<compile_context>
chip_gen: v7x
topology: tpu7x:2x2x1
jax: 0.10.0
libtpu: 0.0.40
codegen_flags: <defaults>
</compile_context>

<pallas_src>
import jax
import jax.numpy as jnp
from jax.experimental import pallas as pl
from jax.experimental.pallas import tpu as pltpu

# ---- model config (Electra-small-like, shrunk for a synthetic test) ----
VOCAB = 512
EMB = 128            # electra "embedding_size"
HID = 256            # electra-small hidden size (module hard-codes last_size=256)
N_HEADS = 4
D_HEAD = HID // N_HEADS
FFN = 1024
N_LAYERS = 2         # shrunk from 12 for a small synthetic test
SEQ = 8
BATCH = 2
MLP_HIDDEN = 512     # hidden_layers=[512]
NEG_INF = -1e9
LN_EPS = 1e-12
N_BRANCH = 2         # evidence / topic encoders
N_LAYER_PARAMS = 12  # wqkv,bqkv,wo,bo,g1,be1,w1,b1,w2,b2,g2,be2


def _layernorm(x, g, b, eps=LN_EPS):
    mu = jnp.mean(x, axis=-1, keepdims=True)
    var = jnp.mean((x - mu) ** 2, axis=-1, keepdims=True)
    return (x - mu) * jax.lax.rsqrt(var + eps) * g + b


# ---------------------------------------------------------------------------
# Pallas kernel: both encoder branches x all layers in one pallas_call.
#   grid = (branch, layer)
#   - branch axis "parallel"  -> megacore sharding on v7x, neutral elsewhere
#   - layer axis "arbitrary"  -> activation carried in the resident output
#                                block (constant out block index across layers)
#   - per-layer weights indexed by (branch, layer) in their BlockSpecs and
#     streamed / double-buffered by the standard pipeline (bf16)
# ---------------------------------------------------------------------------
def encoder_stack_kernel(x_ref, bias_ref,
                         wqkv_ref, bqkv_ref, wo_ref, bo_ref,
                         g1_ref, be1_ref,
                         w1_ref, b1_ref, w2_ref, b2_ref, g2_ref, be2_ref,
                         o_ref):
    layer = pl.program_id(1)

    @pl.when(layer == 0)
    def _():
        o_ref[0] = x_ref[0]          # seed resident activation with embeddings

    x = o_ref[0]                     # (B*S, H) f32, carried across layer axis
    bias = bias_ref[0]               # (B, 1, S) additive attention-mask bias

    def dense(v, w_ref, b_ref):
        # bf16 operands on the MXU, f32 accumulation; bias stays f32.
        return jnp.dot(v.astype(jnp.bfloat16), w_ref[0, 0],
                       preferred_element_type=jnp.float32) + b_ref[0, 0]

    # Fused Q/K/V projection: one (B*S, H) x (H, 3H) matmul.
    qkv = dense(x, wqkv_ref, bqkv_ref)       # (B*S, 3H)
    q = qkv[:, :HID]
    k = qkv[:, HID:2 * HID]
    v = qkv[:, 2 * HID:]

    scale = 1.0 / (D_HEAD ** 0.5)
    # Attention is block-diagonal over the folded batch: static unroll over B.
    ctx_blocks = []
    for b in range(BATCH):
        sl = slice(b * SEQ, (b + 1) * SEQ)
        qb = q[sl].reshape(SEQ, N_HEADS, D_HEAD)
        kb = k[sl].reshape(SEQ, N_HEADS, D_HEAD)
        vb = v[sl].reshape(SEQ, N_HEADS, D_HEAD)
        sc = jnp.einsum('qhd,khd->hqk', qb, kb,
                        preferred_element_type=jnp.float32) * scale
        sc = sc + bias[b][None, :, :]                       # (1,1,S) broadcast
        sc = sc - jnp.max(sc, axis=-1, keepdims=True)
        p = jnp.exp(sc)
        p = p * pl.reciprocal(jnp.sum(p, axis=-1, keepdims=True), approx=True)
        ctx_b = jnp.einsum('hqk,khd->qhd', p, vb,
                           preferred_element_type=jnp.float32)
        ctx_blocks.append(ctx_b.reshape(SEQ, HID))
    ctx = jnp.concatenate(ctx_blocks, axis=0)               # (B*S, H)

    attn_out = dense(ctx, wo_ref, bo_ref)
    x1 = _layernorm(x + attn_out, g1_ref[0, 0], be1_ref[0, 0])

    # TODO(synk): Electra uses exact erf-GELU; tanh-approx GELU used here.
    h = jax.nn.gelu(dense(x1, w1_ref, b1_ref))
    ffn_out = dense(h, w2_ref, b2_ref)
    o_ref[0] = _layernorm(x1 + ffn_out, g2_ref[0, 0], be2_ref[0, 0])


def encoder_stack(x, mask_bias, stacked_params):
    """x: (2, B*S, H) f32; mask_bias: (2, B, 1, S) f32;
    stacked_params: 12 arrays, each (2, N_LAYERS, ...)."""
    weight_specs = [
        pl.BlockSpec((1, 1) + p.shape[2:],
                     lambda br, l, nd=p.ndim: (br, l) + (0,) * (nd - 2))
        for p in stacked_params
    ]
    return pl.pallas_call(
        encoder_stack_kernel,
        out_shape=jax.ShapeDtypeStruct((N_BRANCH, BATCH * SEQ, HID), jnp.float32),
        grid=(N_BRANCH, N_LAYERS),
        in_specs=[pl.BlockSpec((1, BATCH * SEQ, HID), lambda br, l: (br, 0, 0)),
                  pl.BlockSpec((1, BATCH, 1, SEQ), lambda br, l: (br, 0, 0, 0))]
                 + weight_specs,
        out_specs=pl.BlockSpec((1, BATCH * SEQ, HID), lambda br, l: (br, 0, 0)),
        compiler_params=pltpu.CompilerParams(
            dimension_semantics=("parallel", "arbitrary")),
    )(x, mask_bias, *stacked_params)


# ---------------------------------------------------------------------------
# Parameter init (deterministic, synthetic — no checkpoint load)
# ---------------------------------------------------------------------------
def init_backbone(key):
    ks = jax.random.split(key, 4 + N_LAYERS)

    def norm(k, shape, dtype=jnp.float32, scale=0.02):
        return (scale * jax.random.normal(k, shape, jnp.float32)).astype(dtype)

    emb = dict(
        word=norm(ks[0], (VOCAB, EMB)),
        pos=norm(ks[1], (SEQ, EMB)),
        typ=norm(ks[2], (2, EMB)),
        ln_g=jnp.ones((1, EMB), jnp.float32),
        ln_b=jnp.zeros((1, EMB), jnp.float32),
        proj_w=norm(ks[3], (EMB, HID)),
        proj_b=jnp.zeros((1, HID), jnp.float32),
    )
    per_layer = []
    for i in range(N_LAYERS):
        lk = jax.random.split(ks[4 + i], 4)
        per_layer.append([
            norm(lk[0], (HID, 3 * HID), jnp.bfloat16),                        # wqkv (fused)
            jnp.zeros((1, 3 * HID), jnp.float32),                             # bqkv
            norm(lk[1], (HID, HID), jnp.bfloat16), jnp.zeros((1, HID), jnp.float32),  # wo, bo
            jnp.ones((1, HID), jnp.float32), jnp.zeros((1, HID), jnp.float32),        # ln1
            norm(lk[2], (HID, FFN), jnp.bfloat16), jnp.zeros((1, FFN), jnp.float32),  # ffn w1, b1
            norm(lk[3], (FFN, HID), jnp.bfloat16), jnp.zeros((1, HID), jnp.float32),  # ffn w2, b2
            jnp.ones((1, HID), jnp.float32), jnp.zeros((1, HID), jnp.float32),        # ln2
        ])
    # stack over layers -> 12 arrays, each (N_LAYERS, ...)
    layer_stack = [jnp.stack([per_layer[l][j] for l in range(N_LAYERS)])
                   for j in range(N_LAYER_PARAMS)]
    return emb, layer_stack


def init_head(key):
    k1, k2 = jax.random.split(key)
    w1 = 0.02 * jax.random.normal(k1, (HID, MLP_HIDDEN), jnp.float32)
    b1 = jnp.zeros((1, MLP_HIDDEN), jnp.float32)
    w2 = 0.02 * jax.random.normal(k2, (HID, MLP_HIDDEN), jnp.float32)
    b2 = jnp.zeros((1, MLP_HIDDEN), jnp.float32)
    return w1, b1, w2, b2


# ---------------------------------------------------------------------------
# Plain-JAX glue: embeddings, head MLP + dot product
# ---------------------------------------------------------------------------
def embed(ids, emb):
    S = ids.shape[1]
    x = emb['word'][ids] + emb['pos'][None, :S] + emb['typ'][0][None, None]
    x = _layernorm(x, emb['ln_g'], emb['ln_b'])
    x = x @ emb['proj_w'] + emb['proj_b']          # (B, S, H)
    return x.reshape(-1, HID)                      # fold batch -> (B*S, H)


def head(h_ev, h_topic, procon, w1, b1, w2, b2):
    weird = 2.0 * procon.reshape(-1, 1) - 1.0
    e = jnp.maximum(h_ev @ w1 + b1, 0.0)                       # ReLU branch 1
    t = jnp.maximum((h_topic * weird) @ w2 + b2, 0.0)          # ReLU branch 2
    return jnp.sum(e * t, axis=-1, keepdims=True)              # (B, 1)


@jax.jit
def distilbert_dot_product(input_ids_evidence, attention_mask_evidence,
                           input_ids_topic, attention_mask_topic, procon,
                           params_ev, params_topic, head_params):
    emb1, layers1 = params_ev
    emb2, layers2 = params_topic
    w1, b1, w2, b2 = head_params

    x = jnp.stack([embed(input_ids_evidence, emb1),
                   embed(input_ids_topic, emb2)])              # (2, B*S, H)

    def bias_of(mask):
        return ((1.0 - mask.astype(jnp.float32)) * NEG_INF)[:, None, :]  # (B,1,S)

    mask_bias = jnp.stack([bias_of(attention_mask_evidence),
                           bias_of(attention_mask_topic)])     # (2, B, 1, S)

    # stack the two branches' per-layer weights -> 12 arrays (2, N_LAYERS, ...)
    stacked = [jnp.stack([a, b]) for a, b in zip(layers1, layers2)]

    enc_out = encoder_stack(x, mask_bias, stacked)             # (2, B*S, H)
    cls = enc_out.reshape(N_BRANCH, BATCH, SEQ, HID)[:, :, 0, :]  # (2, B, H)
    return head(cls[0], cls[1], procon, w1, b1, w2, b2)


if __name__ == "__main__":
    key = jax.random.PRNGKey(0)
    k_ev, k_top, k_head, k_ids1, k_ids2, k_procon = jax.random.split(key, 6)

    params_ev = init_backbone(k_ev)
    params_topic = init_backbone(k_top)
    head_params = init_head(k_head)

    input_ids_evidence = jax.random.randint(k_ids1, (BATCH, SEQ), 0, VOCAB, jnp.int32)
    attention_mask_evidence = jnp.ones((BATCH, SEQ), jnp.float32)
    input_ids_topic = jax.random.randint(k_ids2, (BATCH, SEQ), 0, VOCAB, jnp.int32)
    attention_mask_topic = jnp.ones((BATCH, SEQ), jnp.float32)
    procon = jax.random.bernoulli(k_procon, 0.5, (BATCH,)).astype(jnp.float32)

    out = distilbert_dot_product(input_ids_evidence, attention_mask_evidence,
                                 input_ids_topic, attention_mask_topic, procon,
                                 params_ev, params_topic, head_params)
    jax.block_until_ready(out)
    assert out.shape == (BATCH, 1) and out.dtype == jnp.float32
    assert bool(jnp.all(jnp.isfinite(out)))
    print("KERNEL_OK")
</pallas_src>

<mosaic_0001>
module attributes {stable_mosaic.version = 11 : i64} {
  func.func @encoder_stack_kernel(%arg0: i32, %arg1: i32, %arg2: memref<1x16x256xf32, #tpu.memory_space<vmem>>, %arg3: memref<1x2x1x8xf32, #tpu.memory_space<vmem>>, %arg4: memref<1x1x256x768xbf16, #tpu.memory_space<vmem>>, %arg5: memref<1x1x1x768xf32, #tpu.memory_space<vmem>>, %arg6: memref<1x1x256x256xbf16, #tpu.memory_space<vmem>>, %arg7: memref<1x1x1x256xf32, #tpu.memory_space<vmem>>, %arg8: memref<1x1x1x256xf32, #tpu.memory_space<vmem>>, %arg9: memref<1x1x1x256xf32, #tpu.memory_space<vmem>>, %arg10: memref<1x1x256x1024xbf16, #tpu.memory_space<vmem>>, %arg11: memref<1x1x1x1024xf32, #tpu.memory_space<vmem>>, %arg12: memref<1x1x1024x256xbf16, #tpu.memory_space<vmem>>, %arg13: memref<1x1x1x256xf32, #tpu.memory_space<vmem>>, %arg14: memref<1x1x1x256xf32, #tpu.memory_space<vmem>>, %arg15: memref<1x1x1x256xf32, #tpu.memory_space<vmem>>, %arg16: memref<1x16x256xf32, #tpu.memory_space<vmem>>) attributes {dimension_semantics = [#tpu.dimension_semantics<parallel>, #tpu.dimension_semantics<arbitrary>], iteration_bounds = array<i64: 2, 2>, scalar_prefetch = 0 : i64, scratch_operands = 0 : i64, tpu.core_type = #tpu.core_type<tc>, window_params = [{transform_indices = @transform_0, window_bounds = array<i64: 1, 16, 256>}, {transform_indices = @transform_1, window_bounds = array<i64: 1, 2, 1, 8>}, {transform_indices = @transform_2, window_bounds = array<i64: 1, 1, 256, 768>}, {transform_indices = @transform_3, window_bounds = array<i64: 1, 1, 1, 768>}, {transform_indices = @transform_4, window_bounds = array<i64: 1, 1, 256, 256>}, {transform_indices = @transform_5, window_bounds = array<i64: 1, 1, 1, 256>}, {transform_indices = @transform_6, window_bounds = array<i64: 1, 1, 1, 256>}, {transform_indices = @transform_7, window_bounds = array<i64: 1, 1, 1, 256>}, {transform_indices = @transform_8, window_bounds = array<i64: 1, 1, 256, 1024>}, {transform_indices = @transform_9, window_bounds = array<i64: 1, 1, 1, 1024>}, {transform_indices = @transform_10, window_bounds = array<i64: 1, 1, 1024, 256>}, {transform_indices = @transform_11, window_bounds = array<i64: 1, 1, 1, 256>}, {transform_indices = @transform_12, window_bounds = array<i64: 1, 1, 1, 256>}, {transform_indices = @transform_13, window_bounds = array<i64: 1, 1, 1, 256>}, {transform_indices = @transform_14, window_bounds = array<i64: 1, 16, 256>}]} {
    %c0_i32 = arith.constant 0 : i32
    %0 = arith.cmpi eq, %arg1, %c0_i32 : i32
    %1 = arith.extui %0 : i1 to i32
    %c0_i32_0 = arith.constant 0 : i32
    %2 = arith.cmpi ne, %1, %c0_i32_0 : i32
    scf.if %2 {
      %c0_85 = arith.constant 0 : index
      %c0_86 = arith.constant 0 : index
      %c0_87 = arith.constant 0 : index
      %167 = vector.load %arg2[%c0_85, %c0_86, %c0_87] : memref<1x16x256xf32, #tpu.memory_space<vmem>>, vector<1x16x256xf32>
      %168 = vector.shape_cast %167 : vector<1x16x256xf32> to vector<16x256xf32>
      %c0_88 = arith.constant 0 : index
      %c0_89 = arith.constant 0 : index
      %c0_90 = arith.constant 0 : index
      %169 = vector.load %arg16[%c0_88, %c0_89, %c0_90] : memref<1x16x256xf32, #tpu.memory_space<vmem>>, vector<1x16x256xf32>
      %170 = vector.shape_cast %169 : vector<1x16x256xf32> to vector<16x256xf32>
      %171 = vector.shape_cast %168 : vector<16x256xf32> to vector<1x16x256xf32>
      tpu.vector_store %arg16[%c0_88, %c0_89, %c0_90], %171 {strides = array<i32>} : memref<1x16x256xf32, #tpu.memory_space<vmem>>, vector<1x16x256xf32>,
    } else {
    }
    %c0 = arith.constant 0 : index
    %c0_1 = arith.constant 0 : index
    %c0_2 = arith.constant 0 : index
    %3 = vector.load %arg16[%c0, %c0_1, %c0_2] : memref<1x16x256xf32, #tpu.memory_space<vmem>>, vector<1x16x256xf32>
    %4 = vector.shape_cast %3 : vector<1x16x256xf32> to vector<16x256xf32>
    %c0_3 = arith.constant 0 : index
    %c0_4 = arith.constant 0 : index
    %c0_5 = arith.constant 0 : index
    %c0_6 = arith.constant 0 : index
    %5 = vector.load %arg3[%c0_3, %c0_4, %c0_5, %c0_6] : memref<1x2x1x8xf32, #tpu.memory_space<vmem>>, vector<1x2x1x8xf32>
    %6 = vector.shape_cast %5 : vector<1x2x1x8xf32> to vector<2x1x8xf32>
    %7 = arith.truncf %4 : vector<16x256xf32> to vector<16x256xbf16>
    %c0_7 = arith.constant 0 : index
    %c0_8 = arith.constant 0 : index
    %c0_9 = arith.constant 0 : index
    %c0_10 = arith.constant 0 : index
    %8 = vector.load %arg4[%c0_7, %c0_8, %c0_9, %c0_10] : memref<1x1x256x768xbf16, #tpu.memory_space<vmem>>, vector<1x1x256x768xbf16>
    %9 = vector.shape_cast %8 : vector<1x1x256x768xbf16> to vector<256x768xbf16>
    %cst = arith.constant dense<0.000000e+00> : vector<16x768xf32>
    %10 = tpu.matmul %7, %9, %cst {dimension_numbers = #tpu.dot_dimension_numbers<[1], [0], [0], [1], [0, 0, 1, 1], [], []>} : vector<16x256xbf16>, vector<256x768xbf16>, vector<16x768xf32> -> vector<16x768xf32>
    %c0_11 = arith.constant 0 : index
    %c0_12 = arith.constant 0 : index
    %c0_13 = arith.constant 0 : index
    %c0_14 = arith.constant 0 : index
    %11 = vector.load %arg5[%c0_11, %c0_12, %c0_13, %c0_14] : memref<1x1x1x768xf32, #tpu.memory_space<vmem>>, vector<1x1x1x768xf32>
    %12 = vector.shape_cast %11 : vector<1x1x1x768xf32> to vector<1x768xf32>
    %13 = vector.broadcast %12 : vector<1x768xf32> to vector<16x768xf32>
    %14 = arith.addf %10, %13 : vector<16x768xf32>
    %15 = vector.extract_strided_slice %14 {offsets = [0, 0], sizes = [16, 256], strides = [1, 1]} : vector<16x768xf32> to vector<16x256xf32>
    %16 = vector.extract_strided_slice %14 {offsets = [0, 256], sizes = [16, 256], strides = [1, 1]} : vector<16x768xf32> to vector<16x256xf32>
    %17 = vector.extract_strided_slice %14 {offsets = [0, 512], sizes = [16, 256], strides = [1, 1]} : vector<16x768xf32> to vector<16x256xf32>
    %18 = vector.extract_strided_slice %15 {offsets = [0, 0], sizes = [8, 256], strides = [1, 1]} : vector<16x256xf32> to vector<8x256xf32>
    %19 = vector.shape_cast %18 : vector<8x256xf32> to vector<8x4x64xf32>
    %20 = vector.extract_strided_slice %16 {offsets = [0, 0], sizes = [8, 256], strides = [1, 1]} : vector<16x256xf32> to vector<8x256xf32>
    %21 = vector.shape_cast %20 : vector<8x256xf32> to vector<8x4x64xf32>
    %22 = vector.extract_strided_slice %17 {offsets = [0, 0], sizes = [8, 256], strides = [1, 1]} : vector<16x256xf32> to vector<8x256xf32>
    %23 = vector.shape_cast %22 : vector<8x256xf32> to vector<8x4x64xf32>
    "tpu.trace_start"() <{level = 10 : i32, message = "qhd,khd->hqk"}> : () -> ()
    %cst_15 = arith.constant dense<0.000000e+00> : vector<4x8x8xf32>
    %24 = tpu.matmul %19, %21, %cst_15 {dimension_numbers = #tpu.dot_dimension_numbers<[2], [2], [0], [0], [0, 1, 0, 0, 1, 0], [1], [1]>} : vector<8x4x64xf32>, vector<8x4x64xf32>, vector<4x8x8xf32> -> vector<4x8x8xf32>
    "tpu.trace_stop"() : () -> ()
    %cst_16 = arith.constant 1.250000e-01 : f32
    %25 = vector.broadcast %cst_16 : f32 to vector<4x8x8xf32>
    %26 = arith.mulf %24, %25 : vector<4x8x8xf32>
    %27 = vector.extract_strided_slice %6 {offsets = [0, 0, 0], sizes = [1, 1, 8], strides = [1, 1, 1]} : vector<2x1x8xf32> to vector<1x1x8xf32>
    %28 = vector.shape_cast %27 : vector<1x1x8xf32> to vector<1x8xf32>
    %29 = vector.shape_cast %28 : vector<1x8xf32> to vector<1x1x8xf32>
    %30 = vector.broadcast %29 : vector<1x1x8xf32> to vector<4x8x8xf32>
    %31 = arith.addf %26, %30 : vector<4x8x8xf32>
    %cst_17 = arith.constant dense<0xFF800000> : vector<4x8xf32>
    %32 = vector.multi_reduction <maximumf>, %31, %cst_17 [2] : vector<4x8x8xf32> to vector<4x8xf32>
    %33 = vector.shape_cast %32 : vector<4x8xf32> to vector<4x8x1xf32>
    %34 = vector.broadcast %33 : vector<4x8x1xf32> to vector<4x8x8xf32>
    %35 = arith.subf %31, %34 : vector<4x8x8xf32>
    %36 = math.exp %35 : vector<4x8x8xf32>
    %cst_18 = arith.constant dense<0.000000e+00> : vector<4x8xf32>
    %37 = vector.multi_reduction <add>, %36, %cst_18 [2] : vector<4x8x8xf32> to vector<4x8xf32>
    %38 = vector.shape_cast %37 : vector<4x8xf32> to vector<4x8x1xf32>
    %39 = tpu.reciprocal %38 {approx = true} : vector<4x8x1xf32> -> vector<4x8x1xf32>
    %40 = vector.broadcast %39 : vector<4x8x1xf32> to vector<4x8x8xf32>
    %41 = arith.mulf %36, %40 : vector<4x8x8xf32>
    "tpu.trace_start"() <{level = 10 : i32, message = "hqk,khd->qhd"}> : () -> ()
    %cst_19 = arith.constant dense<0.000000e+00> : vector<4x64x8xf32>
    %42 = tpu.matmul %23, %41, %cst_19 {dimension_numbers = #tpu.dot_dimension_numbers<[0], [2], [2], [1], [0, 1, 0, 2, 1, 1], [1], [0]>} : vector<8x4x64xf32>, vector<4x8x8xf32>, vector<4x64x8xf32> -> vector<4x64x8xf32>
    %43 = tpu.transpose %42, [2, 0, 1] : vector<4x64x8xf32> -> vector<8x4x64xf32>
    "tpu.trace_stop"() : () -> ()
    %44 = vector.shape_cast %43 : vector<8x4x64xf32> to vector<8x256xf32>
    %45 = vector.extract_strided_slice %15 {offsets = [8, 0], sizes = [8, 256], strides = [1, 1]} : vector<16x256xf32> to vector<8x256xf32>
    %46 = vector.shape_cast %45 : vector<8x256xf32> to vector<8x4x64xf32>
    %47 = vector.extract_strided_slice %16 {offsets = [8, 0], sizes = [8, 256], strides = [1, 1]} : vector<16x256xf32> to vector<8x256xf32>
    %48 = vector.shape_cast %47 : vector<8x256xf32> to vector<8x4x64xf32>
    %49 = vector.extract_strided_slice %17 {offsets = [8, 0], sizes = [8, 256], strides = [1, 1]} : vector<16x256xf32> to vector<8x256xf32>
    %50 = vector.shape_cast %49 : vector<8x256xf32> to vector<8x4x64xf32>
    "tpu.trace_start"() <{level = 10 : i32, message = "qhd,khd->hqk"}> : () -> ()
    %cst_20 = arith.constant dense<0.000000e+00> : vector<4x8x8xf32>
    %51 = tpu.matmul %46, %48, %cst_20 {dimension_numbers = #tpu.dot_dimension_numbers<[2], [2], [0], [0], [0, 1, 0, 0, 1, 0], [1], [1]>} : vector<8x4x64xf32>, vector<8x4x64xf32>, vector<4x8x8xf32> -> vector<4x8x8xf32>
    "tpu.trace_stop"() : () -> ()
    %cst_21 = arith.constant 1.250000e-01 : f32
    %52 = vector.broadcast %cst_21 : f32 to vector<4x8x8xf32>
    %53 = arith.mulf %51, %52 : vector<4x8x8xf32>
    %54 = vector.extract_strided_slice %6 {offsets = [1, 0, 0], sizes = [1, 1, 8], strides = [1, 1, 1]} : vector<2x1x8xf32> to vector<1x1x8xf32>
    %55 = vector.shape_cast %54 : vector<1x1x8xf32> to vector<1x8xf32>
    %56 = vector.shape_cast %55 : vector<1x8xf32> to vector<1x1x8xf32>
    %57 = vector.broadcast %56 : vector<1x1x8xf32> to vector<4x8x8xf32>
    %58 = arith.addf %53, %57 : vector<4x8x8xf32>
    %cst_22 = arith.constant dense<0xFF800000> : vector<4x8xf32>
    %59 = vector.multi_reduction <maximumf>, %58, %cst_22 [2] : vector<4x8x8xf32> to vector<4x8xf32>
    %60 = vector.shape_cast %59 : vector<4x8xf32> to vector<4x8x1xf32>
    %61 = vector.broadcast %60 : vector<4x8x1xf32> to vector<4x8x8xf32>
    %62 = arith.subf %58, %61 : vector<4x8x8xf32>
    %63 = math.exp %62 : vector<4x8x8xf32>
    %cst_23 = arith.constant dense<0.000000e+00> : vector<4x8xf32>
    %64 = vector.multi_reduction <add>, %63, %cst_23 [2] : vector<4x8x8xf32> to vector<4x8xf32>
    %65 = vector.shape_cast %64 : vector<4x8xf32> to vector<4x8x1xf32>
    %66 = tpu.reciprocal %65 {approx = true} : vector<4x8x1xf32> -> vector<4x8x1xf32>
    %67 = vector.broadcast %66 : vector<4x8x1xf32> to vector<4x8x8xf32>
    %68 = arith.mulf %63, %67 : vector<4x8x8xf32>
    "tpu.trace_start"() <{level = 10 : i32, message = "hqk,khd->qhd"}> : () -> ()
    %cst_24 = arith.constant dense<0.000000e+00> : vector<4x64x8xf32>
    %69 = tpu.matmul %50, %68, %cst_24 {dimension_numbers = #tpu.dot_dimension_numbers<[0], [2], [2], [1], [0, 1, 0, 2, 1, 1], [1], [0]>} : vector<8x4x64xf32>, vector<4x8x8xf32>, vector<4x64x8xf32> -> vector<4x64x8xf32>
    %70 = tpu.transpose %69, [2, 0, 1] : vector<4x64x8xf32> -> vector<8x4x64xf32>
    "tpu.trace_stop"() : () -> ()
    %71 = vector.shape_cast %70 : vector<8x4x64xf32> to vector<8x256xf32>
    %72 = tpu.concatenate %44, %71 in 0 : vector<8x256xf32>, vector<8x256xf32> -> vector<16x256xf32>
    %73 = arith.truncf %72 : vector<16x256xf32> to vector<16x256xbf16>
    %c0_25 = arith.constant 0 : index
    %c0_26 = arith.constant 0 : index
    %c0_27 = arith.constant 0 : index
    %c0_28 = arith.constant 0 : index
    %74 = vector.load %arg6[%c0_25, %c0_26, %c0_27, %c0_28] : memref<1x1x256x256xbf16, #tpu.memory_space<vmem>>, vector<1x1x256x256xbf16>
    %75 = vector.shape_cast %74 : vector<1x1x256x256xbf16> to vector<256x256xbf16>
    %cst_29 = arith.constant dense<0.000000e+00> : vector<16x256xf32>
    %76 = tpu.matmul %73, %75, %cst_29 {dimension_numbers = #tpu.dot_dimension_numbers<[1], [0], [0], [1], [0, 0, 1, 1], [], []>} : vector<16x256xbf16>, vector<256x256xbf16>, vector<16x256xf32> -> vector<16x256xf32>
    %c0_30 = arith.constant 0 : index
    %c0_31 = arith.constant 0 : index
    %c0_32 = arith.constant 0 : index
    %c0_33 = arith.constant 0 : index
    %77 = vector.load %arg7[%c0_30, %c0_31, %c0_32, %c0_33] : memref<1x1x1x256xf32, #tpu.memory_space<vmem>>, vector<1x1x1x256xf32>
    %78 = vector.shape_cast %77 : vector<1x1x1x256xf32> to vector<1x256xf32>
    %79 = vector.broadcast %78 : vector<1x256xf32> to vector<16x256xf32>
    %80 = arith.addf %76, %79 : vector<16x256xf32>
    %81 = arith.addf %4, %80 : vector<16x256xf32>
    %c0_34 = arith.constant 0 : index
    %c0_35 = arith.constant 0 : index
    %c0_36 = arith.constant 0 : index
    %c0_37 = arith.constant 0 : index
    %82 = vector.load %arg8[%c0_34, %c0_35, %c0_36, %c0_37] : memref<1x1x1x256xf32, #tpu.memory_space<vmem>>, vector<1x1x1x256xf32>
    %83 = vector.shape_cast %82 : vector<1x1x1x256xf32> to vector<1x256xf32>
    %c0_38 = arith.constant 0 : index
    %c0_39 = arith.constant 0 : index
    %c0_40 = arith.constant 0 : index
    %c0_41 = arith.constant 0 : index
    %84 = vector.load %arg9[%c0_38, %c0_39, %c0_40, %c0_41] : memref<1x1x1x256xf32, #tpu.memory_space<vmem>>, vector<1x1x1x256xf32>
    %85 = vector.shape_cast %84 : vector<1x1x1x256xf32> to vector<1x256xf32>
    %cst_42 = arith.constant dense<0.000000e+00> : vector<16xf32>
    %86 = vector.multi_reduction <add>, %81, %cst_42 [1] : vector<16x256xf32> to vector<16xf32>
    %87 = vector.shape_cast %86 : vector<16xf32> to vector<16x1xf32>
    %cst_43 = arith.constant 2.560000e+02 : f32
    %88 = vector.broadcast %cst_43 : f32 to vector<16x1xf32>
    %89 = arith.divf %87, %88 : vector<16x1xf32>
    %90 = vector.broadcast %89 : vector<16x1xf32> to vector<16x256xf32>
    %91 = arith.subf %81, %90 : vector<16x256xf32>
    %92 = arith.mulf %91, %91 : vector<16x256xf32>
    %cst_44 = arith.constant dense<0.000000e+00> : vector<16xf32>
    %93 = vector.multi_reduction <add>, %92, %cst_44 [1] : vector<16x256xf32> to vector<16xf32>
    %94 = vector.shape_cast %93 : vector<16xf32> to vector<16x1xf32>
    %cst_45 = arith.constant 2.560000e+02 : f32
    %95 = vector.broadcast %cst_45 : f32 to vector<16x1xf32>
    %96 = arith.divf %94, %95 : vector<16x1xf32>
    %97 = vector.broadcast %89 : vector<16x1xf32> to vector<16x256xf32>
    %98 = arith.subf %81, %97 : vector<16x256xf32>
    %cst_46 = arith.constant 9.99999996E-13 : f32
    %99 = vector.broadcast %cst_46 : f32 to vector<16x1xf32>
    %100 = arith.addf %96, %99 : vector<16x1xf32>
    %101 = math.rsqrt %100 : vector<16x1xf32>
    %102 = vector.broadcast %101 : vector<16x1xf32> to vector<16x256xf32>
    %103 = arith.mulf %98, %102 : vector<16x256xf32>
    %104 = vector.broadcast %83 : vector<1x256xf32> to vector<16x256xf32>
    %105 = arith.mulf %103, %104 : vector<16x256xf32>
    %106 = vector.broadcast %85 : vector<1x256xf32> to vector<16x256xf32>
    %107 = arith.addf %105, %106 : vector<16x256xf32>
    %108 = arith.truncf %107 : vector<16x256xf32> to vector<16x256xbf16>
    %c0_47 = arith.constant 0 : index
    %c0_48 = arith.constant 0 : index
    %c0_49 = arith.constant 0 : index
    %c0_50 = arith.constant 0 : index
    %109 = vector.load %arg10[%c0_47, %c0_48, %c0_49, %c0_50] : memref<1x1x256x1024xbf16, #tpu.memory_space<vmem>>, vector<1x1x256x1024xbf16>
    %110 = vector.shape_cast %109 : vector<1x1x256x1024xbf16> to vector<256x1024xbf16>
    %cst_51 = arith.constant dense<0.000000e+00> : vector<16x1024xf32>
    %111 = tpu.matmul %108, %110, %cst_51 {dimension_numbers = #tpu.dot_dimension_numbers<[1], [0], [0], [1], [0, 0, 1, 1], [], []>} : vector<16x256xbf16>, vector<256x1024xbf16>, vector<16x1024xf32> -> vector<16x1024xf32>
    %c0_52 = arith.constant 0 : index
    %c0_53 = arith.constant 0 : index
    %c0_54 = arith.constant 0 : index
    %c0_55 = arith.constant 0 : index
    %112 = vector.load %arg11[%c0_52, %c0_53, %c0_54, %c0_55] : memref<1x1x1x1024xf32, #tpu.memory_space<vmem>>, vector<1x1x1x1024xf32>
    %113 = vector.shape_cast %112 : vector<1x1x1x1024xf32> to vector<1x1024xf32>
    %114 = vector.broadcast %113 : vector<1x1024xf32> to vector<16x1024xf32>
    %115 = arith.addf %111, %114 : vector<16x1024xf32>
    %116 = arith.mulf %115, %115 : vector<16x1024xf32>
    %117 = arith.mulf %115, %116 : vector<16x1024xf32>
    %cst_56 = arith.constant 4.471500e-02 : f32
    %118 = vector.broadcast %cst_56 : f32 to vector<16x1024xf32>
    %119 = arith.mulf %118, %117 : vector<16x1024xf32>
    %120 = arith.addf %115, %119 : vector<16x1024xf32>
    %cst_57 = arith.constant 0.797884583 : f32
    %121 = vector.broadcast %cst_57 : f32 to vector<16x1024xf32>
    %122 = arith.mulf %121, %120 : vector<16x1024xf32>
    %123 = math.tanh %122 : vector<16x1024xf32>
    %cst_58 = arith.constant 1.000000e+00 : f32
    %124 = vector.broadcast %cst_58 : f32 to vector<16x1024xf32>
    %125 = arith.addf %124, %123 : vector<16x1024xf32>
    %cst_59 = arith.constant 5.000000e-01 : f32
    %126 = vector.broadcast %cst_59 : f32 to vector<16x1024xf32>
    %127 = arith.mulf %126, %125 : vector<16x1024xf32>
    %128 = arith.mulf %115, %127 : vector<16x1024xf32>
    %129 = arith.truncf %128 : vector<16x1024xf32> to vector<16x1024xbf16>
    %c0_60 = arith.constant 0 : index
    %c0_61 = arith.constant 0 : index
    %c0_62 = arith.constant 0 : index
    %c0_63 = arith.constant 0 : index
    %130 = vector.load %arg12[%c0_60, %c0_61, %c0_62, %c0_63] : memref<1x1x1024x256xbf16, #tpu.memory_space<vmem>>, vector<1x1x1024x256xbf16>
    %131 = vector.shape_cast %130 : vector<1x1x1024x256xbf16> to vector<1024x256xbf16>
    %cst_64 = arith.constant dense<0.000000e+00> : vector<16x256xf32>
    %132 = tpu.matmul %129, %131, %cst_64 {dimension_numbers = #tpu.dot_dimension_numbers<[1], [0], [0], [1], [0, 0, 1, 1], [], []>} : vector<16x1024xbf16>, vector<1024x256xbf16>, vector<16x256xf32> -> vector<16x256xf32>
    %c0_65 = arith.constant 0 : index
    %c0_66 = arith.constant 0 : index
    %c0_67 = arith.constant 0 : index
    %c0_68 = arith.constant 0 : index
    %133 = vector.load %arg13[%c0_65, %c0_66, %c0_67, %c0_68] : memref<1x1x1x256xf32, #tpu.memory_space<vmem>>, vector<1x1x1x256xf32>
    %134 = vector.shape_cast %133 : vector<1x1x1x256xf32> to vector<1x256xf32>
    %135 = vector.broadcast %134 : vector<1x256xf32> to vector<16x256xf32>
    %136 = arith.addf %132, %135 : vector<16x256xf32>
    %137 = arith.addf %107, %136 : vector<16x256xf32>
    %c0_69 = arith.constant 0 : index
    %c0_70 = arith.constant 0 : index
    %c0_71 = arith.constant 0 : index
    %c0_72 = arith.constant 0 : index
    %138 = vector.load %arg14[%c0_69, %c0_70, %c0_71, %c0_72] : memref<1x1x1x256xf32, #tpu.memory_space<vmem>>, vector<1x1x1x256xf32>
    %139 = vector.shape_cast %138 : vector<1x1x1x256xf32> to vector<1x256xf32>
    %c0_73 = arith.constant 0 : index
    %c0_74 = arith.constant 0 : index
    %c0_75 = arith.constant 0 : index
    %c0_76 = arith.constant 0 : index
    %140 = vector.load %arg15[%c0_73, %c0_74, %c0_75, %c0_76] : memref<1x1x1x256xf32, #tpu.memory_space<vmem>>, vector<1x1x1x256xf32>
    %141 = vector.shape_cast %140 : vector<1x1x1x256xf32> to vector<1x256xf32>
    %cst_77 = arith.constant dense<0.000000e+00> : vector<16xf32>
    %142 = vector.multi_reduction <add>, %137, %cst_77 [1] : vector<16x256xf32> to vector<16xf32>
    %143 = vector.shape_cast %142 : vector<16xf32> to vector<16x1xf32>
    %cst_78 = arith.constant 2.560000e+02 : f32
    %144 = vector.broadcast %cst_78 : f32 to vector<16x1xf32>
    %145 = arith.divf %143, %144 : vector<16x1xf32>
    %146 = vector.broadcast %145 : vector<16x1xf32> to vector<16x256xf32>
    %147 = arith.subf %137, %146 : vector<16x256xf32>
    %148 = arith.mulf %147, %147 : vector<16x256xf32>
    %cst_79 = arith.constant dense<0.000000e+00> : vector<16xf32>
    %149 = vector.multi_reduction <add>, %148, %cst_79 [1] : vector<16x256xf32> to vector<16xf32>
    %150 = vector.shape_cast %149 : vector<16xf32> to vector<16x1xf32>
    %cst_80 = arith.constant 2.560000e+02 : f32
    %151 = vector.broadcast %cst_80 : f32 to vector<16x1xf32>
    %152 = arith.divf %150, %151 : vector<16x1xf32>
    %153 = vector.broadcast %145 : vector<16x1xf32> to vector<16x256xf32>
    %154 = arith.subf %137, %153 : vector<16x256xf32>
    %cst_81 = arith.constant 9.99999996E-13 : f32
    %155 = vector.broadcast %cst_81 : f32 to vector<16x1xf32>
    %156 = arith.addf %152, %155 : vector<16x1xf32>
    %157 = math.rsqrt %156 : vector<16x1xf32>
    %158 = vector.broadcast %157 : vector<16x1xf32> to vector<16x256xf32>
    %159 = arith.mulf %154, %158 : vector<16x256xf32>
    %160 = vector.broadcast %139 : vector<1x256xf32> to vector<16x256xf32>
    %161 = arith.mulf %159, %160 : vector<16x256xf32>
    %162 = vector.broadcast %141 : vector<1x256xf32> to vector<16x256xf32>
    %163 = arith.addf %161, %162 : vector<16x256xf32>
    %c0_82 = arith.constant 0 : index
    %c0_83 = arith.constant 0 : index
    %c0_84 = arith.constant 0 : index
    %164 = vector.load %arg16[%c0_82, %c0_83, %c0_84] : memref<1x16x256xf32, #tpu.memory_space<vmem>>, vector<1x16x256xf32>
    %165 = vector.shape_cast %164 : vector<1x16x256xf32> to vector<16x256xf32>
    %166 = vector.shape_cast %163 : vector<16x256xf32> to vector<1x16x256xf32>
    tpu.vector_store %arg16[%c0_82, %c0_83, %c0_84], %166 {strides = array<i32>} : memref<1x16x256xf32, #tpu.memory_space<vmem>>, vector<1x16x256xf32>,
    return
  }
  func.func @transform_0(%arg0: i32, %arg1: i32) -> (i32, i32, i32) {
    %c0_i32 = arith.constant 0 : i32
    %c0_i32_0 = arith.constant 0 : i32
    %c0_i32_1 = arith.constant 0 : i32
    return %arg0, %c0_i32, %c0_i32_0 : i32, i32, i32
  }
  func.func @transform_1(%arg0: i32, %arg1: i32) -> (i32, i32, i32, i32) {
    %c0_i32 = arith.constant 0 : i32
    %c0_i32_0 = arith.constant 0 : i32
    %c0_i32_1 = arith.constant 0 : i32
    %c0_i32_2 = arith.constant 0 : i32
    return %arg0, %c0_i32, %c0_i32_0, %c0_i32_1 : i32, i32, i32, i32
  }
  func.func @transform_2(%arg0: i32, %arg1: i32) -> (i32, i32, i32, i32) {
    %c0_i32 = arith.constant 0 : i32
    %c0_i32_0 = arith.constant 0 : i32
    %c0_i32_1 = arith.constant 0 : i32
    return %arg0, %arg1, %c0_i32, %c0_i32_0 : i32, i32, i32, i32
  }
  func.func @transform_3(%arg0: i32, %arg1: i32) -> (i32, i32, i32, i32) {
    %c0_i32 = arith.constant 0 : i32
    %c0_i32_0 = arith.constant 0 : i32
    %c0_i32_1 = arith.constant 0 : i32
    return %arg0, %arg1, %c0_i32, %c0_i32_0 : i32, i32, i32, i32
  }
  func.func @transform_4(%arg0: i32, %arg1: i32) -> (i32, i32, i32, i32) {
    %c0_i32 = arith.constant 0 : i32
    %c0_i32_0 = arith.constant 0 : i32
    %c0_i32_1 = arith.constant 0 : i32
    return %arg0, %arg1, %c0_i32, %c0_i32_0 : i32, i32, i32, i32
  }
  func.func @transform_5(%arg0: i32, %arg1: i32) -> (i32, i32, i32, i32) {
    %c0_i32 = arith.constant 0 : i32
    %c0_i32_0 = arith.constant 0 : i32
    %c0_i32_1 = arith.constant 0 : i32
    return %arg0, %arg1, %c0_i32, %c0_i32_0 : i32, i32, i32, i32
  }
  func.func @transform_6(%arg0: i32, %arg1: i32) -> (i32, i32, i32, i32) {
    %c0_i32 = arith.constant 0 : i32
    %c0_i32_0 = arith.constant 0 : i32
    %c0_i32_1 = arith.constant 0 : i32
    return %arg0, %arg1, %c0_i32, %c0_i32_0 : i32, i32, i32, i32
  }
  func.func @transform_7(%arg0: i32, %arg1: i32) -> (i32, i32, i32, i32) {
    %c0_i32 = arith.constant 0 : i32
    %c0_i32_0 = arith.constant 0 : i32
    %c0_i32_1 = arith.constant 0 : i32
    return %arg0, %arg1, %c0_i32, %c0_i32_0 : i32, i32, i32, i32
  }
  func.func @transform_8(%arg0: i32, %arg1: i32) -> (i32, i32, i32, i32) {
    %c0_i32 = arith.constant 0 : i32
    %c0_i32_0 = arith.constant 0 : i32
    %c0_i32_1 = arith.constant 0 : i32
    return %arg0, %arg1, %c0_i32, %c0_i32_0 : i32, i32, i32, i32
  }
  func.func @transform_9(%arg0: i32, %arg1: i32) -> (i32, i32, i32, i32) {
    %c0_i32 = arith.constant 0 : i32
    %c0_i32_0 = arith.constant 0 : i32
    %c0_i32_1 = arith.constant 0 : i32
    return %arg0, %arg1, %c0_i32, %c0_i32_0 : i32, i32, i32, i32
  }
  func.func @transform_10(%arg0: i32, %arg1: i32) -> (i32, i32, i32, i32) {
    %c0_i32 = arith.constant 0 : i32
    %c0_i32_0 = arith.constant 0 : i32
    %c0_i32_1 = arith.constant 0 : i32
    return %arg0, %arg1, %c0_i32, %c0_i32_0 : i32, i32, i32, i32
  }
  func.func @transform_11(%arg0: i32, %arg1: i32) -> (i32, i32, i32, i32) {
    %c0_i32 = arith.constant 0 : i32
    %c0_i32_0 = arith.constant 0 : i32
    %c0_i32_1 = arith.constant 0 : i32
    return %arg0, %arg1, %c0_i32, %c0_i32_0 : i32, i32, i32, i32
  }
  func.func @transform_12(%arg0: i32, %arg1: i32) -> (i32, i32, i32, i32) {
    %c0_i32 = arith.constant 0 : i32
    %c0_i32_0 = arith.constant 0 : i32
    %c0_i32_1 = arith.constant 0 : i32
    return %arg0, %arg1, %c0_i32, %c0_i32_0 : i32, i32, i32, i32
  }
  func.func @transform_13(%arg0: i32, %arg1: i32) -> (i32, i32, i32, i32) {
    %c0_i32 = arith.constant 0 : i32
    %c0_i32_0 = arith.constant 0 : i32
    %c0_i32_1 = arith.constant 0 : i32
    return %arg0, %arg1, %c0_i32, %c0_i32_0 : i32, i32, i32, i32
  }
  func.func @transform_14(%arg0: i32, %arg1: i32) -> (i32, i32, i32) {
    %c0_i32 = arith.constant 0 : i32
    %c0_i32_0 = arith.constant 0 : i32
    %c0_i32_1 = arith.constant 0 : i32
    return %arg0, %c0_i32, %c0_i32_0 : i32, i32, i32
  }
}

</mosaic_0001>

<bundles_post_ra>
// kernel: distilbert_dot_product.1
= control target key start
LH: loop header
LB: loop body
LE: loop exit
PB: predicated region body
PF: predicated region fallthrough
CT: control target
= control target key end

     0   :  { %s9082_s29 = smov 0   ;;  %s9084_s30 = smov 0   ;;  %s10398_s0 = inlined_call_operand.vmem [shape: f32[2,16,256], index: 0, kind: input, shape index: {}]   ;;  %s10399_s1 = inlined_call_operand.vmem [shape: f32[2,2,1,8], index: 1, kind: input, shape index: {}]   ;;  %s10400_s2 = inlined_call_operand.vmem [shape: bf16[2,2,256,768], index: 2, kind: input, shape index: {}]   ;;  %s10401_s3 = inlined_call_operand.vmem [shape: f32[2,2,1,768], index: 3, kind: input, shape index: {}]   ;;  %s10402_s4 = inlined_call_operand.vmem [shape: bf16[2,2,256,256], index: 4, kind: input, shape index: {}]   ;;  %s10403_s5 = inlined_call_operand.vmem [shape: f32[2,2,1,256], index: 5, kind: input, shape index: {}]   ;;  %s10404_s6 = inlined_call_operand.vmem [shape: f32[2,2,1,256], index: 6, kind: input, shape index: {}]   ;;  %s10405_s7 = inlined_call_operand.vmem [shape: f32[2,2,1,256], index: 7, kind: input, shape index: {}]   ;;  %s10406_s8 = inlined_call_operand.vmem [shape: bf16[2,2,256,1024], index: 8, kind: input, shape index: {}]   ;;  %s10407_s9 = inlined_call_operand.vmem [shape: f32[2,2,1,1024], index: 9, kind: input, shape index: {}]   ;;  %s10408_s10 = inlined_call_operand.vmem [shape: bf16[2,2,1024,256], index: 10, kind: input, shape index: {}]   ;;  %s10409_s11 = inlined_call_operand.vmem [shape: f32[2,2,1,256], index: 11, kind: input, shape index: {}]   ;;  %s10410_s12 = inlined_call_operand.vmem [shape: f32[2,2,1,256], index: 12, kind: input, shape index: {}]   ;;  %s10411_s13 = inlined_call_operand.vmem [shape: f32[2,2,1,256], index: 13, kind: input, shape index: {}]   ;;  %s10412_s14 = inlined_call_operand.vmem [shape: f32[2,16,256], index: 14, kind: output, shape index: {}]  }
   0x1   :  { %10421 = sst [smem:[#allocation11_spill]] %s10398_s0  ;;  %s9086_s15 = smov 0  }
   0x2   :  { %10422 = sst [smem:[#allocation12_spill]] %s10399_s1  ;;  %s9088_s16 = smov 0  }
   0x3   :  { %10423 = sst [smem:[#allocation13_spill]] %s10400_s2  ;;  %s9090_s17 = smov 0  }
   0x4   :  { %10424 = sst [smem:[#allocation14_spill]] %s10401_s3 }
   0x5   :  { %10425 = sst [smem:[#allocation15_spill]] %s10402_s4 }
   0x6   :  { %10426 = sst [smem:[#allocation16_spill]] %s10406_s8 }
   0x7   :  { %10427 = sst [smem:[#allocation17_spill]] %s10407_s9 }
   0x8   :  { %10428 = sst [smem:[#allocation18_spill]] %s10411_s13 }
   0x9   :  { %10429 = sst [smem:[#allocation19_spill]] %s10412_s14 }
   0xa LB: > { %10430 = sst [smem:[#allocation2_spill]] %s8983_s29  ;;  %s33_s18 = sadd.s32 1, %s8991_s15  ;;  %s8999_s17 = sphi %s9090_s17, %s24_s17   ;;  %s8995_s16 = sphi %s9088_s16, %s10465_s16   ;;  %s8991_s15 = sphi %s9086_s15, %s10464_s15   ;;  %s8987_s30 = sphi %s9084_s30, %s10463_s30   ;;  %s8983_s29 = sphi %s9082_s29, %s10462_s29  }
   0xb   : > { %10431 = sst [smem:[#allocation3_spill]] %s8991_s15  ;;  %s36_s19 = sadd.s32 1, %s8995_s16 }
   0xc   : > { %10432 = sst [smem:[#allocation4_spill]] %s8995_s16  ;;  %p34_p0 = scmp.ge.s32.totalorder %s33_s18, 2 }
   0xd   : > { %10433 = sst [smem:[#allocation5_spill]] %s8999_s17  ;;  %p7280_p1 = scmp.ge.s32.totalorder %s8999_s17, 1 }
   0xe   : > { %p617_p2 = scmp.lt.s32.totalorder %s8999_s17, 5  ;;  %s10467_s18 = smov (%p34_p0, %s33_s18), 0 }
   0xf   : > { %10434 = sst [smem:[#allocation6_spill]] %s10467_s18  ;;  %s10469_s19 = smov (!%p34_p0, %s36_s19), %s8995_s16 }
  0x10   : > { %p618_p3 = pnand %p7280_p1, %p617_p2  ;;  %p38_p4 = scmp.ge.s32.totalorder %s10469_s19, 2 }
  0x12   : > { %s10471_s19 = smov (%p38_p4, %s10469_s19), 0  ;;  %621 = sbr.rel (%p618_p3) target bundleno = 4023 (0xfb7), region = 76 }
  0x13   : > { %10435 = sst [smem:[#allocation7_spill]] %s10471_s19 }
  0x19   : > { %p767_p5 = scmp.lt.s32.totalorder %s8987_s30, 1  ;;  %p778_p6 = scmp.lt.s32.totalorder %s8983_s29, 1 }
  0x1a   : > { %s10436_s0 = sld [smem:[#allocation11_spill]]  ;;  %s10437_s1 = sld [smem:[#allocation12_spill]] }
  0x1b   : > { %s10473_s30 = smov (!%p767_p5, %s8987_s30), 1  ;;  %s10439_s2 = sld [smem:[#allocation13_spill]] }
  0x1c   : > { %s9118_s20 = scalar_select %p778_p6, %s8983_s29, 1 }
  0x1d   : > { %s10417_s21 = sshll.u32 %s10473_s30, 5  ;;  %s7283_s22 = sshll.u32 %s10473_s30, 1 }
  0x1e   : > { %s8305_s19 = smul.u32 192, %s9118_s20  ;;  %s7285_s18 = sshll.u32 %s9118_s20, 6 }
  0x1f   : > { %s8306_s16 = smul.u32 384, %s10473_s30  ;;  %s7286_s15 = sshll.u32 %s10473_s30, 7 }
  0x20   : > { %s9127_s25 = scalar_lea.vmem %s10436_s0, %s10417_s21  ;;  %s9132_s28 = scalar_lea.vmem %s10437_s1, %s7283_s22 }
  0x21   : > { %10438 = sst [smem:[#allocation8_spill]] %s9132_s28  ;;  %s8307_s17 = smul.u32 6, %s9118_s20 }
  0x22   : > { %s799_s29 = sadd.s32 %s7286_s15, %s7285_s18  ;;  %s782_s14 = sadd.s32 %s8306_s16, %s8305_s19 }
  0x23   : > { %s8308_s13 = smul.u32 12, %s10473_s30  ;;  %s7284_s23 = sshll.u32 %s782_s14, 2 }
  0x24   : > { %s7287_s24 = sshll.u32 %s799_s29, 2  ;;  %s9143_s22 = scalar_lea.vmem %s10439_s2, %s7284_s23 }
  0x25   : > { %s9145_s26 = sadd.s32 %s8308_s13, %s8307_s17  ;;  %s10442_s4 = sld [smem:[#allocation15_spill]] }
  0x26   : > { %10440 = sst [smem:[#allocation9_spill]] %s9145_s26  ;;  %s7288_s14 = sshll.u32 %s9118_s20, 1 }
  0x27   : > { %s7289_s29 = sshll.u32 %s10473_s30, 2  ;;  %s7294_s0 = sshll.u32 %s9118_s20, 8 }
  0x28   : > { %s9158_s19 = sadd.s32 %s7289_s29, %s7288_s14  ;;  %s7295_s14 = sshll.u32 %s10473_s30, 9 }
  0x29   : > { %s832_s29 = sadd.s32 %s7295_s14, %s7294_s0  ;;  %s7297_s28 = sshll.u32 %s9118_s20, 3 }
  0x2a   : > { %s7296_s2 = sshll.u32 %s832_s29, 2  ;;  %s10444_s8 = sld [smem:[#allocation16_spill]] }
  0x2b   : > { %s9154_s16 = scalar_lea.vmem %s10442_s4, %s7287_s24  ;;  %s7298_s4 = sshll.u32 %s10473_s30, 4 }
  0x2c   : > { %10443 = sst [smem:[#allocation10_spill]] %s9154_s16  ;;  %s9181_s13 = sadd.s32 %s7298_s4, %s7297_s28 }
  0x2d   : > { %s9190_s15 = scalar_lea.vmem %s10408_s10, %s7296_s2  ;;  %s859_s14 = scalar_lea.vmem %s10409_s11, %s9158_s19 }
  0x2e   : > { %s867_s16 = scalar_lea.vmem %s10410_s12, %s9158_s19  ;;  %s10446_s18 = sld [smem:[#allocation18_spill]] }
  0x2f   : > { %s10448_s23 = sld [smem:[#allocation19_spill]] }
  0x30   : > { %s9179_s26 = scalar_lea.vmem %s10444_s8, %s7296_s2  ;;  %s10447_s8 = sshll.u32 %s10473_s30, 5 }
  0x31   : > { %s10449_s2 = sld [smem:[#allocation2_spill]] }
  0x34   : > { %s875_s1 = scalar_lea.vmem %s10446_s18, %s9158_s19 }
  0x35   : > { %s9209_s9 = scalar_lea.vmem %s10448_s23, %s10447_s8 }
  0x37   : > { %p7310_p7 = scmp.ne.s32.totalorder %s10449_s2, 0 }
  0x38   : > { %v885_v0 = vld [vmem:[%s9127_s25] sm:$0xff] (!%p7310_p7)  ;;  %v886_v1 = vld [vmem:[%s9127_s25 + $0x8] sm:$0xff] (!%p7310_p7)  ;;  %v887_v2 = vld [vmem:[%s9127_s25 + $0x10] sm:$0xff] (!%p7310_p7) }
  0x39   : > { %884 = sbr.rel (%p7310_p7) target bundleno = 64 (0x40), region = 80  ;;  %889 = vst [vmem:[%s9209_s9] sm:$0xff] (!%p7310_p7), %v885_v0  ;;  %890 = vst [vmem:[%s9209_s9 + $0x8] sm:$0xff] (!%p7310_p7), %v886_v1  ;;  %v888_v3 = vld [vmem:[%s9127_s25 + $0x18] sm:$0xff] (!%p7310_p7) }
  0x3a   : > { %891 = vst [vmem:[%s9209_s9 + $0x10] sm:$0xff] (!%p7310_p7), %v887_v2  ;;  %892 = vst [vmem:[%s9209_s9 + $0x18] sm:$0xff] (!%p7310_p7), %v888_v3 }
  0x40 PF: > { %v8501_v4 = vld [vmem:[%s9143_s22 + $0x4] ss:$24 sps:$4 sm:$0xff]   ;;  %v8503_v5 = vld [vmem:[%s9143_s22] ss:$24 sps:$4 sm:$0xff]   ;;  %v8504_v6 = vld [vmem:[%s9143_s22 + $0x34] ss:$24 sps:$4 sm:$0xff]   ;;  %s10455_s29 = scalar_lea.vmem %s10403_s5, %s9158_s19  ;;  %s10456_s28 = scalar_lea.vmem %s10404_s6, %s9158_s19 }
  0x41   : > { %1509 = vmatprep.subr.bf16.mxu1 %v8501_v4  ;;  %v8506_v7 = vld [vmem:[%s9143_s22 + $0x30] ss:$24 sps:$4 sm:$0xff]   ;;  %v8507_v8 = vld [vmem:[%s9143_s22 + $0x64] ss:$24 sps:$4 sm:$0xff]   ;;  %v8509_v9 = vld [vmem:[%s9143_s22 + $0x60] ss:$24 sps:$4 sm:$0xff]   ;;  %s10457_s2 = scalar_lea.vmem %s10405_s7, %s9158_s19 }
  0x42   : > { %1510 = vmatpush1.bf16.msra.mxu1 %v8503_v5  ;;  %v8510_v10 = vld [vmem:[%s9143_s22 + $0x94] ss:$24 sps:$4 sm:$0xff]   ;;  %v8512_v11 = vld [vmem:[%s9143_s22 + $0x90] ss:$24 sps:$4 sm:$0xff]   ;;  %v8513_v12 = vld [vmem:[%s9143_s22 + $0xc4] ss:$24 sps:$4 sm:$0xff]  }
  0x43   : > { %1511 = vmatprep.subr.bf16.mxu1 %v8504_v6  ;;  %v8515_v13 = vld [vmem:[%s9143_s22 + $0xc0] ss:$24 sps:$4 sm:$0xff]   ;;  %v8516_v14 = vld [vmem:[%s9143_s22 + $0xf4] ss:$24 sps:$4 sm:$0xff]   ;;  %v8518_v15 = vld [vmem:[%s9143_s22 + $0xf0] ss:$24 sps:$4 sm:$0xff]  }
  0x44   : > { %v8519_v16 = vld [vmem:[%s9143_s22 + $0x124] ss:$24 sps:$4 sm:$0xff]   ;;  %v894_v17 = vld [vmem:[%s9209_s9 + $0x8] sm:$0xff]  ;;  %v8521_v20 = vld [vmem:[%s9143_s22 + $0x120] ss:$24 sps:$4 sm:$0xff]   ;;  %s10450_s8 = sld [smem:[#allocation9_spill]] }
  0x45   : > { %v896_v18 = vld [vmem:[%s9209_s9 + $0x18] sm:$0xff]  ;;  %v8522_v21 = vld [vmem:[%s9143_s22 + $0x154] ss:$24 sps:$4 sm:$0xff]   ;;  %v8524_v22 = vld [vmem:[%s9143_s22 + $0x150] ss:$24 sps:$4 sm:$0xff]   ;;  %s10451_s24 = sld [smem:[#allocation14_spill]] }
  0x46   : > { %1512 = vmatpush1.bf16.msra.mxu1 %v8506_v7  ;;  %v900_v19 = vpack.c.bf16 %v896_v18, %v894_v17  ;;  %v8525_v23 = vld [vmem:[%s9143_s22 + $0x184] ss:$24 sps:$4 sm:$0xff]   ;;  %v8527_v24 = vld [vmem:[%s9143_s22 + $0x180] ss:$24 sps:$4 sm:$0xff]   ;;  %v8528_v25 = vld [vmem:[%s9143_s22 + $0x1b4] ss:$24 sps:$4 sm:$0xff]  }
  0x47   : > { %1513 = vmatprep.subr.bf16.mxu1 %v8507_v8  ;;  %v8530_v26 = vld [vmem:[%s9143_s22 + $0x1b0] ss:$24 sps:$4 sm:$0xff]   ;;  %v8531_v27 = vld [vmem:[%s9143_s22 + $0x1e4] ss:$24 sps:$4 sm:$0xff]   ;;  %v8533_v28 = vld [vmem:[%s9143_s22 + $0x1e0] ss:$24 sps:$4 sm:$0xff]  }
  0x48   : > { %1541 = vmatprep.mubr.bf16.mxu1 %v900_v19  ;;  %1627 = vmatprep.mubr.bf16.mxu0 %v900_v19  ;;  %v8534_v29 = vld [vmem:[%s9143_s22 + $0x214] ss:$24 sps:$4 sm:$0xff]   ;;  %v8536_v30 = vld [vmem:[%s9143_s22 + $0x210] ss:$24 sps:$4 sm:$0xff]   ;;  %v8537_v31 = vld [vmem:[%s9143_s22 + $0x244] ss:$24 sps:$4 sm:$0xff]  }
  0x49   : > { %v8539_v32 = vld [vmem:[%s9143_s22 + $0x240] ss:$24 sps:$4 sm:$0xff]   ;;  %v8540_v33 = vld [vmem:[%s9143_s22 + $0x274] ss:$24 sps:$4 sm:$0xff]   ;;  %v8542_v34 = vld [vmem:[%s9143_s22 + $0x270] ss:$24 sps:$4 sm:$0xff]  }
  0x4a   : > { %1514 = vmatpush1.bf16.msra.mxu1 %v8509_v9  ;;  %v8543_v35 = vld [vmem:[%s9143_s22 + $0x2a4] ss:$24 sps:$4 sm:$0xff]   ;;  %v8545_v36 = vld [vmem:[%s9143_s22 + $0x2a0] ss:$24 sps:$4 sm:$0xff]   ;;  %v8546_v37 = vld [vmem:[%s9143_s22 + $0x2d4] ss:$24 sps:$4 sm:$0xff]  }
  0x4b   : > { %1515 = vmatprep.subr.bf16.mxu1 %v8510_v10  ;;  %v8548_v38 = vld [vmem:[%s9143_s22 + $0x2d0] ss:$24 sps:$4 sm:$0xff]   ;;  %v893_v39 = vld [vmem:[%s9209_s9] sm:$0xff]  ;;  %v8554_v44 = vld [vmem:[%s9143_s22 + $0x3c] ss:$24 sps:$4 sm:$0xff]   ;;  %s10452_s18 = scalar_lea.vmem %s10451_s24, %s10450_s8  ;;  %s9001_s23 = smov 64  }
  0x4c   : > { %v895_v40 = vld [vmem:[%s9209_s9 + $0x10] sm:$0xff]  ;;  %v8551_v41 = vld [vmem:[%s9143_s22 + $0xc] ss:$24 sps:$4 sm:$0xff]   ;;  %v8549_v42 = vld [vmem:[%s9143_s22 + $0x8] ss:$24 sps:$4 sm:$0xff]   ;;  %vm9003_vm0 = vmmov 0  }
  0x4d   : > { %v9258_v43 = vpack.c.bf16 %v895_v40, %v893_v39  ;;  %v8552_v45 = vld [vmem:[%s9143_s22 + $0x38] ss:$24 sps:$4 sm:$0xff]   ;;  %v8557_v46 = vld [vmem:[%s9143_s22 + $0x6c] ss:$24 sps:$4 sm:$0xff]   ;;  %v8555_v47 = vld [vmem:[%s9143_s22 + $0x68] ss:$24 sps:$4 sm:$0xff]  }
  0x4e   : > { %1516 = vmatpush1.bf16.msra.mxu1 %v8512_v11  ;;  %v8560_v48 = vld [vmem:[%s9143_s22 + $0x9c] ss:$24 sps:$4 sm:$0xff]   ;;  %v8558_v49 = vld [vmem:[%s9143_s22 + $0x98] ss:$24 sps:$4 sm:$0xff]   ;;  %v8563_v50 = vld [vmem:[%s9143_s22 + $0xcc] ss:$24 sps:$4 sm:$0xff]  }
  0x4f   : > { %1517 = vmatprep.subr.bf16.mxu1 %v8513_v12  ;;  %v8561_v51 = vld [vmem:[%s9143_s22 + $0xc8] ss:$24 sps:$4 sm:$0xff]   ;;  %v8566_v52 = vld [vmem:[%s9143_s22 + $0xfc] ss:$24 sps:$4 sm:$0xff]   ;;  %v8564_v53 = vld [vmem:[%s9143_s22 + $0xf8] ss:$24 sps:$4 sm:$0xff]   ;;  %v999_v12 = vlaneseq }
  0x50   : > { %v8569_v54 = vld [vmem:[%s9143_s22 + $0x12c] ss:$24 sps:$4 sm:$0xff]   ;;  %v8567_v55 = vld [vmem:[%s9143_s22 + $0x128] ss:$24 sps:$4 sm:$0xff]   ;;  %v8572_v56 = vld [vmem:[%s9143_s22 + $0x15c] ss:$24 sps:$4 sm:$0xff]  }
  0x51   : > { %v8570_v57 = vld [vmem:[%s9143_s22 + $0x158] ss:$24 sps:$4 sm:$0xff]   ;;  %v8575_v58 = vld [vmem:[%s9143_s22 + $0x18c] ss:$24 sps:$4 sm:$0xff]   ;;  %v8573_v59 = vld [vmem:[%s9143_s22 + $0x188] ss:$24 sps:$4 sm:$0xff]  }
  0x52   : > { %1518 = vmatpush1.bf16.msra.mxu1 %v8515_v13  ;;  %v8578_v60 = vld [vmem:[%s9143_s22 + $0x1bc] ss:$24 sps:$4 sm:$0xff]   ;;  %v8576_v61 = vld [vmem:[%s9143_s22 + $0x1b8] ss:$24 sps:$4 sm:$0xff]   ;;  %v8581_v62 = vld [vmem:[%s9143_s22 + $0x1ec] ss:$24 sps:$4 sm:$0xff]  }
  0x53   : > { %1519 = vmatprep.subr.bf16.mxu1 %v8516_v14  ;;  %v8579_v63 = vld [vmem:[%s9143_s22 + $0x1e8] ss:$24 sps:$4 sm:$0xff]   ;;  %v8584_v0 = vld [vmem:[%s9143_s22 + $0x21c] ss:$24 sps:$4 sm:$0xff]   ;;  %v8582_v1 = vld [vmem:[%s9143_s22 + $0x218] ss:$24 sps:$4 sm:$0xff]  }
  0x54   : > { %v8587_v2 = vld [vmem:[%s9143_s22 + $0x24c] ss:$24 sps:$4 sm:$0xff]   ;;  %v8585_v3 = vld [vmem:[%s9143_s22 + $0x248] ss:$24 sps:$4 sm:$0xff]   ;;  %v8590_v4 = vld [vmem:[%s9143_s22 + $0x27c] ss:$24 sps:$4 sm:$0xff]  }
  0x55   : > { %v8588_v5 = vld [vmem:[%s9143_s22 + $0x278] ss:$24 sps:$4 sm:$0xff]   ;;  %v8593_v6 = vld [vmem:[%s9143_s22 + $0x2ac] ss:$24 sps:$4 sm:$0xff]   ;;  %v8591_v7 = vld [vmem:[%s9143_s22 + $0x2a8] ss:$24 sps:$4 sm:$0xff]  }
  0x56   : > { %1520 = vmatpush1.bf16.msra.mxu1 %v8518_v15  ;;  %v8596_v8 = vld [vmem:[%s9143_s22 + $0x2dc] ss:$24 sps:$4 sm:$0xff]   ;;  %v8594_v9 = vld [vmem:[%s9143_s22 + $0x2d8] ss:$24 sps:$4 sm:$0xff]   ;;  %v9294_v13 = vshrl.u32 %v999_v12, 7  ;;  %vm1788_vm1 = vcmask 523264  }
  0x57   : > { %1521 = vmatprep.subr.bf16.mxu1 %v8519_v16  ;;  %v8597_v10 = vld [vmem:[%s9143_s22 + $0x14] ss:$24 sps:$4 sm:$0xff]   ;;  %v8599_v11 = vld [vmem:[%s9143_s22 + $0x10] ss:$24 sps:$4 sm:$0xff]   ;;  %v8600_v14 = vld [vmem:[%s9143_s22 + $0x44] ss:$24 sps:$4 sm:$0xff]  }
  0x58   : > { %1595 = vmatprep.subr.bf16.mxu0 %v8597_v10  ;;  %v8602_v15 = vld [vmem:[%s9143_s22 + $0x40] ss:$24 sps:$4 sm:$0xff]   ;;  %v8603_v16 = vld [vmem:[%s9143_s22 + $0x74] ss:$24 sps:$4 sm:$0xff]   ;;  %v8605_v17 = vld [vmem:[%s9143_s22 + $0x70] ss:$24 sps:$4 sm:$0xff]  }
  0x59   : > { %1596 = vmatpush1.bf16.msra.mxu0 %v8599_v11  ;;  %v9301_v18 = vsub.s32 0, %v9294_v13  ;;  %v8620_v39 = vld [vmem:[%s9143_s22 + $0x160] ss:$24 sps:$4 sm:$0xff]   ;;  %v8621_v40 = vld [vmem:[%s9143_s22 + $0x194] ss:$24 sps:$4 sm:$0xff]   ;;  %v9004_v10 = vmov 0.0  }
  0x5a   : > { %1522 = vmatpush1.bf16.msra.mxu1 %v8521_v20  ;;  %1597 = vmatprep.subr.bf16.mxu0 %v8600_v14  ;;  %v9309_v20 = vld [vmem:[%s10452_s18] sm:$0x3f]  ;;  %vm2091_vm2 = vcmask 64512   ;;  %s10454_s27 = sld [smem:[#allocation10_spill]]  ;;  %s10458_s30 = sld [smem:[#allocation17_spill]] }
  0x5b   : > { %1523 = vmatprep.subr.bf16.mxu1 %v8522_v21  ;;  %v8608_v21 = vld [vmem:[%s9143_s22 + $0xa0] ss:$24 sps:$4 sm:$0xff]  }
  0x5d   : > { %1598 = vmatpush1.bf16.msra.mxu0 %v8602_v15  ;;  %v1017_v15 = vsub.s32 4, %v9294_v13 }
  0x5e   : > { %1524 = vmatpush1.bf16.msra.mxu1 %v8524_v22  ;;  %1599 = vmatprep.subr.bf16.mxu0 %v8603_v16  ;;  %v1002_v22 = vrot.slane %v9309_v20, %v9301_v18 }
  0x5f   : > { %1525 = vmatprep.subr.bf16.mxu1 %v8525_v23  ;;  %v8609_v23 = vld [vmem:[%s9143_s22 + $0xd4] ss:$24 sps:$4 sm:$0xff]   ;;  %v1018_v16 = vrot.slane %v9309_v20, %v1017_v15 }
  0x60   : > { %s10459_s25 = scalar_lea.vmem %s10458_s30, %s9181_s13 }
  0x61   : > { %1600 = vmatpush1.bf16.msra.mxu0 %v8605_v17  ;;  %v1021_v17 = vsub.s32 5, %v9294_v13 }
  0x62   : > { %1526 = vmatpush1.bf16.msra.mxu1 %v8527_v24  ;;  %v9316_v24 = vsub.s32 1, %v9294_v13 }
  0x63   : > { %1527 = vmatprep.subr.bf16.mxu1 %v8528_v25 }
  0x66   : > { %1528 = vmatpush1.bf16.msra.mxu1 %v8530_v26  ;;  %v8611_v26 = vld [vmem:[%s9143_s22 + $0xd0] ss:$24 sps:$4 sm:$0xff]  }
  0x67   : > { %1529 = vmatprep.subr.bf16.mxu1 %v8531_v27 }
  0x6a   : > { %1530 = vmatpush1.bf16.msra.mxu1 %v8533_v28 }
  0x6b   : > { %1531 = vmatprep.subr.bf16.mxu1 %v8534_v29  ;;  %v8612_v29 = vld [vmem:[%s9143_s22 + $0x104] ss:$24 sps:$4 sm:$0xff]  }
  0x6e   : > { %1532 = vmatpush1.bf16.msra.mxu1 %v8536_v30  ;;  %v9326_v30 = vrot.slane %v9309_v20, %v9316_v24 }
  0x6f   : > { %1533 = vmatprep.subr.bf16.mxu1 %v8537_v31 }
  0x72   : > { %1534 = vmatpush1.bf16.msra.mxu1 %v8539_v32 }
  0x73   : > { %1535 = vmatprep.subr.bf16.mxu1 %v8540_v33 }
  0x76   : > { %1536 = vmatpush1.bf16.msra.mxu1 %v8542_v34 }
  0x77   : > { %1537 = vmatprep.subr.bf16.mxu1 %v8543_v35  ;;  %v8614_v35 = vld [vmem:[%s9143_s22 + $0x100] ss:$24 sps:$4 sm:$0xff]  }
  0x7a   : > { %1538 = vmatpush1.bf16.msra.mxu1 %v8545_v36  ;;  %v8615_v36 = vld [vmem:[%s9143_s22 + $0x134] ss:$24 sps:$4 sm:$0xff]  }
  0x7b   : > { %1539 = vmatprep.subr.bf16.mxu1 %v8546_v37  ;;  %v8617_v37 = vld [vmem:[%s9143_s22 + $0x130] ss:$24 sps:$4 sm:$0xff]  }
  0x7e   : > { %1540 = vmatpush1.bf16.msra.mxu1 %v8548_v38  ;;  %v8618_v38 = vld [vmem:[%s9143_s22 + $0x164] ss:$24 sps:$4 sm:$0xff]  }
  0x7f   : > { %1552 = vmatprep.subr.bf16.mxu1 %v8551_v41  ;;  %v8623_v41 = vld [vmem:[%s9143_s22 + $0x190] ss:$24 sps:$4 sm:$0xff]  }
  0x81   : > { %1542 = vmatmul.mubr.bf16.vlgmr.msra.gmra.mrb[0].mxu1 %v9258_v43 }
  0x82   : > { %1553 = vmatpush1.bf16.msra.mxu1 %v8549_v42  ;;  %1584 = vmatprep.mubr.bf16.mxu1 %v900_v19  ;;  %v8606_v19 = vld [vmem:[%s9143_s22 + $0xa4] ss:$24 sps:$4 sm:$0xff]  }
  0x83   : > { %1554 = vmatprep.subr.bf16.mxu1 %v8554_v44  ;;  %1601 = vmatprep.subr.bf16.mxu0 %v8606_v19  ;;  %v8624_v42 = vld [vmem:[%s9143_s22 + $0x1c4] ss:$24 sps:$4 sm:$0xff]   ;;  %v8626_v44 = vld [vmem:[%s9143_s22 + $0x1c0] ss:$24 sps:$4 sm:$0xff]  }
  0x84   : > { %1602 = vmatpush1.bf16.msra.mxu0 %v8608_v21 }
  0x85   : > { %1603 = vmatprep.subr.bf16.mxu0 %v8609_v23 }
  0x86   : > { %1555 = vmatpush1.bf16.msra.mxu1 %v8552_v45  ;;  %v8627_v45 = vld [vmem:[%s9143_s22 + $0x1f4] ss:$24 sps:$4 sm:$0xff]  }
  0x87   : > { %1556 = vmatprep.subr.bf16.mxu1 %v8557_v46  ;;  %v8629_v46 = vld [vmem:[%s9143_s22 + $0x1f0] ss:$24 sps:$4 sm:$0xff]  }
  0x88   : > { %1604 = vmatpush1.bf16.msra.mxu0 %v8611_v26 }
  0x89   : > { %1605 = vmatprep.subr.bf16.mxu0 %v8612_v29 }
  0x8a   : > { %1557 = vmatpush1.bf16.msra.mxu1 %v8555_v47  ;;  %v8630_v47 = vld [vmem:[%s9143_s22 + $0x224] ss:$24 sps:$4 sm:$0xff]  }
  0x8b   : > { %1558 = vmatprep.subr.bf16.mxu1 %v8560_v48  ;;  %v8632_v48 = vld [vmem:[%s9143_s22 + $0x220] ss:$24 sps:$4 sm:$0xff]  }
  0x8c   : > { %1606 = vmatpush1.bf16.msra.mxu0 %v8614_v35 }
  0x8d   : > { %1607 = vmatprep.subr.bf16.mxu0 %v8615_v36 }
  0x8e   : > { %1559 = vmatpush1.bf16.msra.mxu1 %v8558_v49  ;;  %v8633_v49 = vld [vmem:[%s9143_s22 + $0x254] ss:$24 sps:$4 sm:$0xff]  }
  0x8f   : > { %1560 = vmatprep.subr.bf16.mxu1 %v8563_v50  ;;  %v8635_v50 = vld [vmem:[%s9143_s22 + $0x250] ss:$24 sps:$4 sm:$0xff]  }
  0x90   : > { %1608 = vmatpush1.bf16.msra.mxu0 %v8617_v37 }
  0x91   : > { %1609 = vmatprep.subr.bf16.mxu0 %v8618_v38 }
  0x92   : > { %1561 = vmatpush1.bf16.msra.mxu1 %v8561_v51  ;;  %v8636_v51 = vld [vmem:[%s9143_s22 + $0x284] ss:$24 sps:$4 sm:$0xff]  }
  0x93   : > { %1562 = vmatprep.subr.bf16.mxu1 %v8566_v52  ;;  %v8638_v52 = vld [vmem:[%s9143_s22 + $0x280] ss:$24 sps:$4 sm:$0xff]  }
  0x94   : > { %1610 = vmatpush1.bf16.msra.mxu0 %v8620_v39 }
  0x95   : > { %1611 = vmatprep.subr.bf16.mxu0 %v8621_v40 }
  0x96   : > { %1563 = vmatpush1.bf16.msra.mxu1 %v8564_v53  ;;  %v8639_v53 = vld [vmem:[%s9143_s22 + $0x2b4] ss:$24 sps:$4 sm:$0xff]  }
  0x97   : > { %1564 = vmatprep.subr.bf16.mxu1 %v8569_v54  ;;  %v8641_v54 = vld [vmem:[%s9143_s22 + $0x2b0] ss:$24 sps:$4 sm:$0xff]  }
  0x98   : > { %1612 = vmatpush1.bf16.msra.mxu0 %v8623_v41 }
  0x99   : > { %1613 = vmatprep.subr.bf16.mxu0 %v8624_v42 }
  0x9a   : > { %1565 = vmatpush1.bf16.msra.mxu1 %v8567_v55  ;;  %v8642_v55 = vld [vmem:[%s9143_s22 + $0x2e4] ss:$24 sps:$4 sm:$0xff]  }
  0x9b   : > { %1566 = vmatprep.subr.bf16.mxu1 %v8572_v56  ;;  %v8644_v56 = vld [vmem:[%s9143_s22 + $0x2e0] ss:$24 sps:$4 sm:$0xff]   ;;  %s10453_s22 = sld [smem:[#allocation8_spill]] }
  0x9c   : > { %1614 = vmatpush1.bf16.msra.mxu0 %v8626_v44 }
  0x9d   : > { %1615 = vmatprep.subr.bf16.mxu0 %v8627_v45 }
  0x9e   : > { %1567 = vmatpush1.bf16.msra.mxu1 %v8570_v57  ;;  %v1009_v57 = vsub.s32 2, %v9294_v13 }
  0x9f   : > { %1568 = vmatprep.subr.bf16.mxu1 %v8575_v58  ;;  %v1013_v58 = vsub.s32 3, %v9294_v13 }
  0xa0   : > { %1616 = vmatpush1.bf16.msra.mxu0 %v8629_v46 }
  0xa1   : > { %1617 = vmatprep.subr.bf16.mxu0 %v8630_v47 }
  0xa2   : > { %1569 = vmatpush1.bf16.msra.mxu1 %v8573_v59  ;;  %v1010_v59 = vrot.slane %v9309_v20, %v1009_v57 }
  0xa3   : > { %1570 = vmatprep.subr.bf16.mxu1 %v8578_v60  ;;  %v1014_v60 = vrot.slane %v9309_v20, %v1013_v58 }
  0xa4   : > { %1618 = vmatpush1.bf16.msra.mxu0 %v8632_v48 }
  0xa5   : > { %1619 = vmatprep.subr.bf16.mxu0 %v8633_v49 }
  0xa6   : > { %1571 = vmatpush1.bf16.msra.mxu1 %v8576_v61 }
  0xa7   : > { %1572 = vmatprep.subr.bf16.mxu1 %v8581_v62 }
  0xa8   : > { %1620 = vmatpush1.bf16.msra.mxu0 %v8635_v50 }
  0xa9   : > { %1621 = vmatprep.subr.bf16.mxu0 %v8636_v51 }
  0xaa   : > { %1573 = vmatpush1.bf16.msra.mxu1 %v8579_v63 }
  0xab   : > { %1574 = vmatprep.subr.bf16.mxu1 %v8584_v0 }
  0xac   : > { %1622 = vmatpush1.bf16.msra.mxu0 %v8638_v52 }
  0xad   : > { %1623 = vmatprep.subr.bf16.mxu0 %v8639_v53 }
  0xae   : > { %1575 = vmatpush1.bf16.msra.mxu1 %v8582_v1 }
  0xaf   : > { %1576 = vmatprep.subr.bf16.mxu1 %v8587_v2 }
  0xb0   : > { %1624 = vmatpush1.bf16.msra.mxu0 %v8641_v54 }
  0xb1   : > { %1625 = vmatprep.subr.bf16.mxu0 %v8642_v55 }
  0xb2   : > { %1577 = vmatpush1.bf16.msra.mxu1 %v8585_v3 }
  0xb3   : > { %1578 = vmatprep.subr.bf16.mxu1 %v8590_v4 }
  0xb4   : > { %1626 = vmatpush1.bf16.msra.mxu0 %v8644_v56 }
  0xb6   : > { %1579 = vmatpush1.bf16.msra.mxu1 %v8588_v5 }
  0xb7   : > { %1580 = vmatprep.subr.bf16.mxu1 %v8593_v6  ;;  %1628 = vmatmul.mubr.bf16.vlgmr.msra.gmra.mrb[0].mxu0 %v9258_v43 }
  0xba   : > { %1581 = vmatpush1.bf16.msra.mxu1 %v8591_v7 }
  0xbb   : > { %1582 = vmatprep.subr.bf16.mxu1 %v8596_v8 }
  0xbe   : > { %1583 = vmatpush1.bf16.msra.mxu1 %v8594_v9  ;;  %v9002_v9 = vmov 0.0|0.0  }
  0xbf   : > { %8193 = vmatprep.subr.bf16.mxu1 %v9002_v9 }
  0xc1   : > { %1585 = vmatmul.mubr.bf16.vlgmr.msra.gmra.mrb[4].mxu1 %v9258_v43 }
  0xc2   : > { %7945 = vmatprep.mubr.msk.f32.mxu1 %vm9003_vm0, %v9004_v10 }
 0x154   : > { %v1543_v25 = vpop.f32.mrb[0].mxu1 }
 0x155   : > { %v9319_v27 = vadd.f32 %v1543_v25, %v1002_v22  ;;  %v9321_v28 = vpop.f32.mrb[1].mxu1 }
 0x156   : > { %v1547_v31 = vpop.f32.mrb[2].mxu1  ;;  %v9378_v12 = vadd.f32 %v9321_v28, %v9326_v30 }
 0x157   : > { %v9328_v32 = vadd.f32 %v1547_v31, %v1002_v22  ;;  %v1549_v33 = vpop.f32.mrb[3].mxu1  ;;  %1639 = vrot.lane.b32.xlu1 %v9319_v27, %s9001_s23  ;;  %v9392_v22 = vrot.slane %v9309_v20, %v1021_v17 }
 0x158   : > { %v9333_v34 = vadd.f32 %v1549_v33, %v9326_v30 }
 0x18a   : > { %v1629_v14 = vpop.f32.mrb[0].mxu0 }
 0x18b   : > { %v9387_v19 = vpop.f32.mrb[1].mxu0  ;;  %v1630_v28 = vadd.f32 %v1629_v14, %v1018_v16 }
 0x18c   : > { %v1633_v21 = vpop.f32.mrb[2].mxu0 }
 0x18d   : > { %v9394_v23 = vadd.f32 %v1633_v21, %v1018_v16  ;;  %v1635_v25 = vpop.f32.mrb[3].mxu0 }
 0x18e   : > { %v9397_v26 = vadd.f32 %v1635_v25, %v9392_v22 }
 0x194   : > { %v1586_v61 = vpop.f32.mrb[4].mxu1 }
 0x195   : > { %v1587_v62 = vadd.f32 %v1586_v61, %v1010_v59  ;;  %v1588_v63 = vpop.f32.mrb[5].mxu1 }
 0x196   : > { %v1589_v0 = vadd.f32 %v1588_v63, %v1014_v60  ;;  %v1590_v1 = vpop.f32.mrb[6].mxu1 }
 0x197   : > { %v9365_v2 = vadd.f32 %v1590_v1, %v1010_v59  ;;  %v1592_v43 = vpop.f32.mrb[7].mxu1 }
 0x198   : > { %v9367_v3 = vadd.f32 %v1592_v43, %v1014_v60  ;;  %1724 = vxpose.xlu1.b32.start.end [1/1] (short) (narrow) %v1589_v0, 64  ;;  %v8355_v4 = vpack.i.bf16 %v1589_v0, %v1587_v62 }
 0x19a   : > { %8356 = vrot.lane.b32.xlu0 %v8355_v4, %s9001_s23  ;;  %v8402_v11 = vpack.i.bf16 %v9367_v3, %v9365_v2 }
 0x1c9   : > { %v9399_v29 = vpop.permute.xlu1 %1639 }
 0x20c   : > { %v8357_v5 = vpop.permute.xlu0 %8356 }
 0x20d   : > { %v8359_v6 = vunpack.i.h.bf16 %v8357_v5  ;;  %v8358_v7 = vunpack.i.l.bf16 %v8357_v5 }
 0x20f   : > { %1756 = vxpose.xlu1.b32.start.end [1/1] (short) (narrow) %v8359_v6, 64  ;;  %v8360_v8 = vpack.i.bf16 %v8358_v7, %v1587_v62 }
 0x211   : > { %8361 = vxpose.xlu0.b32.start.end [1/1] (short) (narrow) %v8360_v8, 64 }
 0x218   : > { %v9401_v30 = vpop.trf.xlu1 }
 0x21c   : > { %v9403_v31 = vpop.trf.xlu1 }
 0x21d   : > { %v8218_v25 = vpack.c.bf16 %v9403_v31, %v9401_v30 }
 0x220   : > { %v9405_v33 = vpop.trf.xlu1 }
 0x224   : > { %v9407_v36 = vpop.trf.xlu1 }
 0x228   : > { %v9409_v41 = vpop.trf.xlu1 }
 0x22c   : > { %v1745_v47 = vpop.trf.xlu1 }
 0x230   : > { %v1746_v52 = vpop.trf.xlu1 }
 0x234   : > { %v1747_v55 = vpop.trf.xlu1 }
 0x235   : > { %v8227_v30 = vpack.c.bf16 %v1747_v55, %v1746_v52 }
 0x249   : > { %8403 = vrot.lane.b32.xlu1 %v8402_v11, %s9001_s23 }
 0x256   : > { %1642 = vrot.lane.b32.xlu0 %v9378_v12, %s9001_s23 }
 0x274   : > { %2136 = vxpose.xlu0.b32.start.end [1/1] (short) (narrow) %v1630_v28, 64 }
 0x28f   : > { %v1772_v0 = vpop.trf.xlu1 }
 0x291   : > { %v8362_v35 = vpop.trf.xlu0 }
 0x292   : > { %v8363_v37 = vunpack.i.l.bf16 %v8362_v35  ;;  %v8366_v63 = vunpack.i.h.bf16 %v8362_v35 }
 0x293   : > { %v1773_v7 = vpop.trf.xlu1 }
 0x294   : > { %v8230_v31 = vpack.c.bf16 %v1773_v7, %v1772_v0 }
 0x295   : > { %v8367_v20 = vpop.trf.xlu0 }
 0x296   : > { %v8368_v38 = vunpack.i.l.bf16 %v8367_v20  ;;  %v8371_v61 = vunpack.i.h.bf16 %v8367_v20 }
 0x298   : > { %v8194_v39 = vpack.c.bf16 %v8368_v38, %v8363_v37  ;;  %v8206_v43 = vpack.c.bf16 %v8371_v61, %v8366_v63  ;;  %v8224_v37 = vpack.c.bf16 %v1745_v47, %v9409_v41 }
 0x299   : > { %v8372_v40 = vpop.trf.xlu0 }
 0x29a   : > { %8195 = vmatpush3.bf16.msra.mxu1 %v8194_v39  ;;  %v8373_v44 = vunpack.i.l.bf16 %v8372_v40  ;;  %v8376_v4 = vunpack.i.h.bf16 %v8372_v40 }
 0x29b   : > { %8196 = vmatprep.subr.bf16.mxu1 %v9002_v9 }
 0x29d   : > { %v8377_v42 = vpop.trf.xlu0 }
 0x29e   : > { %v8378_v45 = vunpack.i.l.bf16 %v8377_v42  ;;  %v8381_v1 = vunpack.i.h.bf16 %v8377_v42 }
 0x2a0   : > { %v8197_v46 = vpack.c.bf16 %v8378_v45, %v8373_v44  ;;  %v8209_v6 = vpack.c.bf16 %v8381_v1, %v8376_v4  ;;  %v7411_v44 = vld [vmem:[%s10453_s22] ss:$0 sm:$0xff] }
 0x2a1   : > { %v8382_v48 = vpop.trf.xlu0 }
 0x2a2   : > { %8198 = vmatpush3.bf16.msra.mxu1 %v8197_v46  ;;  %v8383_v50 = vunpack.i.l.bf16 %v8382_v48  ;;  %v8386_v8 = vunpack.i.h.bf16 %v8382_v48 }
 0x2a3   : > { %8199 = vmatprep.subr.bf16.mxu1 %v9002_v9 }
 0x2a5   : > { %v8387_v49 = vpop.trf.xlu0 }
 0x2a6   : > { %v8388_v51 = vunpack.i.l.bf16 %v8387_v49  ;;  %v8391_v5 = vunpack.i.h.bf16 %v8387_v49 }
 0x2a8   : > { %v8200_v53 = vpack.c.bf16 %v8388_v51, %v8383_v50  ;;  %v8212_v14 = vpack.c.bf16 %v8391_v5, %v8386_v8 }
 0x2a9   : > { %v8392_v54 = vpop.trf.xlu0 }
 0x2aa   : > { %8201 = vmatpush3.bf16.msra.mxu1 %v8200_v53  ;;  %v8393_v59 = vunpack.i.l.bf16 %v8392_v54  ;;  %v8396_v16 = vunpack.i.h.bf16 %v8392_v54 }
 0x2ab   : > { %8202 = vmatprep.subr.bf16.mxu1 %v9002_v9 }
 0x2ad   : > { %v8397_v56 = vpop.trf.xlu0 }
 0x2ae   : > { %v8398_v60 = vunpack.i.l.bf16 %v8397_v56  ;;  %v8401_v11 = vunpack.i.h.bf16 %v8397_v56 }
 0x2b0   : > { %v8203_v62 = vpack.c.bf16 %v8398_v60, %v8393_v59  ;;  %v8215_v21 = vpack.c.bf16 %v8401_v11, %v8396_v16 }
 0x2b2   : > { %8204 = vmatpush3.bf16.msra.mxu1 %v8203_v62 }
 0x2b3   : > { %8205 = vmatprep.subr.bf16.mxu1 %v9002_v9 }
 0x2b5   : > { %7946 = vmatmul.mubr.msk.f32.vlgmr.msra.gmra.mrb[8].mxu1 %vm1788_vm1, %v9319_v27  ;;  %v1774_v27 = vpop.trf.xlu1 }
 0x2b6   : > { %8207 = vmatpush3.bf16.msra.mxu1 %v8206_v43  ;;  %7964 = vmatprep.mubr.msk.f32.mxu1 %vm9003_vm0, %v9004_v10 }
 0x2b7   : > { %8208 = vmatprep.subr.bf16.mxu1 %v9002_v9 }
 0x2b9   : > { %1653 = vrot.lane.b32.xlu0 %v1630_v28, %s9001_s23  ;;  %v1775_v35 = vpop.trf.xlu1  ;;  %v8221_v28 = vpack.c.bf16 %v9407_v36, %v9405_v33 }
 0x2ba   : > { %8210 = vmatpush3.bf16.msra.mxu1 %v8209_v6  ;;  %v8233_v38 = vpack.c.bf16 %v1775_v35, %v1774_v27 }
 0x2bb   : > { %8211 = vmatprep.subr.bf16.mxu1 %v9002_v9 }
 0x2bd   : > { %v1776_v20 = vpop.trf.xlu1 }
 0x2be   : > { %8213 = vmatpush3.bf16.msra.mxu1 %v8212_v14 }
 0x2bf   : > { %8214 = vmatprep.subr.bf16.mxu1 %v9002_v9 }
 0x2c2   : > { %8216 = vmatpush3.bf16.msra.mxu1 %v8215_v21 }
 0x2c3   : > { %8217 = vmatprep.subr.bf16.mxu1 %v9002_v9 }
 0x2c5   : > { %7965 = vmatmul.mubr.msk.f32.vlgmr.msra.gmra.mrb[10].mxu1 %vm1788_vm1, %v9399_v29  ;;  %v1777_v29 = vpop.trf.xlu1 }
 0x2c6   : > { %8219 = vmatpush3.bf16.msra.mxu1 %v8218_v25  ;;  %7983 = vmatprep.mubr.msk.f32.mxu1 %vm9003_vm0, %v9004_v10  ;;  %v8236_v36 = vpack.c.bf16 %v1777_v29, %v1776_v20 }
 0x2c7   : > { %8220 = vmatprep.subr.bf16.mxu1 %v9002_v9 }
 0x2c9   : > { %v1778_v33 = vpop.trf.xlu1 }
 0x2ca   : > { %8222 = vmatpush3.bf16.msra.mxu1 %v8221_v28 }
 0x2cb   : > { %8223 = vmatprep.subr.bf16.mxu1 %v9002_v9 }
 0x2cd   : > { %v1779_v39 = vpop.trf.xlu1 }
 0x2ce   : > { %8225 = vmatpush3.bf16.msra.mxu1 %v8224_v37  ;;  %v8239_v40 = vpack.c.bf16 %v1779_v39, %v1778_v33  ;;  %v1632_v37 = vadd.f32 %v9387_v19, %v9392_v22 }
 0x2cf   : > { %8226 = vmatprep.subr.bf16.mxu1 %v9002_v9 }
 0x2d1   : > { %v9454_v63 = vpop.permute.xlu1 %8403 }
 0x2d2   : > { %8228 = vmatpush3.bf16.msra.mxu1 %v8227_v30  ;;  %v8405_v4 = vunpack.i.l.bf16 %v9454_v63 }
 0x2d3   : > { %8229 = vmatprep.subr.bf16.mxu1 %v9002_v9 }
 0x2d4   : > { %v8407_v7 = vpack.i.bf16 %v8405_v4, %v9365_v2 }
 0x2d5   : > { %7984 = vmatmul.mubr.msk.f32.vlgmr.msra.gmra.mrb[12].mxu1 %vm1788_vm1, %v9378_v12  ;;  %v1643_v12 = vpop.permute.xlu0 %1642 }
 0x2d6   : > { %8231 = vmatpush3.bf16.msra.mxu1 %v8230_v31  ;;  %8002 = vmatprep.mubr.msk.f32.mxu1 %vm9003_vm0, %v9004_v10 }
 0x2d7   : > { %8232 = vmatprep.subr.bf16.mxu1 %v9002_v9 }
 0x2da   : > { %8234 = vmatpush3.bf16.msra.mxu1 %v8233_v38 }
 0x2db   : > { %8235 = vmatprep.subr.bf16.mxu1 %v9002_v9 }
 0x2de   : > { %8237 = vmatpush3.bf16.msra.mxu1 %v8236_v36 }
 0x2df   : > { %8238 = vmatprep.subr.bf16.mxu1 %v9002_v9 }
 0x2e2   : > { %8240 = vmatpush3.bf16.msra.mxu1 %v8239_v40 }
 0x2e5   : > { %8003 = vmatmul.mubr.msk.f32.vlgmr.msra.gmra.mrb[14].mxu1 %vm1788_vm1, %v1643_v12 }
 0x2f4   : > { %v2152_v41 = vpop.trf.xlu0 }
 0x2f5   : > { %8007 = vmatprep.mubr.msk.f32.mxu1 %vm2091_vm2, %v2152_v41 }
 0x2f8   : > { %v9450_v61 = vpop.trf.xlu0 }
 0x2fc   : > { %v9452_v62 = vpop.trf.xlu0 }
 0x300   : > { %v9457_v6 = vpop.trf.xlu0 }
 0x304   : > { %v9460_v8 = vpop.trf.xlu0 }
 0x308   : > { %v9462_v11 = vpop.trf.xlu0 }
 0x30c   : > { %v9464_v14 = vpop.trf.xlu0 }
 0x310   : > { %v9466_v16 = vpop.trf.xlu0 }
 0x32b   : > { %v1654_v27 = vpop.permute.xlu0 %1653 }
 0x388   : > { %v1857_v42 = vpop.f32.mrb[8].mxu1 }
 0x389   : > { %v2077_v45 = vmul.f32 0.125, %v1857_v42  ;;  %v7947_v46 = vpop.f32.mrb[9].mxu1 }
 0x38b   : > { %v2087_v47 = vadd.f32 %v7411_v44, %v2077_v45 }
 0x38d   : > { %v2092_v48 = vsel %vm2091_vm2, %v2087_v47, -inf }
 0x38e   : > { %2093 = vmax.xlane.f32.xlu1 %v2092_v48 }
 0x398   : > { %v1929_v49 = vpop.f32.mrb[10].mxu1 }
 0x399   : > { %v2078_v50 = vmul.f32 0.125, %v1929_v49  ;;  %v7966_v51 = vpop.f32.mrb[11].mxu1 }
 0x39b   : > { %v2088_v52 = vadd.f32 %v7411_v44, %v2078_v50 }
 0x39d   : > { %v2095_v53 = vsel %vm2091_vm2, %v2088_v52, -inf }
 0x39e   : > { %2096 = vmax.xlane.f32.xlu0 %v2095_v53 }
 0x3a8   : > { %v2001_v54 = vpop.f32.mrb[12].mxu1 }
 0x3a9   : > { %v2079_v55 = vmul.f32 0.125, %v2001_v54  ;;  %v7985_v56 = vpop.f32.mrb[13].mxu1 }
 0x3ab   : > { %v2089_v59 = vadd.f32 %v7411_v44, %v2079_v55 }
 0x3ad   : > { %v2098_v60 = vsel %vm2091_vm2, %v2089_v59, -inf }
 0x3ae   : > { %2099 = vmax.xlane.f32.xlu0 %v2098_v60 }
 0x3b8   : > { %v2073_v0 = vpop.f32.mrb[14].mxu1 }
 0x3b9   : > { %v2080_v1 = vmul.f32 0.125, %v2073_v0  ;;  %v8004_v43 = vpop.f32.mrb[15].mxu1 }
 0x3bb   : > { %v2090_v5 = vadd.f32 %v7411_v44, %v2080_v1 }
 0x3bd   : > { %v2101_v28 = vsel %vm2091_vm2, %v2090_v5, -inf }
 0x3c1   : > { %8408 = vxpose.xlu1.b32.start.end [1/1] (short) (narrow) %v8407_v7, 64 }
 0x3db   : > { %2168 = vxpose.xlu0.b32.start.end [1/1] (short) (narrow) %v1654_v27, 64 }
 0x41b   : > { %v2094_v21 = vpop.xlane.xlu1 %2093 }
 0x41c   : > { %v2104_v25 = vsub.f32 %v2087_v47, %v2094_v21 }
 0x41e   : > { %v2108_v35 = vmul.f32 1.442695, %v2104_v25 }
 0x420   : > { %8885 = vpow2.f32 %v2108_v35 }
 0x424   : > { %2102 = vmax.xlane.f32.xlu0 %v2101_v28 }
 0x42a   : > { %v8886_v20 = vpop.eup %8885 }
 0x42b   : > { %v2116_v2 = vsel %vm2091_vm2, %v8886_v20, 0.0  ;;  %v2097_v31 = vpop.xlane.xlu0 %2096 }
 0x42c   : > { %2117 = vadd.xlane.f32.xlu1 %v2116_v2  ;;  %v2105_v33 = vsub.f32 %v2088_v52, %v2097_v31 }
 0x42e   : > { %v2110_v40 = vmul.f32 1.442695, %v2105_v33 }
 0x430   : > { %8887 = vpow2.f32 %v2110_v40 }
 0x43a   : > { %v8888_v44 = vpop.eup %8887 }
 0x43b   : > { %v2100_v36 = vpop.xlane.xlu0 %2099  ;;  %v2119_v46 = vsel %vm2091_vm2, %v8888_v44, 0.0 }
 0x43c   : > { %v2106_v12 = vsub.f32 %v2089_v59, %v2100_v36 }
 0x43d   : > { %1657 = vrot.lane.b32.xlu1 %v1632_v37, %s9001_s23 }
 0x43e   : > { %v2112_v42 = vmul.f32 1.442695, %v2106_v12 }
 0x440   : > { %8889 = vpow2.f32 %v2112_v42 }
 0x441   : > { %v9473_v30 = vpop.trf.xlu1 }
 0x442   : > { %v8410_v40 = vunpack.i.l.bf16 %v9473_v30 }
 0x445   : > { %v9475_v29 = vpop.trf.xlu1 }
 0x446   : > { %v8415_v12 = vunpack.i.l.bf16 %v9475_v29 }
 0x449   : > { %v9477_v38 = vpop.trf.xlu1 }
 0x44a   : > { %v8890_v47 = vpop.eup %8889 }
 0x44b   : > { %v2122_v52 = vsel %vm2091_vm2, %v8890_v47, 0.0 }
 0x44d   : > { %v9479_v39 = vpop.trf.xlu1 }
 0x44e   : > { %v8425_v42 = vunpack.i.l.bf16 %v9479_v39 }
 0x451   : > { %2200 = vxpose.xlu0.b32.start.end [1/1] (short) (narrow) %v1632_v37, 64  ;;  %v8429_v41 = vpop.trf.xlu1 }
 0x452   : > { %v8433_v48 = vunpack.i.h.bf16 %v8429_v41  ;;  %v8430_v49 = vunpack.i.l.bf16 %v8429_v41  ;;  %v8420_v41 = vunpack.i.l.bf16 %v9477_v38 }
 0x455   : > { %v8434_v19 = vpop.trf.xlu1 }
 0x456   : > { %v8438_v50 = vunpack.i.h.bf16 %v8434_v19  ;;  %v8435_v51 = vunpack.i.l.bf16 %v8434_v19 }
 0x458   : > { %v9487_v53 = vpack.c.bf16 %v8435_v51, %v8430_v49  ;;  %v9489_v54 = vpack.c.bf16 %v8438_v50, %v8433_v48  ;;  %v8413_v50 = vunpack.i.h.bf16 %v9473_v30  ;;  %v8418_v51 = vunpack.i.h.bf16 %v9475_v29 }
 0x459   : > { %v9481_v22 = vpop.trf.xlu1 }
 0x45a   : > { %v8440_v48 = vunpack.i.l.bf16 %v9481_v22  ;;  %v8443_v29 = vunpack.i.h.bf16 %v9481_v22 }
 0x45b   : > { %v2184_v55 = vpop.trf.xlu0 }
 0x45d   : > { %v9483_v45 = vpop.trf.xlu1 }
 0x45e   : > { %v8445_v49 = vunpack.i.l.bf16 %v9483_v45 }
 0x45f   : > { %v2185_v56 = vpop.trf.xlu0 }
 0x461   : > { %2120 = vadd.xlane.f32.xlu1 %v2119_v46  ;;  %v8245_v46 = vpack.c.bf16 %v8425_v42, %v8420_v41 }
 0x463   : > { %v2186_v59 = vpop.trf.xlu0 }
 0x465   : > { %2123 = vadd.xlane.f32.xlu1 %v2122_v52 }
 0x467   : > { %v2187_v60 = vpop.trf.xlu0 }
 0x46b   : > { %v2188_v0 = vpop.trf.xlu0 }
 0x46f   : > { %v2189_v1 = vpop.trf.xlu0 }
 0x473   : > { %v2190_v43 = vpop.trf.xlu0 }
 0x476   : > { %3070 = vrot.lane.b32.xlu1 %v9333_v34, %s9001_s23 }
 0x477   : > { %v2191_v4 = vpop.trf.xlu0 }
 0x496   : > { %3067 = vrot.lane.b32.xlu0 %v9328_v32, %s9001_s23 }
 0x4b1   : > { %v2103_v7 = vpop.xlane.xlu0 %2102 }
 0x4b2   : > { %v2107_v27 = vsub.f32 %v2090_v5, %v2103_v7 }
 0x4b4   : > { %v2114_v21 = vmul.f32 1.442695, %v2107_v27 }
 0x4b6   : > { %8891 = vpow2.f32 %v2114_v21 }
 0x4b9   : > { %v2118_v25 = vpop.xlane.xlu1 %2117 }
 0x4ba   : > { %8893 = vrcp.f32 %v2118_v25 }
 0x4bd   : > { %v1658_v35 = vpop.permute.xlu1 %1657 }
 0x4be   : > { %2232 = vxpose.xlu0.b32.start.end [1/1] (short) (narrow) %v1658_v35, 64 }
 0x4c0   : > { %v9495_v28 = vpop.eup %8891 }
 0x4c1   : > { %v2125_v2 = vsel %vm2091_vm2, %v9495_v28, 0.0 }
 0x4c2   : > { %2126 = vadd.xlane.f32.xlu1 %v2125_v2 }
 0x4c4   : > { %v8894_v37 = vpop.eup %8893 }
 0x4c5   : > { %v2132_v31 = vmul.f32 %v8894_v37, %v8886_v20 }
 0x4c7   : > { %8005 = vmatprep.subr.msk.mxu1 %vm2091_vm2, %v2132_v31 }
 0x4c8   : > { %8006 = vmatpush3.xpose.msk.msra.mxu1 %vm2091_vm2, %v2132_v31 }
 0x4cb   : > { %8008 = vmatmul.mubr.msk.f32.vlgmr.msra.gmra.mrb[16].mxu1 %vm2091_vm2, %v9450_v61 }
 0x4cc   : > { %8010 = vmatprep.mubr.msk.f32.mxu1 %vm2091_vm2, %v9452_v62  ;;  %v8406_v62 = vunpack.i.h.bf16 %v9454_v63 }
 0x4cf   : > { %8011 = vmatmul.mubr.msk.f32.gmra.mrb[18].mxu1 %vm2091_vm2, %v9457_v6 }
 0x4d0   : > { %8013 = vmatprep.mubr.msk.f32.mxu1 %vm2091_vm2, %v9460_v8  ;;  %v8449_v8 = vpack.i.bf16 %v8406_v62, %v9367_v3 }
 0x4d1   : > { %v2216_v5 = vpop.trf.xlu0 }
 0x4d3   : > { %8014 = vmatmul.mubr.msk.f32.gmra.mrb[20].mxu1 %vm2091_vm2, %v9462_v11 }
 0x4d4   : > { %8016 = vmatprep.mubr.msk.f32.mxu1 %vm2091_vm2, %v9464_v14 }
 0x4d5   : > { %v2217_v20 = vpop.trf.xlu0 }
 0x4d7   : > { %8017 = vmatmul.mubr.msk.f32.gmra.mrb[22].mxu1 %vm2091_vm2, %v9466_v16 }
 0x4d8   : > { %8021 = vmatprep.mubr.msk.f32.mxu1 %vm2091_vm2, %v2184_v55  ;;  %v8251_v55 = vpack.c.bf16 %v8445_v49, %v8440_v48 }
 0x4d9   : > { %v2218_v36 = vpop.trf.xlu0 }
 0x4dd   : > { %v2219_v3 = vpop.trf.xlu0 }
 0x4e1   : > { %v2220_v63 = vpop.trf.xlu0 }
 0x4e5   : > { %v2221_v19 = vpop.trf.xlu0 }
 0x4ee   : > { %v2121_v61 = vpop.xlane.xlu1 %2120 }
 0x4ef   : > { %8895 = vrcp.f32 %v2121_v61 }
 0x4f2   : > { %v2124_v6 = vpop.xlane.xlu1 %2123 }
 0x4f3   : > { %8897 = vrcp.f32 %v2124_v6 }
 0x4f5   : > { %8450 = vxpose.xlu1.b32.start.end [1/1] (short) (narrow) %v8449_v8, 64 }
 0x4f9   : > { %v8896_v11 = vpop.eup %8895 }
 0x4fa   : > { %v2133_v33 = vmul.f32 %v8896_v11, %v8888_v44  ;;  %v8242_v44 = vpack.c.bf16 %v8415_v12, %v8410_v40 }
 0x4fc   : > { %8019 = vmatprep.subr.msk.mxu1 %vm2091_vm2, %v2133_v33 }
 0x4fd   : > { %v8898_v14 = vpop.eup %8897  ;;  %8020 = vmatpush3.xpose.msk.msra.mxu1 %vm2091_vm2, %v2133_v33 }
 0x4fe   : > { %v2134_v16 = vmul.f32 %v8898_v14, %v8890_v47  ;;  %v2222_v47 = vpop.trf.xlu0 }
 0x500   : > { %8022 = vmatmul.mubr.msk.f32.vlgmr.msra.gmra.mrb[24].mxu1 %vm2091_vm2, %v2185_v56  ;;  %8033 = vmatprep.subr.msk.mxu1 %vm2091_vm2, %v2134_v16  ;;  %v8428_v56 = vunpack.i.h.bf16 %v9479_v39 }
 0x501   : > { %8024 = vmatprep.mubr.msk.f32.mxu1 %vm2091_vm2, %v2186_v59  ;;  %8034 = vmatpush3.xpose.msk.msra.mxu1 %vm2091_vm2, %v2134_v16  ;;  %v8254_v59 = vpack.c.bf16 %v8418_v51, %v8413_v50 }
 0x502   : > { %8241 = vmatprep.subr.bf16.mxu1 %v9002_v9  ;;  %v2223_v52 = vpop.trf.xlu0 }
 0x504   : > { %8025 = vmatmul.mubr.msk.f32.gmra.mrb[26].mxu1 %vm2091_vm2, %v2187_v60 }
 0x505   : > { %8027 = vmatprep.mubr.msk.f32.mxu1 %vm2091_vm2, %v2188_v0  ;;  %v9570_v0 = vpop.permute.xlu1 %3070 }
 0x508   : > { %8028 = vmatmul.mubr.msk.f32.gmra.mrb[28].mxu1 %vm2091_vm2, %v2189_v1 }
 0x509   : > { %8030 = vmatprep.mubr.msk.f32.mxu1 %vm2091_vm2, %v2190_v43 }
 0x50c   : > { %8031 = vmatmul.mubr.msk.f32.gmra.mrb[30].mxu1 %vm2091_vm2, %v2191_v4 }
 0x50d   : > { %8035 = vmatprep.mubr.msk.f32.mxu1 %vm2091_vm2, %v2216_v5 }
 0x510   : > { %8036 = vmatmul.mubr.msk.f32.vlgmr.msra.gmra.mrb[32].mxu1 %vm2091_vm2, %v2217_v20 }
 0x511   : > { %8243 = vmatpush3.bf16.msra.mxu1 %v8242_v44  ;;  %8038 = vmatprep.mubr.msk.f32.mxu1 %vm2091_vm2, %v2218_v36 }
 0x512   : > { %8244 = vmatprep.subr.bf16.mxu1 %v9002_v9 }
 0x514   : > { %8039 = vmatmul.mubr.msk.f32.gmra.mrb[34].mxu1 %vm2091_vm2, %v2219_v3 }
 0x515   : > { %8246 = vmatpush3.bf16.msra.mxu1 %v8245_v46  ;;  %8041 = vmatprep.mubr.msk.f32.mxu1 %vm2091_vm2, %v2220_v63 }
 0x516   : > { %8247 = vmatprep.subr.bf16.mxu1 %v9002_v9 }
 0x518   : > { %8042 = vmatmul.mubr.msk.f32.gmra.mrb[36].mxu1 %vm2091_vm2, %v2221_v19 }
 0x519   : > { %8249 = vmatpush3.bf16.msra.mxu1 %v9487_v53  ;;  %8044 = vmatprep.mubr.msk.f32.mxu1 %vm2091_vm2, %v2222_v47  ;;  %v8423_v53 = vunpack.i.h.bf16 %v9477_v38  ;;  %v8448_v38 = vunpack.i.h.bf16 %v9483_v45 }
 0x51a   : > { %8250 = vmatprep.subr.bf16.mxu1 %v9002_v9 }
 0x51b   : > { %v8257_v30 = vpack.c.bf16 %v8428_v56, %v8423_v53  ;;  %v8263_v39 = vpack.c.bf16 %v8448_v38, %v8443_v29 }
 0x51c   : > { %8045 = vmatmul.mubr.msk.f32.gmra.mrb[38].mxu1 %vm2091_vm2, %v2223_v52 }
 0x51d   : > { %8252 = vmatpush3.bf16.msra.mxu1 %v8251_v55  ;;  %8077 = vmatprep.mubr.msk.f32.mxu1 %vm9003_vm0, %v9004_v10 }
 0x51e   : > { %8253 = vmatprep.subr.bf16.mxu1 %v9002_v9 }
 0x520   : > { %8078 = vmatmul.mubr.msk.f32.vlgmr.msra.gmra.mrb[40].mxu1 %vm1788_vm1, %v9328_v32  ;;  %v3068_v32 = vpop.permute.xlu0 %3067 }
 0x521   : > { %8255 = vmatpush3.bf16.msra.mxu1 %v8254_v59  ;;  %8096 = vmatprep.mubr.msk.f32.mxu1 %vm9003_vm0, %v9004_v10 }
 0x522   : > { %8256 = vmatprep.subr.bf16.mxu1 %v9002_v9 }
 0x525   : > { %8258 = vmatpush3.bf16.msra.mxu1 %v8257_v30 }
 0x526   : > { %8259 = vmatprep.subr.bf16.mxu1 %v9002_v9 }
 0x529   : > { %8261 = vmatpush3.bf16.msra.mxu1 %v9489_v54 }
 0x52a   : > { %8262 = vmatprep.subr.bf16.mxu1 %v9002_v9 }
 0x52d   : > { %8264 = vmatpush3.bf16.msra.mxu1 %v8263_v39 }
 0x52e   : > { %8265 = vmatprep.subr.bf16.mxu1 %v9002_v9 }
 0x530   : > { %8097 = vmatmul.mubr.msk.f32.vlgmr.msra.gmra.mrb[42].mxu1 %vm1788_vm1, %v3068_v32 }
 0x531   : > { %8115 = vmatprep.mubr.msk.f32.mxu1 %vm9003_vm0, %v9004_v10 }
 0x53e   : > { %v2248_v60 = vpop.trf.xlu0 }
 0x53f   : > { %8049 = vmatprep.mubr.msk.f32.mxu0 %vm2091_vm2, %v2248_v60 }
 0x542   : > { %v2249_v22 = vpop.trf.xlu0 }
 0x546   : > { %v2250_v45 = vpop.trf.xlu0 }
 0x54a   : > { %v2251_v1 = vpop.trf.xlu0 }
 0x54e   : > { %v2252_v43 = vpop.trf.xlu0 }
 0x54f   : > { %v2127_v54 = vpop.xlane.xlu1 %2126 }
 0x550   : > { %8899 = vrcp.f32 %v2127_v54 }
 0x552   : > { %v2253_v27 = vpop.trf.xlu0 }
 0x556   : > { %v2254_v21 = vpop.trf.xlu0 }
 0x55a   : > { %v8900_v4 = vpop.eup %8899  ;;  %v2255_v25 = vpop.trf.xlu0 }
 0x55b   : > { %v2135_v7 = vmul.f32 %v8900_v4, %v9495_v28 }
 0x55d   : > { %8047 = vmatprep.subr.msk.mxu0 %vm2091_vm2, %v2135_v7 }
 0x55e   : > { %8048 = vmatpush3.xpose.msk.msra.mxu0 %vm2091_vm2, %v2135_v7 }
 0x55f   : > { %8277 = vmatprep.subr.bf16.mxu0 %v9002_v9 }
 0x561   : > { %8050 = vmatmul.mubr.msk.f32.vlgmr.msra.gmra.mrb[4].mxu0 %vm2091_vm2, %v2249_v22 }
 0x562   : > { %8052 = vmatprep.mubr.msk.f32.mxu0 %vm2091_vm2, %v2250_v45 }
 0x565   : > { %8053 = vmatmul.mubr.msk.f32.gmra.mrb[6].mxu0 %vm2091_vm2, %v2251_v1 }
 0x566   : > { %8055 = vmatprep.mubr.msk.f32.mxu0 %vm2091_vm2, %v2252_v43 }
 0x569   : > { %8056 = vmatmul.mubr.msk.f32.gmra.mrb[8].mxu0 %vm2091_vm2, %v2253_v27 }
 0x56a   : > { %8058 = vmatprep.mubr.msk.f32.mxu0 %vm2091_vm2, %v2254_v21 }
 0x56d   : > { %8059 = vmatmul.mubr.msk.f32.gmra.mrb[10].mxu0 %vm2091_vm2, %v2255_v25 }
 0x56e   : > { %8134 = vmatprep.mubr.msk.f32.mxu0 %vm9003_vm0, %v9004_v10 }
 0x575   : > { %v8451_v35 = vpop.trf.xlu1 }
 0x576   : > { %v8455_v28 = vunpack.i.h.bf16 %v8451_v35  ;;  %v8452_v2 = vunpack.i.l.bf16 %v8451_v35 }
 0x579   : > { %v8456_v37 = vpop.trf.xlu1 }
 0x57a   : > { %v8460_v31 = vunpack.i.h.bf16 %v8456_v37  ;;  %v8457_v61 = vunpack.i.l.bf16 %v8456_v37 }
 0x57c   : > { %v8266_v62 = vpack.c.bf16 %v8457_v61, %v8452_v2  ;;  %v8278_v5 = vpack.c.bf16 %v8460_v31, %v8455_v28  ;;  %v7454_v2 = vld [vmem:[%s10453_s22 + $0x1] ss:$0 sm:$0xff] }
 0x57d   : > { %v8461_v6 = vpop.trf.xlu1 }
 0x57e   : > { %8267 = vmatpush3.bf16.msra.mxu1 %v8266_v62  ;;  %8279 = vmatpush3.bf16.msra.mxu0 %v8278_v5  ;;  %v8465_v8 = vunpack.i.h.bf16 %v8461_v6  ;;  %v8462_v20 = vunpack.i.l.bf16 %v8461_v6 }
 0x57f   : > { %8268 = vmatprep.subr.bf16.mxu1 %v9002_v9  ;;  %8280 = vmatprep.subr.bf16.mxu0 %v9002_v9 }
 0x581   : > { %v8466_v11 = vpop.trf.xlu1 }
 0x582   : > { %v8470_v33 = vunpack.i.h.bf16 %v8466_v11  ;;  %v8467_v10 = vunpack.i.l.bf16 %v8466_v11 }
 0x584   : > { %v8269_v14 = vpack.c.bf16 %v8467_v10, %v8462_v20  ;;  %v8281_v36 = vpack.c.bf16 %v8470_v33, %v8465_v8 }
 0x585   : > { %v8471_v16 = vpop.trf.xlu1 }
 0x586   : > { %8270 = vmatpush3.bf16.msra.mxu1 %v8269_v14  ;;  %8282 = vmatpush3.bf16.msra.mxu0 %v8281_v36  ;;  %v8475_v3 = vunpack.i.h.bf16 %v8471_v16  ;;  %v8472_v63 = vunpack.i.l.bf16 %v8471_v16 }
 0x587   : > { %8271 = vmatprep.subr.bf16.mxu1 %v9002_v9  ;;  %8283 = vmatprep.subr.bf16.mxu0 %v9002_v9 }
 0x589   : > { %v8476_v40 = vpop.trf.xlu1 }
 0x58a   : > { %v8480_v12 = vunpack.i.h.bf16 %v8476_v40  ;;  %v8477_v41 = vunpack.i.l.bf16 %v8476_v40 }
 0x58c   : > { %v8272_v42 = vpack.c.bf16 %v8477_v41, %v8472_v63  ;;  %v8284_v19 = vpack.c.bf16 %v8480_v12, %v8475_v3 }
 0x58d   : > { %v8481_v44 = vpop.trf.xlu1 }
 0x58e   : > { %8273 = vmatpush3.bf16.msra.mxu1 %v8272_v42  ;;  %8285 = vmatpush3.bf16.msra.mxu0 %v8284_v19  ;;  %v8485_v46 = vunpack.i.h.bf16 %v8481_v44  ;;  %v8482_v47 = vunpack.i.l.bf16 %v8481_v44 }
 0x58f   : > { %8274 = vmatprep.subr.bf16.mxu1 %v9002_v9  ;;  %8286 = vmatprep.subr.bf16.mxu0 %v9002_v9 }
 0x591   : > { %v8486_v48 = vpop.trf.xlu1 }
 0x592   : > { %v8490_v49 = vunpack.i.h.bf16 %v8486_v48  ;;  %v8487_v50 = vunpack.i.l.bf16 %v8486_v48 }
 0x594   : > { %v8275_v51 = vpack.c.bf16 %v8487_v50, %v8482_v47  ;;  %v8287_v52 = vpack.c.bf16 %v8490_v49, %v8485_v46 }
 0x596   : > { %8276 = vmatpush3.bf16.msra.mxu1 %v8275_v51  ;;  %8288 = vmatpush3.bf16.msra.mxu0 %v8287_v52 }
 0x599   : > { %8116 = vmatmul.mubr.msk.f32.vlgmr.msra.gmra.mrb[44].mxu1 %vm1788_vm1, %v9333_v34  ;;  %8135 = vmatmul.mubr.msk.f32.vlgmr.msra.gmra.mrb[12].mxu0 %vm1788_vm1, %v9570_v0 }
 0x59e   : > { %v9595_v55 = vpop.f32.mrb[16].mxu1 }
 0x59f   : > { %v9597_v53 = vpop.f32.mrb[17].mxu1 }
 0x5a2   : > { %v9599_v9 = vpop.f32.mrb[18].mxu1 }
 0x5a3   : > { %v9601_v56 = vpop.f32.mrb[19].mxu1 }
 0x5a6   : > { %v9603_v59 = vpop.f32.mrb[20].mxu1 }
 0x5a7   : > { %v9605_v30 = vpop.f32.mrb[21].mxu1 }
 0x5aa   : > { %v9607_v29 = vpop.f32.mrb[22].mxu1 }
 0x5ab   : > { %v9609_v38 = vpop.f32.mrb[23].mxu1 }
 0x5d3   : > { %v9611_v34 = vpop.f32.mrb[24].mxu1 }
 0x5d4   : > { %v9613_v39 = vpop.f32.mrb[25].mxu1 }
 0x5d7   : > { %v9615_v32 = vpop.f32.mrb[26].mxu1 }
 0x5d8   : > { %v9617_v60 = vpop.f32.mrb[27].mxu1 }
 0x5db   : > { %v9619_v22 = vpop.f32.mrb[28].mxu1 }
 0x5dc   : > { %v9621_v0 = vpop.f32.mrb[29].mxu1 }
 0x5df   : > { %v9623_v45 = vpop.f32.mrb[30].mxu1 }
 0x5e0   : > { %v9625_v54 = vpop.f32.mrb[31].mxu1 }
 0x5e3   : > { %v9627_v1 = vpop.f32.mrb[32].mxu1 }
 0x5e4   : > { %v9629_v43 = vpop.f32.mrb[33].mxu1 }
 0x5e7   : > { %v9631_v4 = vpop.f32.mrb[34].mxu1 }
 0x5e8   : > { %v9633_v7 = vpop.f32.mrb[35].mxu1 }
 0x5eb   : > { %v9635_v27 = vpop.f32.mrb[36].mxu1 }
 0x5ec   : > { %v9637_v21 = vpop.f32.mrb[37].mxu1 }
 0x5ef   : > { %v9639_v25 = vpop.f32.mrb[38].mxu1 }
 0x5f0   : > { %v9641_v35 = vpop.f32.mrb[39].mxu1 }
 0x5f3   : > { %v3284_v28 = vpop.f32.mrb[40].mxu1 }
 0x5f4   : > { %v3504_v37 = vmul.f32 0.125, %v3284_v28  ;;  %v8079_v31 = vpop.f32.mrb[41].mxu1 }
 0x5f6   : > { %v3514_v61 = vadd.f32 %v7454_v2, %v3504_v37 }
 0x5f8   : > { %v3518_v62 = vsel %vm2091_vm2, %v3514_v61, -inf }
 0x5f9   : > { %3519 = vmax.xlane.f32.xlu0 %v3518_v62 }
 0x603   : > { %v3356_v5 = vpop.f32.mrb[42].mxu1 }
 0x604   : > { %v3505_v6 = vmul.f32 0.125, %v3356_v5  ;;  %v8098_v8 = vpop.f32.mrb[43].mxu1 }
 0x606   : > { %v3515_v20 = vadd.f32 %v7454_v2, %v3505_v6 }
 0x608   : > { %v3521_v11 = vsel %vm2091_vm2, %v3515_v20, -inf }
 0x609   : > { %3522 = vmax.xlane.f32.xlu1 %v3521_v11 }
 0x634   : > { %v9646_v33 = vpop.f32.mrb[4].mxu0 }
 0x635   : > { %v9648_v10 = vpop.f32.mrb[5].mxu0 }
 0x638   : > { %v9650_v14 = vpop.f32.mrb[6].mxu0 }
 0x639   : > { %v9652_v36 = vpop.f32.mrb[7].mxu0 }
 0x63c   : > { %v9654_v16 = vpop.f32.mrb[8].mxu0 }
 0x63d   : > { %v9656_v3 = vpop.f32.mrb[9].mxu0 }
 0x640   : > { %v9658_v63 = vpop.f32.mrb[10].mxu0 }
 0x641   : > { %v9660_v40 = vpop.f32.mrb[11].mxu0 }
 0x66c   : > { %v3428_v12 = vpop.f32.mrb[44].mxu1  ;;  %v3500_v41 = vpop.f32.mrb[12].mxu0 }
 0x66d   : > { %v3506_v42 = vmul.f32 0.125, %v3428_v12  ;;  %v3507_v19 = vmul.f32 0.125, %v3500_v41  ;;  %v8117_v44 = vpop.f32.mrb[45].mxu1  ;;  %v8136_v46 = vpop.f32.mrb[13].mxu0 }
 0x66f   : > { %v3517_v47 = vadd.f32 %v7454_v2, %v3507_v19  ;;  %v3516_v48 = vadd.f32 %v7454_v2, %v3506_v42 }
 0x671   : > { %v3527_v49 = vsel %vm2091_vm2, %v3517_v47, -inf  ;;  %v3524_v50 = vsel %vm2091_vm2, %v3516_v48, -inf }
 0x672   : > { %3528 = vmax.xlane.f32.xlu1 %v3527_v49  ;;  %3525 = vmax.xlane.f32.xlu0 %v3524_v50 }
 0x683   : > { %3085 = vrot.lane.b32.xlu1 %v9397_v26, %s9001_s23 }
 0x686   : > { %v3520_v51 = vpop.xlane.xlu0 %3519 }
 0x687   : > { %v3530_v52 = vsub.f32 %v3514_v61, %v3520_v51 }
 0x688   : > { %3081 = vrot.lane.b32.xlu0 %v9394_v23, %s9001_s23 }
 0x689   : > { %v3534_v28 = vmul.f32 1.442695, %v3530_v52 }
 0x68b   : > { %8901 = vpow2.f32 %v3534_v28 }
 0x695   : > { %v8902_v2 = vpop.eup %8901 }
 0x696   : > { %v3523_v37 = vpop.xlane.xlu1 %3522  ;;  %v3542_v5 = vsel %vm2091_vm2, %v8902_v2, 0.0 }
 0x697   : > { %v3531_v31 = vsub.f32 %v3515_v20, %v3523_v37 }
 0x699   : > { %v3536_v62 = vmul.f32 1.442695, %v3531_v31 }
 0x69b   : > { %8903 = vpow2.f32 %v3536_v62 }
 0x6a5   : > { %v8904_v6 = vpop.eup %8903 }
 0x6a6   : > { %v3545_v8 = vsel %vm2091_vm2, %v8904_v6, 0.0 }
 0x6a7   : > { %3543 = vadd.xlane.f32.xlu1 %v3542_v5 }
 0x6ab   : > { %3546 = vadd.xlane.f32.xlu1 %v3545_v8 }
 0x6ff   : > { %v3529_v11 = vpop.xlane.xlu1 %3528  ;;  %v3526_v12 = vpop.xlane.xlu0 %3525 }
 0x700   : > { %v3533_v41 = vsub.f32 %v3517_v47, %v3529_v11  ;;  %v3532_v42 = vsub.f32 %v3516_v48, %v3526_v12 }
 0x702   : > { %v3540_v19 = vmul.f32 1.442695, %v3533_v41  ;;  %v3538_v61 = vmul.f32 1.442695, %v3532_v42 }
 0x703   : > { %v3086_v50 = vpop.permute.xlu1 %3085  ;;  %v3082_v28 = vpop.permute.xlu0 %3081 }
 0x704   : > { %8905 = vpow2.f32 %v3540_v19 }
 0x705   : > { %8907 = vpow2.f32 %v3538_v61 }
 0x70e   : > { %v8906_v20 = vpop.eup %8905 }
 0x70f   : > { %v8908_v44 = vpop.eup %8907  ;;  %v3551_v46 = vsel %vm2091_vm2, %v8906_v20, 0.0 }
 0x710   : > { %3552 = vadd.xlane.f32.xlu1 %v3551_v46  ;;  %v3548_v49 = vsel %vm2091_vm2, %v8908_v44, 0.0 }
 0x711   : > { %3549 = vadd.xlane.f32.xlu0 %v3548_v49 }
 0x734   : > { %v3544_v51 = vpop.xlane.xlu1 %3543 }
 0x735   : > { %8909 = vrcp.f32 %v3544_v51 }
 0x738   : > { %v3547_v52 = vpop.xlane.xlu1 %3546 }
 0x739   : > { %8911 = vrcp.f32 %v3547_v52 }
 0x73e   : > { %3562 = vxpose.xlu0.b32.start.end [1/1] (short) (narrow) %v9394_v23, 64 }
 0x73f   : > { %v8910_v47 = vpop.eup %8909 }
 0x740   : > { %v3558_v48 = vmul.f32 %v8910_v47, %v8902_v2 }
 0x742   : > { %8137 = vmatprep.subr.msk.mxu1 %vm2091_vm2, %v3558_v48 }
 0x743   : > { %v8912_v37 = vpop.eup %8911  ;;  %8138 = vmatpush3.xpose.msk.msra.mxu1 %vm2091_vm2, %v3558_v48  ;;  %3594 = vxpose.xlu1.b32.start.end [1/1] (short) (narrow) %v3082_v28, 64  ;;  %v9006_v28 = vmov 1934713408  }
 0x744   : > { %v3559_v31 = vmul.f32 %v8912_v37, %v8904_v6  ;;  %v2955_v37 = vunpack.c.l.s4 %v9006_v28 }
 0x746   : > { %8151 = vmatprep.subr.msk.mxu0 %vm2091_vm2, %v3559_v31 }
 0x747   : > { %8152 = vmatpush3.xpose.msk.msra.mxu0 %vm2091_vm2, %v3559_v31 }
 0x75b   : > { %3626 = vxpose.xlu0.b32.start.end [1/1] (short) (narrow) %v9397_v26, 64 }
 0x760   : > { %3658 = vxpose.xlu1.b32.start.end [1/1] (short) (narrow) %v3086_v50, 64 }
 0x778   : > { %2792 = vxpose.xlu0.b32.start [1/8] (short) (narrow) %v9597_v53, 8 }
 0x77c   : > { %2793 = vxpose.xlu0.b32.cont [2/8] (short) (narrow) %v9595_v55, 8 }
 0x77d   : > { %2824 = vxpose.xlu1.b32.start [1/8] (short) (narrow) %v9613_v39, 8 }
 0x780   : > { %2794 = vxpose.xlu0.b32.cont [3/8] (short) (narrow) %v9601_v56, 8 }
 0x781   : > { %2825 = vxpose.xlu1.b32.cont [2/8] (short) (narrow) %v9611_v34, 8 }
 0x784   : > { %2795 = vxpose.xlu0.b32.cont [4/8] (short) (narrow) %v9599_v9, 8 }
 0x785   : > { %2826 = vxpose.xlu1.b32.cont [3/8] (short) (narrow) %v9617_v60, 8 }
 0x788   : > { %2796 = vxpose.xlu0.b32.cont [5/8] (short) (narrow) %v9605_v30, 8 }
 0x789   : > { %2827 = vxpose.xlu1.b32.cont [4/8] (short) (narrow) %v9615_v32, 8 }
 0x78c   : > { %2797 = vxpose.xlu0.b32.cont [6/8] (short) (narrow) %v9603_v59, 8 }
 0x78d   : > { %2828 = vxpose.xlu1.b32.cont [5/8] (short) (narrow) %v9621_v0, 8 }
 0x790   : > { %2798 = vxpose.xlu0.b32.cont [7/8] (short) (narrow) %v9609_v38, 8 }
 0x791   : > { %2829 = vxpose.xlu1.b32.cont [6/8] (short) (narrow) %v9619_v22, 8 }
 0x794   : > { %2799 = vxpose.xlu0.b32.end [8/8] (short) (narrow) %v9607_v29, 8 }
 0x795   : > { %2830 = vxpose.xlu1.b32.cont [7/8] (short) (narrow) %v9625_v54, 8 }
 0x798   : > { %2856 = vxpose.xlu0.b32.start [1/8] (short) (narrow) %v9629_v43, 8 }
 0x799   : > { %2831 = vxpose.xlu1.b32.end [8/8] (short) (narrow) %v9623_v45, 8 }
 0x79c   : > { %2857 = vxpose.xlu0.b32.cont [2/8] (short) (narrow) %v9627_v1, 8 }
 0x79d   : > { %v3553_v23 = vpop.xlane.xlu1 %3552  ;;  %2888 = vxpose.xlu1.b32.start [1/8] (short) (narrow) %v9648_v10, 8 }
 0x79e   : > { %8913 = vrcp.f32 %v3553_v23  ;;  %v3550_v26 = vpop.xlane.xlu0 %3549 }
 0x79f   : > { %8915 = vrcp.f32 %v3550_v26 }
 0x7a0   : > { %2858 = vxpose.xlu0.b32.cont [3/8] (short) (narrow) %v9633_v7, 8 }
 0x7a1   : > { %2889 = vxpose.xlu1.b32.cont [2/8] (short) (narrow) %v9646_v33, 8 }
 0x7a4   : > { %2859 = vxpose.xlu0.b32.cont [4/8] (short) (narrow) %v9631_v4, 8 }
 0x7a5   : > { %2890 = vxpose.xlu1.b32.cont [3/8] (short) (narrow) %v9652_v36, 8 }
 0x7a8   : > { %v8914_v55 = vpop.eup %8913  ;;  %2860 = vxpose.xlu0.b32.cont [5/8] (short) (narrow) %v9637_v21, 8 }
 0x7a9   : > { %v8916_v53 = vpop.eup %8915  ;;  %2891 = vxpose.xlu1.b32.cont [4/8] (short) (narrow) %v9650_v14, 8  ;;  %v3561_v9 = vmul.f32 %v8914_v55, %v8906_v20 }
 0x7aa   : > { %v3560_v56 = vmul.f32 %v8916_v53, %v8908_v44  ;;  %v9005_v44 = vmov 1983009808  }
 0x7ab   : > { %8179 = vmatprep.subr.msk.mxu0 %vm2091_vm2, %v3561_v9  ;;  %v2923_v46 = vunpack.c.l.s4 %v9005_v44 }
 0x7ac   : > { %2861 = vxpose.xlu0.b32.cont [6/8] (short) (narrow) %v9635_v27, 8  ;;  %8165 = vmatprep.subr.msk.mxu1 %vm2091_vm2, %v3560_v56 }
 0x7ad   : > { %2892 = vxpose.xlu1.b32.cont [5/8] (short) (narrow) %v9656_v3, 8  ;;  %v2924_v50 = vunpack.c.0.s8 %v2923_v46 }
 0x7af   : > { %v9747_v23 = vsub.s32 %v2924_v50, %v9294_v13 }
 0x7b0   : > { %2862 = vxpose.xlu0.b32.cont [7/8] (short) (narrow) %v9641_v35, 8 }
 0x7b1   : > { %2893 = vxpose.xlu1.b32.cont [6/8] (short) (narrow) %v9654_v16, 8 }
 0x7b4   : > { %2863 = vxpose.xlu0.b32.end [8/8] (short) (narrow) %v9639_v25, 8 }
 0x7b5   : > { %2894 = vxpose.xlu1.b32.cont [7/8] (short) (narrow) %v9660_v40, 8 }
 0x7b9   : > { %2895 = vxpose.xlu1.b32.end [8/8] (short) (narrow) %v9658_v63, 8 }
 0x7be   : > { %v3578_v59 = vpop.trf.xlu0 }
 0x7bf   : > { %8139 = vmatprep.mubr.msk.f32.mxu1 %vm2091_vm2, %v3578_v59 }
 0x7c2   : > { %v3579_v30 = vpop.trf.xlu0 }
 0x7c3   : > { %8140 = vmatmul.mubr.msk.f32.vlgmr.msra.gmra.mrb[46].mxu1 %vm2091_vm2, %v3579_v30  ;;  %v3610_v29 = vpop.trf.xlu1 }
 0x7c4   : > { %8166 = vmatpush3.xpose.msk.msra.mxu1 %vm2091_vm2, %v3560_v56  ;;  %8153 = vmatprep.mubr.msk.f32.mxu0 %vm2091_vm2, %v3610_v29  ;;  %v2956_v56 = vunpack.c.0.s8 %v2955_v37 }
 0x7c6   : > { %v3580_v38 = vpop.trf.xlu0 }
 0x7c7   : > { %v3611_v34 = vpop.trf.xlu1  ;;  %8142 = vmatprep.mubr.msk.f32.mxu1 %vm2091_vm2, %v3580_v38 }
 0x7c8   : > { %8154 = vmatmul.mubr.msk.f32.vlgmr.msra.gmra.mrb[14].mxu0 %vm2091_vm2, %v3611_v34 }
 0x7c9   : > { %8180 = vmatpush3.xpose.msk.msra.mxu0 %vm2091_vm2, %v3561_v9 }
 0x7ca   : > { %v3581_v39 = vpop.trf.xlu0 }
 0x7cb   : > { %v3612_v32 = vpop.trf.xlu1  ;;  %8143 = vmatmul.mubr.msk.f32.gmra.mrb[48].mxu1 %vm2091_vm2, %v3581_v39 }
 0x7cc   : > { %8156 = vmatprep.mubr.msk.f32.mxu0 %vm2091_vm2, %v3612_v32 }
 0x7ce   : > { %v3582_v60 = vpop.trf.xlu0 }
 0x7cf   : > { %v3613_v22 = vpop.trf.xlu1  ;;  %8145 = vmatprep.mubr.msk.f32.mxu1 %vm2091_vm2, %v3582_v60  ;;  %v9754_v60 = vsub.s32 %v2956_v56, %v9294_v13 }
 0x7d0   : > { %8157 = vmatmul.mubr.msk.f32.gmra.mrb[16].mxu0 %vm2091_vm2, %v3613_v22 }
 0x7d2   : > { %v3583_v0 = vpop.trf.xlu0 }
 0x7d3   : > { %v3614_v45 = vpop.trf.xlu1  ;;  %8146 = vmatmul.mubr.msk.f32.gmra.mrb[50].mxu1 %vm2091_vm2, %v3583_v0 }
 0x7d4   : > { %8159 = vmatprep.mubr.msk.f32.mxu0 %vm2091_vm2, %v3614_v45 }
 0x7d6   : > { %v3584_v54 = vpop.trf.xlu0 }
 0x7d7   : > { %v3615_v1 = vpop.trf.xlu1  ;;  %8148 = vmatprep.mubr.msk.f32.mxu1 %vm2091_vm2, %v3584_v54 }
 0x7d8   : > { %8160 = vmatmul.mubr.msk.f32.gmra.mrb[18].mxu0 %vm2091_vm2, %v3615_v1 }
 0x7da   : > { %v3585_v43 = vpop.trf.xlu0 }
 0x7db   : > { %v3616_v4 = vpop.trf.xlu1  ;;  %8149 = vmatmul.mubr.msk.f32.gmra.mrb[52].mxu1 %vm2091_vm2, %v3585_v43 }
 0x7dc   : > { %8162 = vmatprep.mubr.msk.f32.mxu0 %vm2091_vm2, %v3616_v4 }
 0x7de   : > { %v3642_v7 = vpop.trf.xlu0 }
 0x7df   : > { %v3617_v27 = vpop.trf.xlu1  ;;  %8167 = vmatprep.mubr.msk.f32.mxu1 %vm2091_vm2, %v3642_v7 }
 0x7e0   : > { %8163 = vmatmul.mubr.msk.f32.gmra.mrb[20].mxu0 %vm2091_vm2, %v3617_v27 }
 0x7e2   : > { %v3643_v21 = vpop.trf.xlu0 }
 0x7e3   : > { %v3674_v25 = vpop.trf.xlu1  ;;  %8168 = vmatmul.mubr.msk.f32.vlgmr.msra.gmra.mrb[54].mxu1 %vm2091_vm2, %v3643_v21 }
 0x7e4   : > { %8181 = vmatprep.mubr.msk.f32.mxu0 %vm2091_vm2, %v3674_v25 }
 0x7e6   : > { %v3644_v35 = vpop.trf.xlu0 }
 0x7e7   : > { %v3675_v33 = vpop.trf.xlu1  ;;  %8170 = vmatprep.mubr.msk.f32.mxu1 %vm2091_vm2, %v3644_v35 }
 0x7e8   : > { %8182 = vmatmul.mubr.msk.f32.vlgmr.msra.gmra.mrb[22].mxu0 %vm2091_vm2, %v3675_v33 }
 0x7ea   : > { %v3645_v10 = vpop.trf.xlu0 }
 0x7eb   : > { %v3676_v14 = vpop.trf.xlu1  ;;  %8171 = vmatmul.mubr.msk.f32.gmra.mrb[56].mxu1 %vm2091_vm2, %v3645_v10 }
 0x7ec   : > { %8184 = vmatprep.mubr.msk.f32.mxu0 %vm2091_vm2, %v3676_v14 }
 0x7ee   : > { %v3646_v36 = vpop.trf.xlu0 }
 0x7ef   : > { %v3677_v16 = vpop.trf.xlu1  ;;  %8173 = vmatprep.mubr.msk.f32.mxu1 %vm2091_vm2, %v3646_v36 }
 0x7f0   : > { %8185 = vmatmul.mubr.msk.f32.gmra.mrb[24].mxu0 %vm2091_vm2, %v3677_v16 }
 0x7f2   : > { %v3647_v3 = vpop.trf.xlu0 }
 0x7f3   : > { %v3678_v63 = vpop.trf.xlu1  ;;  %8174 = vmatmul.mubr.msk.f32.gmra.mrb[58].mxu1 %vm2091_vm2, %v3647_v3 }
 0x7f4   : > { %8187 = vmatprep.mubr.msk.f32.mxu0 %vm2091_vm2, %v3678_v63 }
 0x7f6   : > { %v3648_v40 = vpop.trf.xlu0 }
 0x7f7   : > { %v3679_v62 = vpop.trf.xlu1  ;;  %8176 = vmatprep.mubr.msk.f32.mxu1 %vm2091_vm2, %v3648_v40 }
 0x7f8   : > { %8188 = vmatmul.mubr.msk.f32.gmra.mrb[26].mxu0 %vm2091_vm2, %v3679_v62 }
 0x7fa   : > { %v3649_v2 = vpop.trf.xlu0 }
 0x7fb   : > { %v3680_v5 = vpop.trf.xlu1  ;;  %8177 = vmatmul.mubr.msk.f32.gmra.mrb[60].mxu1 %vm2091_vm2, %v3649_v2 }
 0x7fc   : > { %8190 = vmatprep.mubr.msk.f32.mxu0 %vm2091_vm2, %v3680_v5 }
 0x7fe   : > { %v2808_v20 = vpop.trf.xlu0 }
 0x7ff   : > { %v3681_v6 = vpop.trf.xlu1 }
 0x800   : > { %8191 = vmatmul.mubr.msk.f32.gmra.mrb[28].mxu0 %vm2091_vm2, %v3681_v6 }
 0x803   : > { %v2840_v19 = vpop.trf.xlu1 }
 0x818   : > { %v2872_v47 = vpop.trf.xlu0 }
 0x819   : > { %v2920_v53 = vcombine.low %v2808_v20, %v2872_v47  ;;  %v2921_v9 = vcombine.high %v2808_v20, %v2872_v47 }
 0x81b   : > { %v2928_v34 = vrot.slane %v2920_v53, %v9747_v23  ;;  %v2935_v39 = vrot.slane %v2921_v9, %v9747_v23  ;;  %v8650_v9 = vld [vmem:[%s10454_s27 + $0x14] ss:$8 sps:$4 sm:$0xff]  }
 0x81d   : > { %v2904_v52 = vpop.trf.xlu1 }
 0x81e   : > { %v2936_v26 = vcombine.low %v2840_v19, %v2904_v52  ;;  %v2937_v55 = vcombine.high %v2840_v19, %v2904_v52 }
 0x820   : > { %v2944_v29 = vrot.slane %v2936_v26, %v9747_v23  ;;  %v2951_v38 = vrot.slane %v2937_v55, %v9747_v23  ;;  %v8645_v26 = vld [vmem:[%s10454_s27] ss:$8 sps:$4 sm:$0xff]   ;;  %v8647_v55 = vld [vmem:[%s10454_s27 + $0x4] ss:$8 sps:$4 sm:$0xff]  }
 0x821   : > { %4698 = vmatprep.subr.bf16.mxu1 %v8647_v55 }
 0x822   : > { %v2952_v0 = vcombine.low %v2928_v34, %v2944_v29  ;;  %v2953_v45 = vcombine.high %v2928_v34, %v2944_v29  ;;  %v2968_v54 = vcombine.low %v2935_v39, %v2951_v38  ;;  %v2969_v1 = vcombine.high %v2935_v39, %v2951_v38  ;;  %4699 = vmatpush1.bf16.msra.mxu1 %v8645_v26  ;;  %v8651_v29 = vld [vmem:[%s10454_s27 + $0x20] ss:$8 sps:$4 sm:$0xff]   ;;  %v8656_v38 = vld [vmem:[%s10454_s27 + $0x34] ss:$8 sps:$4 sm:$0xff]   ;;  %v8654_v34 = vld [vmem:[%s10454_s27 + $0x30] ss:$8 sps:$4 sm:$0xff]  }
 0x823   : > { %4700 = vmatprep.subr.bf16.mxu1 %v8650_v9  ;;  %v8659_v39 = vld [vmem:[%s10454_s27 + $0x44] ss:$8 sps:$4 sm:$0xff]  }
 0x824   : > { %v2960_v7 = vrot.slane %v2952_v0, %v9754_v60  ;;  %v2967_v27 = vrot.slane %v2953_v45, %v9754_v60  ;;  %v2976_v21 = vrot.slane %v2968_v54, %v9754_v60  ;;  %v2983_v25 = vrot.slane %v2969_v1, %v9754_v60  ;;  %v8660_v0 = vld [vmem:[%s10454_s27 + $0x50] ss:$8 sps:$4 sm:$0xff]   ;;  %v8665_v45 = vld [vmem:[%s10454_s27 + $0x64] ss:$8 sps:$4 sm:$0xff]   ;;  %v8663_v54 = vld [vmem:[%s10454_s27 + $0x60] ss:$8 sps:$4 sm:$0xff]  }
 0x825   : > { %v8668_v1 = vld [vmem:[%s10454_s27 + $0x74] ss:$8 sps:$4 sm:$0xff]  }
 0x826   : > { %v2988_v10 = vcombine.low %v2960_v7, %v2967_v27  ;;  %v7448_v14 = vcombine.high %v2960_v7, %v2967_v27  ;;  %v3004_v36 = vcombine.low %v2976_v21, %v2983_v25  ;;  %v7449_v16 = vcombine.high %v2976_v21, %v2983_v25  ;;  %v8669_v7 = vld [vmem:[%s10454_s27 + $0x80] ss:$8 sps:$4 sm:$0xff]   ;;  %v8674_v27 = vld [vmem:[%s10454_s27 + $0x94] ss:$8 sps:$4 sm:$0xff]   ;;  %v8672_v21 = vld [vmem:[%s10454_s27 + $0x90] ss:$8 sps:$4 sm:$0xff]  }
 0x827   : > { %v8677_v25 = vld [vmem:[%s10454_s27 + $0xa4] ss:$8 sps:$4 sm:$0xff]  }
 0x828   : > { %v2995_v40 = vrot.slane %v2988_v10, %v9747_v23  ;;  %v3003_v62 = vrot.slane %v7448_v14, %v9747_v23  ;;  %v3011_v2 = vrot.slane %v3004_v36, %v9747_v23  ;;  %v3019_v5 = vrot.slane %v7449_v16, %v9747_v23  ;;  %v8678_v10 = vld [vmem:[%s10454_s27 + $0xb0] ss:$8 sps:$4 sm:$0xff]   ;;  %v8683_v14 = vld [vmem:[%s10454_s27 + $0xc4] ss:$8 sps:$4 sm:$0xff]   ;;  %v8681_v36 = vld [vmem:[%s10454_s27 + $0xc0] ss:$8 sps:$4 sm:$0xff]  }
 0x829   : > { %v8686_v16 = vld [vmem:[%s10454_s27 + $0xd4] ss:$8 sps:$4 sm:$0xff]  }
 0x896   : > { %v8141_v8 = vpop.f32.mrb[46].mxu1 }
 0x897   : > { %v3783_v11 = vpop.f32.mrb[47].mxu1 }
 0x898   : > { %4218 = vxpose.xlu0.b32.start [1/8] (short) (narrow) %v3783_v11, 8  ;;  %v3021_v11 = vcombine.high %v2995_v40, %v3003_v62 }
 0x89a   : > { %v9765_v19 = vrot.slane %v3021_v11, %v9754_v60 }
 0x89b   : > { %v8155_v12 = vpop.f32.mrb[14].mxu0 }
 0x89c   : > { %v3915_v41 = vpop.f32.mrb[15].mxu0  ;;  %4219 = vxpose.xlu0.b32.cont [2/8] (short) (narrow) %v8141_v8, 8 }
 0x89d   : > { %4250 = vxpose.xlu1.b32.start [1/8] (short) (narrow) %v3915_v41, 8  ;;  %v3020_v41 = vcombine.low %v2995_v40, %v3003_v62  ;;  %v8687_v40 = vld [vmem:[%s10454_s27 + $0xe0] ss:$8 sps:$4 sm:$0xff]  }
 0x89e   : > { %v8144_v42 = vpop.f32.mrb[48].mxu1 }
 0x89f   : > { %v3793_v61 = vpop.f32.mrb[49].mxu1  ;;  %v9771_v20 = vrot.slane %v3020_v41, %v9754_v60 }
 0x8a0   : > { %4220 = vxpose.xlu0.b32.cont [3/8] (short) (narrow) %v3793_v61, 8 }
 0x8a1   : > { %4251 = vxpose.xlu1.b32.cont [2/8] (short) (narrow) %v8155_v12, 8  ;;  %v3037_v12 = vcombine.high %v3011_v2, %v3019_v5 }
 0x8a3   : > { %v8158_v49 = vpop.f32.mrb[16].mxu0  ;;  %v9768_v61 = vrot.slane %v3037_v12, %v9754_v60 }
 0x8a4   : > { %v3925_v51 = vpop.f32.mrb[17].mxu0  ;;  %4221 = vxpose.xlu0.b32.cont [4/8] (short) (narrow) %v8144_v42, 8  ;;  %v3036_v42 = vcombine.low %v3011_v2, %v3019_v5 }
 0x8a5   : > { %4252 = vxpose.xlu1.b32.cont [3/8] (short) (narrow) %v3925_v51, 8  ;;  %v3054_v51 = vcombine.low %v9765_v19, %v9768_v61 }
 0x8a6   : > { %v8147_v48 = vpop.f32.mrb[50].mxu1  ;;  %v9774_v44 = vrot.slane %v3036_v42, %v9754_v60 }
 0x8a7   : > { %v3803_v31 = vpop.f32.mrb[51].mxu1 }
 0x8a8   : > { %4222 = vxpose.xlu0.b32.cont [5/8] (short) (narrow) %v3803_v31, 8  ;;  %v3052_v50 = vcombine.low %v9771_v20, %v9774_v44 }
 0x8a9   : > { %4253 = vxpose.xlu1.b32.cont [4/8] (short) (narrow) %v8158_v49, 8 }
 0x8ab   : > { %v8161_v59 = vpop.f32.mrb[18].mxu0 }
 0x8ac   : > { %v3935_v30 = vpop.f32.mrb[19].mxu0  ;;  %4223 = vxpose.xlu0.b32.cont [6/8] (short) (narrow) %v8147_v48, 8 }
 0x8ad   : > { %4254 = vxpose.xlu1.b32.cont [5/8] (short) (narrow) %v3935_v30, 8  ;;  %v8653_v30 = vld [vmem:[%s10454_s27 + $0x24] ss:$8 sps:$4 sm:$0xff]  }
 0x8ae   : > { %v8150_v32 = vpop.f32.mrb[52].mxu1 }
 0x8af   : > { %v3813_v22 = vpop.f32.mrb[53].mxu1 }
 0x8b0   : > { %4224 = vxpose.xlu0.b32.cont [7/8] (short) (narrow) %v3813_v22, 8  ;;  %v8662_v22 = vld [vmem:[%s10454_s27 + $0x54] ss:$8 sps:$4 sm:$0xff]  }
 0x8b1   : > { %4255 = vxpose.xlu1.b32.cont [6/8] (short) (narrow) %v8161_v59, 8  ;;  %v8648_v59 = vld [vmem:[%s10454_s27 + $0x10] ss:$8 sps:$4 sm:$0xff]  }
 0x8b2   : > { %4701 = vmatpush1.bf16.msra.mxu1 %v8648_v59 }
 0x8b3   : > { %v8164_v43 = vpop.f32.mrb[20].mxu0  ;;  %4702 = vmatprep.subr.bf16.mxu1 %v8653_v30 }
 0x8b4   : > { %v3945_v4 = vpop.f32.mrb[21].mxu0  ;;  %4225 = vxpose.xlu0.b32.end [8/8] (short) (narrow) %v8150_v32, 8  ;;  %v8657_v32 = vld [vmem:[%s10454_s27 + $0x40] ss:$8 sps:$4 sm:$0xff]  }
 0x8b5   : > { %4256 = vxpose.xlu1.b32.cont [7/8] (short) (narrow) %v3945_v4, 8  ;;  %v8671_v4 = vld [vmem:[%s10454_s27 + $0x84] ss:$8 sps:$4 sm:$0xff]  }
 0x8b6   : > { %v8169_v35 = vpop.f32.mrb[54].mxu1  ;;  %4703 = vmatpush1.bf16.msra.mxu1 %v8651_v29  ;;  %v8692_v29 = vld [vmem:[%s10454_s27 + $0xf4] ss:$8 sps:$4 sm:$0xff]  }
 0x8b7   : > { %v4047_v33 = vpop.f32.mrb[55].mxu1  ;;  %4704 = vmatprep.subr.bf16.mxu1 %v8656_v38 }
 0x8b8   : > { %4282 = vxpose.xlu0.b32.start [1/8] (short) (narrow) %v4047_v33, 8  ;;  %v8680_v33 = vld [vmem:[%s10454_s27 + $0xb4] ss:$8 sps:$4 sm:$0xff]  }
 0x8b9   : > { %4257 = vxpose.xlu1.b32.end [8/8] (short) (narrow) %v8164_v43, 8  ;;  %v8666_v43 = vld [vmem:[%s10454_s27 + $0x70] ss:$8 sps:$4 sm:$0xff]  }
 0x8ba   : > { %4705 = vmatpush1.bf16.msra.mxu1 %v8654_v34 }
 0x8bb   : > { %v8183_v3 = vpop.f32.mrb[22].mxu0  ;;  %4706 = vmatprep.subr.bf16.mxu1 %v8659_v39 }
 0x8bc   : > { %v4179_v63 = vpop.f32.mrb[23].mxu0  ;;  %4283 = vxpose.xlu0.b32.cont [2/8] (short) (narrow) %v8169_v35, 8  ;;  %v8675_v35 = vld [vmem:[%s10454_s27 + $0xa0] ss:$8 sps:$4 sm:$0xff]  }
 0x8bd   : > { %4314 = vxpose.xlu1.b32.start [1/8] (short) (narrow) %v4179_v63, 8  ;;  %v8689_v63 = vld [vmem:[%s10454_s27 + $0xe4] ss:$8 sps:$4 sm:$0xff]  }
 0x8be   : > { %v8172_v6 = vpop.f32.mrb[56].mxu1  ;;  %4707 = vmatpush1.bf16.msra.mxu1 %v8657_v32 }
 0x8bf   : > { %v4057_v8 = vpop.f32.mrb[57].mxu1  ;;  %4708 = vmatprep.subr.bf16.mxu1 %v8662_v22  ;;  %v8690_v22 = vld [vmem:[%s10454_s27 + $0xf0] ss:$8 sps:$4 sm:$0xff]  }
 0x8c0   : > { %4284 = vxpose.xlu0.b32.cont [3/8] (short) (narrow) %v4057_v8, 8 }
 0x8c1   : > { %4315 = vxpose.xlu1.b32.cont [2/8] (short) (narrow) %v8183_v3, 8  ;;  %v8684_v3 = vld [vmem:[%s10454_s27 + $0xd0] ss:$8 sps:$4 sm:$0xff]  }
 0x8c2   : > { %4709 = vmatpush1.bf16.msra.mxu1 %v8660_v0 }
 0x8c3   : > { %v8186_v46 = vpop.f32.mrb[24].mxu0  ;;  %4710 = vmatprep.subr.bf16.mxu1 %v8665_v45 }
 0x8c4   : > { %v4189_v49 = vpop.f32.mrb[25].mxu0  ;;  %4285 = vxpose.xlu0.b32.cont [4/8] (short) (narrow) %v8172_v6, 8 }
 0x8c5   : > { %4316 = vxpose.xlu1.b32.cont [3/8] (short) (narrow) %v4189_v49, 8 }
 0x8c6   : > { %v8175_v52 = vpop.f32.mrb[58].mxu1  ;;  %4711 = vmatpush1.bf16.msra.mxu1 %v8663_v54 }
 0x8c7   : > { %v4067_v47 = vpop.f32.mrb[59].mxu1  ;;  %4712 = vmatprep.subr.bf16.mxu1 %v8668_v1 }
 0x8c8   : > { %4286 = vxpose.xlu0.b32.cont [5/8] (short) (narrow) %v4067_v47, 8 }
 0x8c9   : > { %4317 = vxpose.xlu1.b32.cont [4/8] (short) (narrow) %v8186_v46, 8 }
 0x8ca   : > { %4713 = vmatpush1.bf16.msra.mxu1 %v8666_v43 }
 0x8cb   : > { %v8189_v48 = vpop.f32.mrb[26].mxu0  ;;  %4714 = vmatprep.subr.bf16.mxu1 %v8671_v4 }
 0x8cc   : > { %v4199_v28 = vpop.f32.mrb[27].mxu0  ;;  %4287 = vxpose.xlu0.b32.cont [6/8] (short) (narrow) %v8175_v52, 8 }
 0x8cd   : > { %4318 = vxpose.xlu1.b32.cont [5/8] (short) (narrow) %v4199_v28, 8 }
 0x8ce   : > { %v8178_v37 = vpop.f32.mrb[60].mxu1  ;;  %4715 = vmatpush1.bf16.msra.mxu1 %v8669_v7 }
 0x8cf   : > { %v4077_v31 = vpop.f32.mrb[61].mxu1  ;;  %4716 = vmatprep.subr.bf16.mxu1 %v8674_v27 }
 0x8d0   : > { %4288 = vxpose.xlu0.b32.cont [7/8] (short) (narrow) %v4077_v31, 8 }
 0x8d1   : > { %4319 = vxpose.xlu1.b32.cont [6/8] (short) (narrow) %v8189_v48, 8 }
 0x8d2   : > { %4717 = vmatpush1.bf16.msra.mxu1 %v8672_v21  ;;  %v3055_v21 = vcombine.high %v9765_v19, %v9768_v61 }
 0x8d3   : > { %v8192_v53 = vpop.f32.mrb[28].mxu0  ;;  %4718 = vmatprep.subr.bf16.mxu1 %v8677_v25 }
 0x8d4   : > { %v4209_v56 = vpop.f32.mrb[29].mxu0  ;;  %4289 = vxpose.xlu0.b32.end [8/8] (short) (narrow) %v8178_v37, 8 }
 0x8d5   : > { %4320 = vxpose.xlu1.b32.cont [7/8] (short) (narrow) %v4209_v56, 8 }
 0x8d6   : > { %4719 = vmatpush1.bf16.msra.mxu1 %v8675_v35 }
 0x8d7   : > { %4720 = vmatprep.subr.bf16.mxu1 %v8680_v33 }
 0x8d9   : > { %4321 = vxpose.xlu1.b32.end [8/8] (short) (narrow) %v8192_v53, 8 }
 0x8da   : > { %4721 = vmatpush1.bf16.msra.mxu1 %v8678_v10 }
 0x8db   : > { %4722 = vmatprep.subr.bf16.mxu1 %v8683_v14 }
 0x8de   : > { %4723 = vmatpush1.bf16.msra.mxu1 %v8681_v36 }
 0x8df   : > { %4724 = vmatprep.subr.bf16.mxu1 %v8686_v16 }
 0x8e2   : > { %4725 = vmatpush1.bf16.msra.mxu1 %v8684_v3 }
 0x8e3   : > { %4726 = vmatprep.subr.bf16.mxu1 %v8689_v63 }
 0x8e6   : > { %4727 = vmatpush1.bf16.msra.mxu1 %v8687_v40 }
 0x8e7   : > { %4728 = vmatprep.subr.bf16.mxu1 %v8692_v29  ;;  %v4813_v29 = vld [vmem:[%s9179_s26 + $0x8] sm:$0xff] }
 0x8ea   : > { %4729 = vmatpush1.bf16.msra.mxu1 %v8690_v22  ;;  %v4824_v22 = vld [vmem:[%s9179_s26 + $0x60] sm:$0xff] }
 0x918   : > { %v4234_v62 = vpop.trf.xlu0 }
 0x91d   : > { %v4266_v2 = vpop.trf.xlu1 }
 0x938   : > { %v4298_v5 = vpop.trf.xlu0 }
 0x939   : > { %v4346_v6 = vcombine.low %v4234_v62, %v4298_v5  ;;  %v4347_v8 = vcombine.high %v4234_v62, %v4298_v5 }
 0x93b   : > { %v4354_v42 = vrot.slane %v4346_v6, %v9747_v23  ;;  %v4361_v46 = vrot.slane %v4347_v8, %v9747_v23 }
 0x93d   : > { %v4330_v11 = vpop.trf.xlu1 }
 0x93e   : > { %v4362_v12 = vcombine.low %v4266_v2, %v4330_v11  ;;  %v4363_v41 = vcombine.high %v4266_v2, %v4330_v11 }
 0x940   : > { %v4370_v49 = vrot.slane %v4362_v12, %v9747_v23  ;;  %v4377_v52 = vrot.slane %v4363_v41, %v9747_v23 }
 0x942   : > { %v4378_v47 = vcombine.low %v4354_v42, %v4370_v49  ;;  %v4379_v48 = vcombine.high %v4354_v42, %v4370_v49  ;;  %v4394_v28 = vcombine.low %v4361_v46, %v4377_v52  ;;  %v4395_v37 = vcombine.high %v4361_v46, %v4377_v52  ;;  %v8957_v46 = vld [vmem:[%s9209_s9] sm:$0xff] }
 0x944   : > { %v4386_v31 = vrot.slane %v4378_v47, %v9754_v60  ;;  %v4393_v26 = vrot.slane %v4379_v48, %v9754_v60  ;;  %v4402_v55 = vrot.slane %v4394_v28, %v9754_v60  ;;  %v4409_v53 = vrot.slane %v4395_v37, %v9754_v60  ;;  %v8958_v48 = vld [vmem:[%s9209_s9 + $0x8] sm:$0xff] }
 0x946   : > { %v4414_v9 = vcombine.low %v4386_v31, %v4393_v26  ;;  %v7491_v56 = vcombine.high %v4386_v31, %v4393_v26  ;;  %v4430_v59 = vcombine.low %v4402_v55, %v4409_v53  ;;  %v7492_v30 = vcombine.high %v4402_v55, %v4409_v53  ;;  %v8959_v31 = vld [vmem:[%s9209_s9 + $0x10] sm:$0xff]  ;;  %v8960_v55 = vld [vmem:[%s9209_s9 + $0x18] sm:$0xff] }
 0x948   : > { %v4421_v38 = vrot.slane %v4414_v9, %v9747_v23  ;;  %v4429_v34 = vrot.slane %v7491_v56, %v9747_v23  ;;  %v4437_v39 = vrot.slane %v4430_v59, %v9747_v23  ;;  %v4445_v32 = vrot.slane %v7492_v30, %v9747_v23  ;;  %v4812_v59 = vld [vmem:[%s9179_s26] sm:$0xff] }
 0x949   : > { %v3053_v23 = vcombine.high %v9771_v20, %v9774_v44  ;;  %v4526_v20 = vld [vmem:[%s10455_s29] sm:$0x3] }
 0x94a   : > { %v4447_v0 = vcombine.high %v4421_v38, %v4429_v34  ;;  %v4463_v45 = vcombine.high %v4437_v39, %v4445_v32  ;;  %v4446_v54 = vcombine.low %v4421_v38, %v4429_v34  ;;  %v4462_v1 = vcombine.low %v4437_v39, %v4445_v32  ;;  %v4816_v30 = vld [vmem:[%s9179_s26 + $0x20] sm:$0xff]  ;;  %v4817_v39 = vld [vmem:[%s9179_s26 + $0x28] sm:$0xff] }
 0x94b   : > { %v4531_v44 = vrot.slane %v4526_v20, %v9301_v18  ;;  %v4535_v19 = vrot.slane %v4526_v20, %v9316_v24  ;;  %v7525_v38 = vcombine.low %v4812_v59, %v4816_v30  ;;  %v7526_v34 = vcombine.high %v4812_v59, %v4816_v30  ;;  %v4820_v32 = vld [vmem:[%s9179_s26 + $0x40] sm:$0xff] }
 0x94c   : > { %v4461_v43 = vrot.slane %v4447_v0, %v9754_v60  ;;  %v4477_v4 = vrot.slane %v4463_v45, %v9754_v60  ;;  %v4454_v7 = vrot.slane %v4446_v54, %v9754_v60  ;;  %v4470_v27 = vrot.slane %v4462_v1, %v9754_v60  ;;  %v4821_v1 = vld [vmem:[%s9179_s26 + $0x48] sm:$0xff]  ;;  %v4868_v30 = vld [vmem:[%s9179_s26 + $0x1c0] sm:$0xff] }
 0x94d   : > { %v7527_v0 = vcombine.low %v4813_v29, %v4817_v39  ;;  %v7528_v45 = vcombine.high %v4813_v29, %v4817_v39  ;;  %v7534_v54 = vcombine.high %v4820_v32, %v4824_v22  ;;  %5622 = vmatprep.subr.bf16.mxu0 %v7526_v34  ;;  %v4872_v29 = vld [vmem:[%s9179_s26 + $0x1e0] sm:$0xff]  ;;  %v4873_v34 = vld [vmem:[%s9179_s26 + $0x1e8] sm:$0xff] }
 0x94e   : > { %v4481_v25 = vcombine.high %v4461_v43, %v4477_v4  ;;  %v4479_v35 = vcombine.high %v4454_v7, %v4470_v27  ;;  %v4478_v33 = vcombine.low %v4454_v7, %v4470_v27  ;;  %v4480_v10 = vcombine.low %v4461_v43, %v4477_v4  ;;  %v4825_v43 = vld [vmem:[%s9179_s26 + $0x68] sm:$0xff]  ;;  %v4828_v4 = vld [vmem:[%s9179_s26 + $0x80] sm:$0xff]  ;;  %5623 = vmatpush1.bf16.msra.mxu0 %v7525_v38 }
 0x94f   : > { %v7536_v7 = vcombine.high %v4821_v1, %v4825_v43  ;;  %v4832_v27 = vld [vmem:[%s9179_s26 + $0xa0] sm:$0xff]  ;;  %5665 = vmatprep.subr.bf16.mxu1 %v7528_v45  ;;  %5624 = vmatprep.subr.bf16.mxu0 %v7534_v54  ;;  %v4869_v38 = vld [vmem:[%s9179_s26 + $0x1c8] sm:$0xff] }
 0x950   : > { %v8491_v14 = vpack.i.bf16 %v4481_v25, %v3055_v21  ;;  %v8496_v36 = vpack.i.bf16 %v4479_v35, %v3053_v23  ;;  %v4829_v21 = vld [vmem:[%s9179_s26 + $0x88] sm:$0xff]  ;;  %v7533_v25 = vcombine.low %v4820_v32, %v4824_v22  ;;  %v7535_v35 = vcombine.low %v4821_v1, %v4825_v43  ;;  %v4876_v45 = vld [vmem:[%s9179_s26 + $0x200] sm:$0xff] }
 0x951   : > { %v4833_v23 = vld [vmem:[%s9179_s26 + $0xa8] sm:$0xff]  ;;  %v7582_v22 = vcombine.high %v4868_v30, %v4872_v29  ;;  %v4880_v54 = vld [vmem:[%s9179_s26 + $0x220] sm:$0xff] }
 0x952   : > { %8492 = vrot.lane.b32.xlu0 %v8491_v14, %s9001_s23  ;;  %8497 = vrot.lane.b32.xlu1 %v8496_v36, %s9001_s23  ;;  %v4836_v14 = vld [vmem:[%s9179_s26 + $0xc0] sm:$0xff]  ;;  %v4877_v1 = vld [vmem:[%s9179_s26 + $0x208] sm:$0xff] }
 0x953   : > { %v4840_v36 = vld [vmem:[%s9179_s26 + $0xe0] sm:$0xff]  ;;  %5625 = vmatpush1.bf16.msra.mxu0 %v7533_v25  ;;  %v4881_v43 = vld [vmem:[%s9179_s26 + $0x228] sm:$0xff] }
 0x954   : > { %v4888_v25 = vld [vmem:[%s9179_s26 + $0x260] sm:$0xff] }
 0x9c4   : > { %v8493_v16 = vpop.permute.xlu0 %8492  ;;  %v8498_v3 = vpop.permute.xlu1 %8497 }
 0x9c5   : > { %v8495_v60 = vunpack.i.h.bf16 %v8493_v16  ;;  %v8494_v63 = vunpack.i.l.bf16 %v8493_v16  ;;  %v8500_v40 = vunpack.i.h.bf16 %v8498_v3  ;;  %v8499_v62 = vunpack.i.l.bf16 %v8498_v3  ;;  %v4837_v16 = vld [vmem:[%s9179_s26 + $0xc8] sm:$0xff] }
 0x9c6   : > { %v4841_v3 = vld [vmem:[%s9179_s26 + $0xe8] sm:$0xff] }
 0x9c7   : > { %v3064_v2 = vsel %vm1788_vm1, %v3052_v50, %v8499_v62  ;;  %v4490_v5 = vsel %vm1788_vm1, %v4478_v33, %v8500_v40  ;;  %v3065_v6 = vsel %vm1788_vm1, %v3054_v51, %v8494_v63  ;;  %v4491_v8 = vsel %vm1788_vm1, %v4480_v10, %v8495_v60 }
 0x9c8   : > { %v4492_v11 = vpack.c.bf16 %v4490_v5, %v3064_v2  ;;  %v4493_v12 = vpack.c.bf16 %v4491_v8, %v3065_v6  ;;  %v7542_v33 = vcombine.high %v4828_v4, %v4832_v27  ;;  %v7544_v10 = vcombine.high %v4829_v21, %v4833_v23  ;;  %v4844_v2 = vld [vmem:[%s9179_s26 + $0x100] sm:$0xff]  ;;  %v4845_v6 = vld [vmem:[%s9179_s26 + $0x108] sm:$0xff] }
 0x9c9   : > { %v7541_v60 = vcombine.low %v4828_v4, %v4832_v27  ;;  %v7543_v63 = vcombine.low %v4829_v21, %v4833_v23  ;;  %v7550_v40 = vcombine.high %v4836_v14, %v4840_v36  ;;  %v7552_v62 = vcombine.high %v4837_v16, %v4841_v3  ;;  %v4848_v5 = vld [vmem:[%s9179_s26 + $0x120] sm:$0xff]  ;;  %v4849_v8 = vld [vmem:[%s9179_s26 + $0x128] sm:$0xff] }
 0x9ca   : > { %4730 = vmatprep.mubr.bf16.mxu1 %v4493_v12  ;;  %5626 = vmatprep.subr.bf16.mxu0 %v7542_v33  ;;  %v7551_v12 = vcombine.low %v4837_v16, %v4841_v3  ;;  %v7558_v20 = vcombine.high %v4844_v2, %v4848_v5  ;;  %v7581_v4 = vcombine.low %v4868_v30, %v4872_v29  ;;  %v4884_v23 = vld [vmem:[%s9179_s26 + $0x240] sm:$0xff]  ;;  %v4889_v33 = vld [vmem:[%s9179_s26 + $0x268] sm:$0xff] }
 0x9cb   : > { %4731 = vmatmul.mubr.bf16.vlgmr.msra.gmra.mrb[64].mxu1 %v4492_v11  ;;  %5627 = vmatpush1.bf16.msra.mxu0 %v7541_v60  ;;  %v7549_v11 = vcombine.low %v4836_v14, %v4840_v36  ;;  %v7590_v27 = vcombine.high %v4876_v45, %v4880_v54  ;;  %v7592_v21 = vcombine.high %v4877_v1, %v4881_v43  ;;  %v4912_v30 = vld [vmem:[%s9179_s26 + $0x320] sm:$0xff]  ;;  %v4909_v29 = vld [vmem:[%s9179_s26 + $0x308] sm:$0xff] }
 0x9cc   : > { %5666 = vmatpush1.bf16.msra.mxu1 %v7527_v0  ;;  %5628 = vmatprep.subr.bf16.mxu0 %v7550_v40  ;;  %v7584_v0 = vcombine.high %v4869_v38, %v4873_v34  ;;  %v7591_v14 = vcombine.low %v4877_v1, %v4881_v43  ;;  %v7598_v36 = vcombine.high %v4884_v23, %v4888_v25  ;;  %v4921_v43 = vld [vmem:[%s9179_s26 + $0x368] sm:$0xff] }
 0x9cd   : > { %5667 = vmatprep.subr.bf16.mxu1 %v7536_v7  ;;  %v7583_v7 = vcombine.low %v4869_v38, %v4873_v34  ;;  %v7597_v3 = vcombine.low %v4884_v23, %v4888_v25  ;;  %v4913_v34 = vld [vmem:[%s9179_s26 + $0x328] sm:$0xff]  ;;  %v4928_v23 = vld [vmem:[%s9179_s26 + $0x3a0] sm:$0xff] }
 0x9ce   : > { %v4925_v25 = vld [vmem:[%s9179_s26 + $0x388] sm:$0xff] }
 0x9cf   : > { %5629 = vmatpush1.bf16.msra.mxu0 %v7549_v11 }
 0x9d0   : > { %5668 = vmatpush1.bf16.msra.mxu1 %v7535_v35  ;;  %5630 = vmatprep.subr.bf16.mxu0 %v7558_v20  ;;  %v4885_v35 = vld [vmem:[%s9179_s26 + $0x248] sm:$0xff] }
 0x9d1   : > { %5669 = vmatprep.subr.bf16.mxu1 %v7544_v10  ;;  %v7589_v10 = vcombine.low %v4876_v45, %v4880_v54  ;;  %v7600_v16 = vcombine.high %v4885_v35, %v4889_v33  ;;  %v7599_v60 = vcombine.low %v4885_v35, %v4889_v33  ;;  %v4920_v45 = vld [vmem:[%s9179_s26 + $0x360] sm:$0xff]  ;;  %v4917_v54 = vld [vmem:[%s9179_s26 + $0x348] sm:$0xff] }
 0x9d2   : > { %v4929_v33 = vld [vmem:[%s9179_s26 + $0x3a8] sm:$0xff] }
 0x9d4   : > { %5670 = vmatpush1.bf16.msra.mxu1 %v7543_v63 }
 0x9d5   : > { %5671 = vmatprep.subr.bf16.mxu1 %v7552_v62 }
 0x9d8   : > { %5672 = vmatpush1.bf16.msra.mxu1 %v7551_v12 }
 0xa9e   : > { %v4732_v61 = vpop.f32.mrb[64].mxu1 }
 0xa9f   : > { %v4733_v50 = vadd.f32 %v4732_v61, %v4531_v44  ;;  %v4734_v51 = vpop.f32.mrb[65].mxu1  ;;  %v4856_v61 = vld [vmem:[%s9179_s26 + $0x160] sm:$0xff] }
 0xaa0   : > { %v4735_v41 = vadd.f32 %v4734_v51, %v4535_v19  ;;  %v4736_v42 = vpop.f32.mrb[66].mxu1  ;;  %v4857_v51 = vld [vmem:[%s9179_s26 + $0x168] sm:$0xff] }
 0xaa1   : > { %v9852_v49 = vadd.f32 %v8957_v46, %v4733_v50  ;;  %v4737_v52 = vadd.f32 %v4736_v42, %v4531_v44  ;;  %v4738_v47 = vpop.f32.mrb[67].mxu1  ;;  %v7560_v44 = vcombine.high %v4845_v6, %v4849_v8  ;;  %v4853_v50 = vld [vmem:[%s9179_s26 + $0x148] sm:$0xff]  ;;  %v7559_v42 = vcombine.low %v4845_v6, %v4849_v8 }
 0xaa2   : > { %v9855_v28 = vadd.f32 %v8958_v48, %v4735_v41  ;;  %v4739_v37 = vadd.f32 %v4738_v47, %v4535_v19  ;;  %v4852_v19 = vld [vmem:[%s9179_s26 + $0x140] sm:$0xff]  ;;  %v7557_v41 = vcombine.low %v4844_v2, %v4848_v5 }
 0xaa3   : > { %v9858_v26 = vadd.f32 %v8959_v31, %v4737_v52  ;;  %v7566_v46 = vcombine.high %v4852_v19, %v4856_v61  ;;  %5673 = vmatprep.subr.bf16.mxu1 %v7560_v44  ;;  %v7568_v52 = vcombine.high %v4853_v50, %v4857_v51  ;;  %v4860_v47 = vld [vmem:[%s9179_s26 + $0x180] sm:$0xff]  ;;  %v4865_v31 = vld [vmem:[%s9179_s26 + $0x1a8] sm:$0xff] }
 0xaa4   : > { %v9861_v53 = vadd.f32 %v8960_v55, %v4739_v37  ;;  %v4747_v9 = vadd.f32 %v9855_v28, %v9852_v49  ;;  %v4864_v48 = vld [vmem:[%s9179_s26 + $0x1a0] sm:$0xff]  ;;  %v4861_v37 = vld [vmem:[%s9179_s26 + $0x188] sm:$0xff]  ;;  %5631 = vmatpush1.bf16.msra.mxu0 %v7557_v41  ;;  %v7565_v55 = vcombine.low %v4852_v19, %v4856_v61  ;;  %5674 = vmatpush1.bf16.msra.mxu1 %v7559_v42 }
 0xaa5   : > { %5632 = vmatprep.subr.bf16.mxu0 %v7566_v46  ;;  %5675 = vmatprep.subr.bf16.mxu1 %v7568_v52  ;;  %v7576_v59 = vcombine.high %v4861_v37, %v4865_v31  ;;  %v7573_v39 = vcombine.low %v4860_v47, %v4864_v48  ;;  %v7575_v32 = vcombine.low %v4861_v37, %v4865_v31  ;;  %v4892_v61 = vld [vmem:[%s9179_s26 + $0x280] sm:$0xff]  ;;  %v4905_v31 = vld [vmem:[%s9179_s26 + $0x2e8] sm:$0xff] }
 0xaa6   : > { %4748 = vadd.xlane.f32.xlu0 %v4747_v9  ;;  %v4750_v56 = vadd.f32 %v9861_v53, %v9858_v26  ;;  %v7567_v9 = vcombine.low %v4853_v50, %v4857_v51  ;;  %v4893_v50 = vld [vmem:[%s9179_s26 + $0x288] sm:$0xff]  ;;  %v4900_v52 = vld [vmem:[%s9179_s26 + $0x2c0] sm:$0xff] }
 0xaa8   : > { %4751 = vadd.xlane.f32.xlu1 %v4750_v56  ;;  %v7574_v56 = vcombine.high %v4860_v47, %v4864_v48  ;;  %5633 = vmatpush1.bf16.msra.mxu0 %v7565_v55  ;;  %v4904_v47 = vld [vmem:[%s9179_s26 + $0x2e0] sm:$0xff]  ;;  %v4901_v48 = vld [vmem:[%s9179_s26 + $0x2c8] sm:$0xff] }
 0xaa9   : > { %5676 = vmatpush1.bf16.msra.mxu1 %v7567_v9  ;;  %v7614_v37 = vcombine.high %v4900_v52, %v4904_v47  ;;  %v7613_v55 = vcombine.low %v4900_v52, %v4904_v47  ;;  %v7615_v9 = vcombine.low %v4901_v48, %v4905_v31  ;;  %v4745_v47 = vld [vmem:[%s10456_s28] sm:$0x3] }
 0xaaa   : > { %5634 = vmatprep.subr.bf16.mxu0 %v7574_v56  ;;  %5677 = vmatprep.subr.bf16.mxu1 %v7576_v59  ;;  %v7616_v56 = vcombine.high %v4901_v48, %v4905_v31  ;;  %v4908_v59 = vld [vmem:[%s9179_s26 + $0x300] sm:$0xff] }
 0xaab   : > { %v7622_v38 = vcombine.high %v4908_v59, %v4912_v30 }
 0xaac   : > { %5635 = vmatpush1.bf16.msra.mxu0 %v7573_v39  ;;  %v7621_v39 = vcombine.low %v4908_v59, %v4912_v30 }
 0xaad   : > { %5678 = vmatpush1.bf16.msra.mxu1 %v7575_v32  ;;  %5636 = vmatprep.subr.bf16.mxu0 %v7582_v22  ;;  %v7623_v32 = vcombine.low %v4909_v29, %v4913_v34  ;;  %v7624_v22 = vcombine.high %v4909_v29, %v4913_v34 }
 0xaae   : > { %5679 = vmatprep.subr.bf16.mxu1 %v7584_v0  ;;  %v4916_v0 = vld [vmem:[%s9179_s26 + $0x340] sm:$0xff] }
 0xaaf   : > { %v7630_v1 = vcombine.high %v4916_v0, %v4920_v45 }
 0xab0   : > { %5637 = vmatpush1.bf16.msra.mxu0 %v7581_v4  ;;  %v7629_v4 = vcombine.low %v4916_v0, %v4920_v45 }
 0xab1   : > { %5680 = vmatpush1.bf16.msra.mxu1 %v7583_v7  ;;  %5638 = vmatprep.subr.bf16.mxu0 %v7590_v27  ;;  %v7631_v7 = vcombine.low %v4917_v54, %v4921_v43  ;;  %v7632_v27 = vcombine.high %v4917_v54, %v4921_v43  ;;  %v4826_v43 = vld [vmem:[%s9179_s26 + $0x70] sm:$0xff] }
 0xab2   : > { %5681 = vmatprep.subr.bf16.mxu1 %v7592_v21  ;;  %v4924_v21 = vld [vmem:[%s9179_s26 + $0x380] sm:$0xff] }
 0xab3   : > { %v7638_v35 = vcombine.high %v4924_v21, %v4928_v23 }
 0xab4   : > { %5639 = vmatpush1.bf16.msra.mxu0 %v7589_v10  ;;  %v7637_v10 = vcombine.low %v4924_v21, %v4928_v23 }
 0xab5   : > { %5682 = vmatpush1.bf16.msra.mxu1 %v7591_v14  ;;  %5640 = vmatprep.subr.bf16.mxu0 %v7598_v36  ;;  %v7639_v14 = vcombine.low %v4925_v25, %v4929_v33  ;;  %v7640_v36 = vcombine.high %v4925_v25, %v4929_v33  ;;  %v4834_v25 = vld [vmem:[%s9179_s26 + $0xb0] sm:$0xff]  ;;  %v4835_v33 = vld [vmem:[%s9179_s26 + $0xb8] sm:$0xff] }
 0xab6   : > { %5683 = vmatprep.subr.bf16.mxu1 %v7600_v16  ;;  %v4932_v16 = vld [vmem:[%s9179_s26 + $0x3c0] sm:$0xff] }
 0xab8   : > { %5641 = vmatpush1.bf16.msra.mxu0 %v7597_v3  ;;  %v4936_v3 = vld [vmem:[%s9179_s26 + $0x3e0] sm:$0xff] }
 0xab9   : > { %5684 = vmatpush1.bf16.msra.mxu1 %v7599_v60  ;;  %v4933_v60 = vld [vmem:[%s9179_s26 + $0x3c8] sm:$0xff] }
 0xb33   : > { %v4749_v63 = vpop.xlane.xlu0 %4748 }
 0xb34   : > { %v4754_v40 = vmul.f32 0.00390625, %v4749_v63  ;;  %v7645_v63 = vcombine.low %v4932_v16, %v4936_v3 }
 0xb35   : > { %v4752_v62 = vpop.xlane.xlu1 %4751 }
 0xb36   : > { %v9908_v2 = vsub.f32 %v9852_v49, %v4754_v40  ;;  %v9911_v5 = vsub.f32 %v9855_v28, %v4754_v40  ;;  %v4755_v6 = vmul.f32 0.00390625, %v4752_v62  ;;  %v7646_v40 = vcombine.high %v4932_v16, %v4936_v3  ;;  %v4937_v62 = vld [vmem:[%s9179_s26 + $0x3e8] sm:$0xff]  ;;  %v4838_v3 = vld [vmem:[%s9179_s26 + $0xd0] sm:$0xff] }
 0xb38   : > { %v4760_v8 = vmul.f32 %v9908_v2, %v9908_v2  ;;  %v4761_v11 = vmul.f32 %v9911_v5, %v9911_v5  ;;  %v9918_v12 = vsub.f32 %v9858_v26, %v4755_v6  ;;  %v9921_v20 = vsub.f32 %v9861_v53, %v4755_v6  ;;  %v4896_v26 = vld [vmem:[%s9179_s26 + $0x2a0] sm:$0xff]  ;;  %v4897_v53 = vld [vmem:[%s9179_s26 + $0x2a8] sm:$0xff] }
 0xb39   : > { %v7606_v51 = vcombine.high %v4892_v61, %v4896_v26  ;;  %v7605_v41 = vcombine.low %v4892_v61, %v4896_v26  ;;  %v7607_v42 = vcombine.low %v4893_v50, %v4897_v53  ;;  %v7608_v46 = vcombine.high %v4893_v50, %v4897_v53  ;;  %v4819_v61 = vld [vmem:[%s9179_s26 + $0x38] sm:$0xff] }
 0xb3a   : > { %v4762_v49 = vmul.f32 %v9918_v12, %v9918_v12  ;;  %v4763_v28 = vmul.f32 %v9921_v20, %v9921_v20  ;;  %v4764_v44 = vadd.f32 %v4761_v11, %v4760_v8  ;;  %v7647_v6 = vcombine.low %v4933_v60, %v4937_v62  ;;  %v4814_v11 = vld [vmem:[%s9179_s26 + $0x10] sm:$0xff] }
 0xb3b   : > { %5642 = vmatprep.subr.bf16.mxu0 %v7606_v51  ;;  %5685 = vmatprep.subr.bf16.mxu1 %v7608_v46  ;;  %v7648_v8 = vcombine.high %v4933_v60, %v4937_v62  ;;  %v4842_v60 = vld [vmem:[%s9179_s26 + $0xf0] sm:$0xff] }
 0xb3c   : > { %4765 = vadd.xlane.f32.xlu0 %v4764_v44  ;;  %v4767_v19 = vadd.f32 %v4763_v28, %v4762_v49  ;;  %5643 = vmatpush1.bf16.msra.mxu0 %v7605_v41  ;;  %v4818_v49 = vld [vmem:[%s9179_s26 + $0x30] sm:$0xff]  ;;  %v4815_v28 = vld [vmem:[%s9179_s26 + $0x18] sm:$0xff] }
 0xb3d   : > { %5686 = vmatpush1.bf16.msra.mxu1 %v7607_v42  ;;  %5644 = vmatprep.subr.bf16.mxu0 %v7614_v37  ;;  %v7529_v44 = vcombine.low %v4814_v11, %v4818_v49  ;;  %v7531_v26 = vcombine.low %v4815_v28, %v4819_v61  ;;  %v7532_v50 = vcombine.high %v4815_v28, %v4819_v61  ;;  %v4850_v28 = vld [vmem:[%s9179_s26 + $0x130] sm:$0xff] }
 0xb3e   : > { %5687 = vmatprep.subr.bf16.mxu1 %v7616_v56  ;;  %v4784_v37 = vrot.slane %v4745_v47, %v9301_v18  ;;  %v4788_v56 = vrot.slane %v4745_v47, %v9316_v24  ;;  %v7553_v61 = vcombine.low %v4838_v3, %v4842_v60 }
 0xb40   : > { %4768 = vadd.xlane.f32.xlu0 %v4767_v19  ;;  %5645 = vmatpush1.bf16.msra.mxu0 %v7613_v55  ;;  %v7530_v19 = vcombine.high %v4814_v11, %v4818_v49  ;;  %v4846_v49 = vld [vmem:[%s9179_s26 + $0x110] sm:$0xff] }
 0xb41   : > { %5688 = vmatpush1.bf16.msra.mxu1 %v7615_v9  ;;  %5646 = vmatprep.subr.bf16.mxu0 %v7622_v38  ;;  %v4746_v9 = vld [vmem:[%s10457_s2] sm:$0x3] }
 0xb42   : > { %5689 = vmatprep.subr.bf16.mxu1 %v7624_v22  ;;  %v4799_v30 = vrot.slane %v4746_v9, %v9301_v18  ;;  %v4803_v29 = vrot.slane %v4746_v9, %v9316_v24  ;;  %v4863_v9 = vld [vmem:[%s9179_s26 + $0x198] sm:$0xff] }
 0xb44   : > { %5647 = vmatpush1.bf16.msra.mxu0 %v7621_v39 }
 0xb45   : > { %5690 = vmatpush1.bf16.msra.mxu1 %v7623_v32  ;;  %5648 = vmatprep.subr.bf16.mxu0 %v7630_v1  ;;  %v4822_v1 = vld [vmem:[%s9179_s26 + $0x50] sm:$0xff] }
 0xb46   : > { %5691 = vmatprep.subr.bf16.mxu1 %v7632_v27  ;;  %v4830_v27 = vld [vmem:[%s9179_s26 + $0x90] sm:$0xff]  ;;  %v7538_v21 = vcombine.high %v4822_v1, %v4826_v43 }
 0xb47   : > { %v7545_v62 = vcombine.low %v4830_v27, %v4834_v25 }
 0xb48   : > { %5649 = vmatpush1.bf16.msra.mxu0 %v7629_v4  ;;  %v4823_v4 = vld [vmem:[%s9179_s26 + $0x58] sm:$0xff] }
 0xb49   : > { %5692 = vmatpush1.bf16.msra.mxu1 %v7631_v7  ;;  %5650 = vmatprep.subr.bf16.mxu0 %v7638_v35  ;;  %v4831_v35 = vld [vmem:[%s9179_s26 + $0x98] sm:$0xff] }
 0xb4a   : > { %5693 = vmatprep.subr.bf16.mxu1 %v7640_v36  ;;  %v7546_v36 = vcombine.high %v4830_v27, %v4834_v25  ;;  %v7548_v16 = vcombine.high %v4831_v35, %v4835_v33  ;;  %v4879_v27 = vld [vmem:[%s9179_s26 + $0x218] sm:$0xff] }
 0xb4c   : > { %5651 = vmatpush1.bf16.msra.mxu0 %v7637_v10  ;;  %v7537_v10 = vcombine.low %v4822_v1, %v4826_v43 }
 0xb4d   : > { %5694 = vmatpush1.bf16.msra.mxu1 %v7639_v14  ;;  %5652 = vmatprep.subr.bf16.mxu0 %v7646_v40  ;;  %v4843_v40 = vld [vmem:[%s9179_s26 + $0xf8] sm:$0xff] }
 0xb4e   : > { %5695 = vmatprep.subr.bf16.mxu1 %v7648_v8  ;;  %v7554_v8 = vcombine.high %v4838_v3, %v4842_v60 }
 0xb50   : > { %5653 = vmatpush1.bf16.msra.mxu0 %v7645_v63  ;;  %v4839_v63 = vld [vmem:[%s9179_s26 + $0xd8] sm:$0xff] }
 0xb51   : > { %5696 = vmatpush1.bf16.msra.mxu1 %v7647_v6  ;;  %5708 = vmatprep.subr.bf16.mxu0 %v7530_v19  ;;  %v7547_v6 = vcombine.low %v4831_v35, %v4835_v33  ;;  %v7556_v11 = vcombine.high %v4839_v63, %v4843_v40  ;;  %v4851_v19 = vld [vmem:[%s9179_s26 + $0x138] sm:$0xff] }
 0xb52   : > { %5751 = vmatprep.subr.bf16.mxu1 %v7532_v50  ;;  %v7562_v50 = vcombine.high %v4846_v49, %v4850_v28 }
 0xbc9   : > { %v4766_v51 = vpop.xlane.xlu0 %4765 }
 0xbca   : > { %v4770_v53 = vmul.f32 0.00390625, %v4766_v51 }
 0xbcc   : > { %v4772_v41 = vadd.f32 1e-12, %v4770_v53  ;;  %v4854_v53 = vld [vmem:[%s9179_s26 + $0x150] sm:$0xff] }
 0xbcd   : > { %v4769_v42 = vpop.xlane.xlu0 %4768 }
 0xbce   : > { %8917 = vrsqrt.f32 %v4772_v41  ;;  %v4771_v46 = vmul.f32 0.00390625, %v4769_v42  ;;  %v4858_v41 = vld [vmem:[%s9179_s26 + $0x170] sm:$0xff]  ;;  %v4855_v42 = vld [vmem:[%s9179_s26 + $0x158] sm:$0xff] }
 0xbd0   : > { %v4773_v52 = vadd.f32 1e-12, %v4771_v46  ;;  %v4859_v46 = vld [vmem:[%s9179_s26 + $0x178] sm:$0xff] }
 0xbd2   : > { %8919 = vrsqrt.f32 %v4773_v52  ;;  %v7561_v52 = vcombine.low %v4846_v49, %v4850_v28 }
 0xbd8   : > { %v8918_v48 = vpop.eup %8917 }
 0xbd9   : > { %v4776_v31 = vmul.f32 %v8918_v48, %v9908_v2  ;;  %v4777_v55 = vmul.f32 %v8918_v48, %v9911_v5  ;;  %v7570_v48 = vcombine.high %v4854_v53, %v4858_v41 }
 0xbdb   : > { %v4791_v38 = vmul.f32 %v4784_v37, %v4776_v31  ;;  %v4792_v34 = vmul.f32 %v4788_v56, %v4777_v55  ;;  %v4862_v31 = vld [vmem:[%s9179_s26 + $0x190] sm:$0xff] }
 0xbdc   : > { %v8920_v59 = vpop.eup %8919  ;;  %v4866_v55 = vld [vmem:[%s9179_s26 + $0x1b0] sm:$0xff] }
 0xbdd   : > { %v4778_v2 = vmul.f32 %v8920_v59, %v9918_v12  ;;  %v4779_v5 = vmul.f32 %v8920_v59, %v9921_v20  ;;  %v9973_v22 = vadd.f32 %v4803_v29, %v4792_v34  ;;  %v9977_v45 = vadd.f32 %v4799_v30, %v4791_v38  ;;  %v4827_v12 = vld [vmem:[%s9179_s26 + $0x78] sm:$0xff] }
 0xbde   : > { %v7540_v23 = vcombine.high %v4823_v4, %v4827_v12  ;;  %v7539_v14 = vcombine.low %v4823_v4, %v4827_v12  ;;  %v7569_v59 = vcombine.low %v4854_v53, %v4858_v41  ;;  %v4871_v34 = vld [vmem:[%s9179_s26 + $0x1d8] sm:$0xff]  ;;  %v4878_v12 = vld [vmem:[%s9179_s26 + $0x210] sm:$0xff] }
 0xbdf   : > { %v4793_v39 = vmul.f32 %v4784_v37, %v4778_v2  ;;  %v4794_v32 = vmul.f32 %v4788_v56, %v4779_v5  ;;  %v7572_v37 = vcombine.high %v4855_v42, %v4859_v46  ;;  %v4867_v56 = vld [vmem:[%s9179_s26 + $0x1b8] sm:$0xff]  ;;  %v4870_v2 = vld [vmem:[%s9179_s26 + $0x1d0] sm:$0xff] }
 0xbe0   : > { %v7580_v38 = vcombine.high %v4863_v9, %v4867_v56  ;;  %v4874_v5 = vld [vmem:[%s9179_s26 + $0x1f0] sm:$0xff]  ;;  %v7579_v1 = vcombine.low %v4863_v9, %v4867_v56 }
 0xbe1   : > { %v9975_v0 = vadd.f32 %v4803_v29, %v4794_v32  ;;  %v9979_v54 = vadd.f32 %v4799_v30, %v4793_v39  ;;  %v7571_v30 = vcombine.low %v4855_v42, %v4859_v46  ;;  %v7578_v29 = vcombine.high %v4862_v31, %v4866_v55  ;;  %v4875_v39 = vld [vmem:[%s9179_s26 + $0x1f8] sm:$0xff] }
 0xbe2   : > { %v7577_v32 = vcombine.low %v4862_v31, %v4866_v55  ;;  %v7586_v43 = vcombine.high %v4870_v2, %v4874_v5  ;;  %v7588_v4 = vcombine.high %v4871_v34, %v4875_v39  ;;  %v7587_v25 = vcombine.low %v4871_v34, %v4875_v39 }
 0xbe3   : > { %v4811_v20 = vpack.c.bf16 %v9975_v0, %v9973_v22  ;;  %v9989_v7 = vpack.c.bf16 %v9979_v54, %v9977_v45 }
 0xbe5   : > { %5654 = vmatprep.mubr.bf16.mxu0 %v4811_v20  ;;  %5697 = vmatprep.mubr.bf16.mxu1 %v4811_v20 }
 0xbe6   : > { %5655 = vmatmul.mubr.bf16.vlgmr.msra.gmra.mrb[32].mxu0 %v9989_v7  ;;  %5698 = vmatmul.mubr.bf16.vlgmr.msra.gmra.mrb[68].mxu1 %v9989_v7 }
 0xbe7   : > { %5709 = vmatpush1.bf16.msra.mxu0 %v7529_v44  ;;  %5752 = vmatpush1.bf16.msra.mxu1 %v7531_v26  ;;  %v4847_v44 = vld [vmem:[%s9179_s26 + $0x118] sm:$0xff]  ;;  %v7555_v26 = vcombine.low %v4839_v63, %v4843_v40 }
 0xbe8   : > { %5740 = vmatprep.mubr.bf16.mxu0 %v4811_v20  ;;  %5783 = vmatprep.mubr.bf16.mxu1 %v4811_v20  ;;  %v7564_v51 = vcombine.high %v4847_v44, %v4851_v19  ;;  %v7563_v47 = vcombine.low %v4847_v44, %v4851_v19  ;;  %v4882_v20 = vld [vmem:[%s9179_s26 + $0x230] sm:$0xff] }
 0xbe9   : > { %5710 = vmatprep.subr.bf16.mxu0 %v7538_v21  ;;  %5753 = vmatprep.subr.bf16.mxu1 %v7540_v23  ;;  %v4883_v21 = vld [vmem:[%s9179_s26 + $0x238] sm:$0xff]  ;;  %v7585_v23 = vcombine.low %v4870_v2, %v4874_v5  ;;  %v7594_v35 = vcombine.high %v4878_v12, %v4882_v20  ;;  %v7593_v3 = vcombine.low %v4878_v12, %v4882_v20 }
 0xbea   : > { %v7596_v33 = vcombine.high %v4879_v27, %v4883_v21  ;;  %v7595_v60 = vcombine.low %v4879_v27, %v4883_v21 }
 0xbeb   : > { %5711 = vmatpush1.bf16.msra.mxu0 %v7537_v10  ;;  %5754 = vmatpush1.bf16.msra.mxu1 %v7539_v14  ;;  %v4886_v10 = vld [vmem:[%s9179_s26 + $0x250] sm:$0xff] }
 0xbec   : > { %5712 = vmatprep.subr.bf16.mxu0 %v7546_v36  ;;  %5755 = vmatprep.subr.bf16.mxu1 %v7548_v16  ;;  %v4890_v14 = vld [vmem:[%s9179_s26 + $0x270] sm:$0xff]  ;;  %v4887_v36 = vld [vmem:[%s9179_s26 + $0x258] sm:$0xff] }
 0xbed   : > { %v4891_v16 = vld [vmem:[%s9179_s26 + $0x278] sm:$0xff]  ;;  %v7602_v63 = vcombine.high %v4886_v10, %v4890_v14  ;;  %v7601_v49 = vcombine.low %v4886_v10, %v4890_v14 }
 0xbee   : > { %v7604_v40 = vcombine.high %v4887_v36, %v4891_v16  ;;  %v7603_v28 = vcombine.low %v4887_v36, %v4891_v16 }
 0xbef   : > { %5713 = vmatpush1.bf16.msra.mxu0 %v7545_v62  ;;  %5756 = vmatpush1.bf16.msra.mxu1 %v7547_v6  ;;  %v4894_v62 = vld [vmem:[%s9179_s26 + $0x290] sm:$0xff] }
 0xbf0   : > { %5714 = vmatprep.subr.bf16.mxu0 %v7554_v8  ;;  %5757 = vmatprep.subr.bf16.mxu1 %v7556_v11  ;;  %v4898_v6 = vld [vmem:[%s9179_s26 + $0x2b0] sm:$0xff]  ;;  %v4895_v8 = vld [vmem:[%s9179_s26 + $0x298] sm:$0xff] }
 0xbf1   : > { %v4899_v11 = vld [vmem:[%s9179_s26 + $0x2b8] sm:$0xff]  ;;  %v7610_v44 = vcombine.high %v4894_v62, %v4898_v6  ;;  %v7609_v53 = vcombine.low %v4894_v62, %v4898_v6 }
 0xbf2   : > { %v7612_v19 = vcombine.high %v4895_v8, %v4899_v11  ;;  %v7611_v41 = vcombine.low %v4895_v8, %v4899_v11  ;;  %v8698_v62 = vld [vmem:[%s9190_s15 + $0x14] ss:$8 sps:$4 sm:$0xff]   ;;  %v8696_v6 = vld [vmem:[%s9190_s15 + $0x10] ss:$8 sps:$4 sm:$0xff]   ;;  %v8701_v8 = vld [vmem:[%s9190_s15 + $0x24] ss:$8 sps:$4 sm:$0xff]  }
 0xbf3   : > { %5715 = vmatpush1.bf16.msra.mxu0 %v7553_v61  ;;  %5758 = vmatpush1.bf16.msra.mxu1 %v7555_v26  ;;  %v4902_v61 = vld [vmem:[%s9179_s26 + $0x2d0] sm:$0xff]  ;;  %v8699_v11 = vld [vmem:[%s9190_s15 + $0x20] ss:$8 sps:$4 sm:$0xff]  }
 0xbf4   : > { %5716 = vmatprep.subr.bf16.mxu0 %v7562_v50  ;;  %5759 = vmatprep.subr.bf16.mxu1 %v7564_v51  ;;  %v4906_v26 = vld [vmem:[%s9179_s26 + $0x2f0] sm:$0xff]  ;;  %v4903_v50 = vld [vmem:[%s9179_s26 + $0x2d8] sm:$0xff] }
 0xbf5   : > { %v4907_v51 = vld [vmem:[%s9179_s26 + $0x2f8] sm:$0xff]  ;;  %v7618_v42 = vcombine.high %v4902_v61, %v4906_v26  ;;  %v7617_v31 = vcombine.low %v4902_v61, %v4906_v26  ;;  %v8713_v26 = vld [vmem:[%s9190_s15 + $0x64] ss:$8 sps:$4 sm:$0xff]  }
 0xbf6   : > { %v7620_v46 = vcombine.high %v4903_v50, %v4907_v51  ;;  %v7619_v55 = vcombine.low %v4903_v50, %v4907_v51  ;;  %v8708_v61 = vld [vmem:[%s9190_s15 + $0x50] ss:$8 sps:$4 sm:$0xff]   ;;  %v8711_v50 = vld [vmem:[%s9190_s15 + $0x60] ss:$8 sps:$4 sm:$0xff]   ;;  %v8716_v51 = vld [vmem:[%s9190_s15 + $0x74] ss:$8 sps:$4 sm:$0xff]  }
 0xbf7   : > { %5717 = vmatpush1.bf16.msra.mxu0 %v7561_v52  ;;  %5760 = vmatpush1.bf16.msra.mxu1 %v7563_v47  ;;  %v4910_v52 = vld [vmem:[%s9179_s26 + $0x310] sm:$0xff] }
 0xbf8   : > { %5718 = vmatprep.subr.bf16.mxu0 %v7570_v48  ;;  %5761 = vmatprep.subr.bf16.mxu1 %v7572_v37  ;;  %v4914_v47 = vld [vmem:[%s9179_s26 + $0x330] sm:$0xff]  ;;  %v4911_v48 = vld [vmem:[%s9179_s26 + $0x318] sm:$0xff] }
 0xbf9   : > { %v4915_v37 = vld [vmem:[%s9179_s26 + $0x338] sm:$0xff]  ;;  %v7626_v9 = vcombine.high %v4910_v52, %v4914_v47  ;;  %v7625_v2 = vcombine.low %v4910_v52, %v4914_v47  ;;  %v8725_v47 = vld [vmem:[%s9190_s15 + $0xa4] ss:$8 sps:$4 sm:$0xff]  }
 0xbfa   : > { %v7628_v56 = vcombine.high %v4911_v48, %v4915_v37  ;;  %v7627_v5 = vcombine.low %v4911_v48, %v4915_v37  ;;  %v8720_v52 = vld [vmem:[%s9190_s15 + $0x90] ss:$8 sps:$4 sm:$0xff]   ;;  %v8723_v48 = vld [vmem:[%s9190_s15 + $0xa0] ss:$8 sps:$4 sm:$0xff]   ;;  %v8728_v37 = vld [vmem:[%s9190_s15 + $0xb4] ss:$8 sps:$4 sm:$0xff]  }
 0xbfb   : > { %5719 = vmatpush1.bf16.msra.mxu0 %v7569_v59  ;;  %5762 = vmatpush1.bf16.msra.mxu1 %v7571_v30  ;;  %v4918_v59 = vld [vmem:[%s9179_s26 + $0x350] sm:$0xff] }
 0xbfc   : > { %5720 = vmatprep.subr.bf16.mxu0 %v7578_v29  ;;  %5763 = vmatprep.subr.bf16.mxu1 %v7580_v38  ;;  %v4922_v30 = vld [vmem:[%s9179_s26 + $0x370] sm:$0xff]  ;;  %v4919_v29 = vld [vmem:[%s9179_s26 + $0x358] sm:$0xff] }
 0xbfd   : > { %v4923_v38 = vld [vmem:[%s9179_s26 + $0x378] sm:$0xff]  ;;  %v7634_v34 = vcombine.high %v4918_v59, %v4922_v30  ;;  %v7633_v12 = vcombine.low %v4918_v59, %v4922_v30  ;;  %v8737_v30 = vld [vmem:[%s9190_s15 + $0xe4] ss:$8 sps:$4 sm:$0xff]  }
 0xbfe   : > { %v7636_v39 = vcombine.high %v4919_v29, %v4923_v38  ;;  %v7635_v20 = vcombine.low %v4919_v29, %v4923_v38  ;;  %v8732_v59 = vld [vmem:[%s9190_s15 + $0xd0] ss:$8 sps:$4 sm:$0xff]   ;;  %v8735_v29 = vld [vmem:[%s9190_s15 + $0xe0] ss:$8 sps:$4 sm:$0xff]   ;;  %v8740_v38 = vld [vmem:[%s9190_s15 + $0xf4] ss:$8 sps:$4 sm:$0xff]  }
 0xbff   : > { %5721 = vmatpush1.bf16.msra.mxu0 %v7577_v32  ;;  %5764 = vmatpush1.bf16.msra.mxu1 %v7579_v1  ;;  %v4926_v32 = vld [vmem:[%s9179_s26 + $0x390] sm:$0xff] }
 0xc00   : > { %5722 = vmatprep.subr.bf16.mxu0 %v7586_v43  ;;  %5765 = vmatprep.subr.bf16.mxu1 %v7588_v4  ;;  %v4930_v1 = vld [vmem:[%s9179_s26 + $0x3b0] sm:$0xff]  ;;  %v4927_v43 = vld [vmem:[%s9179_s26 + $0x398] sm:$0xff] }
 0xc01   : > { %v4931_v4 = vld [vmem:[%s9179_s26 + $0x3b8] sm:$0xff]  ;;  %v7642_v27 = vcombine.high %v4926_v32, %v4930_v1  ;;  %v7641_v10 = vcombine.low %v4926_v32, %v4930_v1 }
 0xc02   : > { %v7644_v21 = vcombine.high %v4927_v43, %v4931_v4  ;;  %v7643_v14 = vcombine.low %v4927_v43, %v4931_v4 }
 0xc03   : > { %5723 = vmatpush1.bf16.msra.mxu0 %v7585_v23  ;;  %5766 = vmatpush1.bf16.msra.mxu1 %v7587_v25  ;;  %v4934_v23 = vld [vmem:[%s9179_s26 + $0x3d0] sm:$0xff] }
 0xc04   : > { %5724 = vmatprep.subr.bf16.mxu0 %v7594_v35  ;;  %5767 = vmatprep.subr.bf16.mxu1 %v7596_v33  ;;  %v4938_v25 = vld [vmem:[%s9179_s26 + $0x3f0] sm:$0xff]  ;;  %v4935_v35 = vld [vmem:[%s9179_s26 + $0x3d8] sm:$0xff] }
 0xc05   : > { %v4939_v33 = vld [vmem:[%s9179_s26 + $0x3f8] sm:$0xff]  ;;  %v7650_v36 = vcombine.high %v4934_v23, %v4938_v25 }
 0xc06   : > { %v7652_v16 = vcombine.high %v4935_v35, %v4939_v33 }
 0xc07   : > { %5725 = vmatpush1.bf16.msra.mxu0 %v7593_v3  ;;  %5768 = vmatpush1.bf16.msra.mxu1 %v7595_v60  ;;  %v7649_v3 = vcombine.low %v4934_v23, %v4938_v25  ;;  %v7651_v60 = vcombine.low %v4935_v35, %v4939_v33 }
 0xc08   : > { %5726 = vmatprep.subr.bf16.mxu0 %v7602_v63  ;;  %5769 = vmatprep.subr.bf16.mxu1 %v7604_v40  ;;  %v8695_v63 = vld [vmem:[%s9190_s15 + $0x4] ss:$8 sps:$4 sm:$0xff]   ;;  %v8693_v40 = vld [vmem:[%s9190_s15] ss:$8 sps:$4 sm:$0xff]  }
 0xc0b   : > { %5727 = vmatpush1.bf16.msra.mxu0 %v7601_v49  ;;  %5770 = vmatpush1.bf16.msra.mxu1 %v7603_v28  ;;  %v8704_v49 = vld [vmem:[%s9190_s15 + $0x34] ss:$8 sps:$4 sm:$0xff]   ;;  %v8702_v28 = vld [vmem:[%s9190_s15 + $0x30] ss:$8 sps:$4 sm:$0xff]  }
 0xc0c   : > { %5728 = vmatprep.subr.bf16.mxu0 %v7610_v44  ;;  %5771 = vmatprep.subr.bf16.mxu1 %v7612_v19  ;;  %v8707_v44 = vld [vmem:[%s9190_s15 + $0x44] ss:$8 sps:$4 sm:$0xff]   ;;  %v8710_v19 = vld [vmem:[%s9190_s15 + $0x54] ss:$8 sps:$4 sm:$0xff]  }
 0xc0f   : > { %5729 = vmatpush1.bf16.msra.mxu0 %v7609_v53  ;;  %5772 = vmatpush1.bf16.msra.mxu1 %v7611_v41  ;;  %v8714_v53 = vld [vmem:[%s9190_s15 + $0x70] ss:$8 sps:$4 sm:$0xff]   ;;  %v8719_v41 = vld [vmem:[%s9190_s15 + $0x84] ss:$8 sps:$4 sm:$0xff]  }
 0xc10   : > { %5730 = vmatprep.subr.bf16.mxu0 %v7618_v42  ;;  %5773 = vmatprep.subr.bf16.mxu1 %v7620_v46  ;;  %v8717_v42 = vld [vmem:[%s9190_s15 + $0x80] ss:$8 sps:$4 sm:$0xff]   ;;  %v8722_v46 = vld [vmem:[%s9190_s15 + $0x94] ss:$8 sps:$4 sm:$0xff]  }
 0xc13   : > { %5731 = vmatpush1.bf16.msra.mxu0 %v7617_v31  ;;  %5774 = vmatpush1.bf16.msra.mxu1 %v7619_v55  ;;  %v8726_v31 = vld [vmem:[%s9190_s15 + $0xb0] ss:$8 sps:$4 sm:$0xff]   ;;  %v8731_v55 = vld [vmem:[%s9190_s15 + $0xc4] ss:$8 sps:$4 sm:$0xff]  }
 0xc14   : > { %5732 = vmatprep.subr.bf16.mxu0 %v7626_v9  ;;  %5775 = vmatprep.subr.bf16.mxu1 %v7628_v56  ;;  %v8729_v9 = vld [vmem:[%s9190_s15 + $0xc0] ss:$8 sps:$4 sm:$0xff]   ;;  %v8734_v56 = vld [vmem:[%s9190_s15 + $0xd4] ss:$8 sps:$4 sm:$0xff]  }
 0xc17   : > { %5733 = vmatpush1.bf16.msra.mxu0 %v7625_v2  ;;  %5776 = vmatpush1.bf16.msra.mxu1 %v7627_v5  ;;  %v8738_v2 = vld [vmem:[%s9190_s15 + $0xf0] ss:$8 sps:$4 sm:$0xff]   ;;  %v8743_v5 = vld [vmem:[%s9190_s15 + $0x104] ss:$8 sps:$4 sm:$0xff]  }
 0xc18   : > { %5734 = vmatprep.subr.bf16.mxu0 %v7634_v34  ;;  %5777 = vmatprep.subr.bf16.mxu1 %v7636_v39  ;;  %v10089_v34 = vld [vmem:[%s10459_s25] sm:$0xff] }
 0xc19   : > { %v4945_v39 = vrot.slane %v10089_v34, %v9301_v18  ;;  %v4953_v32 = vrot.slane %v10089_v34, %v1009_v57  ;;  %v4949_v1 = vrot.slane %v10089_v34, %v9316_v24  ;;  %v4957_v43 = vrot.slane %v10089_v34, %v1013_v58 }
 0xc1b   : > { %5735 = vmatpush1.bf16.msra.mxu0 %v7633_v12  ;;  %5778 = vmatpush1.bf16.msra.mxu1 %v7635_v20 }
 0xc1c   : > { %5736 = vmatprep.subr.bf16.mxu0 %v7642_v27  ;;  %5779 = vmatprep.subr.bf16.mxu1 %v7644_v21 }
 0xc1f   : > { %5737 = vmatpush1.bf16.msra.mxu0 %v7641_v10  ;;  %5780 = vmatpush1.bf16.msra.mxu1 %v7643_v14 }
 0xc20   : > { %5738 = vmatprep.subr.bf16.mxu0 %v7650_v36  ;;  %5781 = vmatprep.subr.bf16.mxu1 %v7652_v16 }
 0xc23   : > { %5739 = vmatpush1.bf16.msra.mxu0 %v7649_v3  ;;  %5782 = vmatpush1.bf16.msra.mxu1 %v7651_v60 }
 0xc24   : > { %6726 = vmatprep.subr.bf16.mxu0 %v8695_v63 }
 0xc26   : > { %5741 = vmatmul.mubr.bf16.vlgmr.msra.gmra.mrb[36].mxu0 %v9989_v7  ;;  %5784 = vmatmul.mubr.bf16.vlgmr.msra.gmra.mrb[72].mxu1 %v9989_v7  ;;  %v8705_v7 = vld [vmem:[%s9190_s15 + $0x40] ss:$8 sps:$4 sm:$0xff]  }
 0xc27   : > { %6727 = vmatpush1.bf16.msra.mxu0 %v8693_v40 }
 0xc28   : > { %6728 = vmatprep.subr.bf16.mxu0 %v8698_v62 }
 0xc2b   : > { %6729 = vmatpush1.bf16.msra.mxu0 %v8696_v6 }
 0xc2c   : > { %6730 = vmatprep.subr.bf16.mxu0 %v8701_v8 }
 0xc2f   : > { %6731 = vmatpush1.bf16.msra.mxu0 %v8699_v11 }
 0xc30   : > { %6732 = vmatprep.subr.bf16.mxu0 %v8704_v49 }
 0xc33   : > { %6733 = vmatpush1.bf16.msra.mxu0 %v8702_v28 }
 0xc34   : > { %6734 = vmatprep.subr.bf16.mxu0 %v8707_v44 }
 0xc37   : > { %6735 = vmatpush1.bf16.msra.mxu0 %v8705_v7 }
 0xc38   : > { %6736 = vmatprep.subr.bf16.mxu0 %v8710_v19 }
 0xc3b   : > { %6737 = vmatpush1.bf16.msra.mxu0 %v8708_v61 }
 0xc3c   : > { %6738 = vmatprep.subr.bf16.mxu0 %v8713_v26 }
 0xc3f   : > { %6739 = vmatpush1.bf16.msra.mxu0 %v8711_v50 }
 0xc40   : > { %6740 = vmatprep.subr.bf16.mxu0 %v8716_v51 }
 0xc43   : > { %6741 = vmatpush1.bf16.msra.mxu0 %v8714_v53 }
 0xc44   : > { %6742 = vmatprep.subr.bf16.mxu0 %v8719_v41 }
 0xc47   : > { %6743 = vmatpush1.bf16.msra.mxu0 %v8717_v42 }
 0xc48   : > { %6744 = vmatprep.subr.bf16.mxu0 %v8722_v46 }
 0xc4b   : > { %6745 = vmatpush1.bf16.msra.mxu0 %v8720_v52 }
 0xc4c   : > { %6746 = vmatprep.subr.bf16.mxu0 %v8725_v47 }
 0xc4f   : > { %6747 = vmatpush1.bf16.msra.mxu0 %v8723_v48 }
 0xc50   : > { %6748 = vmatprep.subr.bf16.mxu0 %v8728_v37 }
 0xc53   : > { %6749 = vmatpush1.bf16.msra.mxu0 %v8726_v31 }
 0xc54   : > { %6750 = vmatprep.subr.bf16.mxu0 %v8731_v55 }
 0xc57   : > { %6751 = vmatpush1.bf16.msra.mxu0 %v8729_v9 }
 0xc58   : > { %6752 = vmatprep.subr.bf16.mxu0 %v8734_v56 }
 0xc5b   : > { %6753 = vmatpush1.bf16.msra.mxu0 %v8732_v59 }
 0xc5c   : > { %6754 = vmatprep.subr.bf16.mxu0 %v8737_v30 }
 0xc5f   : > { %6755 = vmatpush1.bf16.msra.mxu0 %v8735_v29 }
 0xc60   : > { %6756 = vmatprep.subr.bf16.mxu0 %v8740_v38 }
 0xc63   : > { %6757 = vmatpush1.bf16.msra.mxu0 %v8738_v2 }
 0xc64   : > { %6769 = vmatprep.subr.bf16.mxu0 %v8743_v5 }
 0xcb9   : > { %v5656_v4 = vpop.f32.mrb[32].mxu0  ;;  %v5699_v12 = vpop.f32.mrb[68].mxu1 }
 0xcba   : > { %v10101_v20 = vadd.f32 %v5656_v4, %v4945_v39  ;;  %v10103_v27 = vadd.f32 %v5699_v12, %v4953_v32  ;;  %v5658_v21 = vpop.f32.mrb[33].mxu0  ;;  %v5701_v23 = vpop.f32.mrb[69].mxu1 }
 0xcbb   : > { %v10105_v25 = vadd.f32 %v5658_v21, %v4949_v1  ;;  %v10107_v35 = vadd.f32 %v5701_v23, %v4957_v43  ;;  %v5660_v57 = vpop.f32.mrb[34].mxu0  ;;  %v5703_v33 = vpop.f32.mrb[70].mxu1 }
 0xcbc   : > { %v5794_v10 = vmul.f32 %v10101_v20, %v10101_v20  ;;  %v5796_v58 = vmul.f32 %v10103_v27, %v10103_v27  ;;  %v10113_v14 = vadd.f32 %v5660_v57, %v4945_v39  ;;  %v10115_v36 = vadd.f32 %v5703_v33, %v4953_v32  ;;  %v5662_v16 = vpop.f32.mrb[35].mxu0  ;;  %v5705_v3 = vpop.f32.mrb[71].mxu1 }
 0xcbd   : > { %v5795_v60 = vmul.f32 %v10105_v25, %v10105_v25  ;;  %v5797_v63 = vmul.f32 %v10107_v35, %v10107_v35  ;;  %v10121_v40 = vadd.f32 %v5662_v16, %v4949_v1  ;;  %v10123_v62 = vadd.f32 %v5705_v3, %v4957_v43 }
 0xcbe   : > { %v5810_v6 = vmul.f32 %v5794_v10, %v10101_v20  ;;  %v5812_v8 = vmul.f32 %v5796_v58, %v10103_v27  ;;  %v5802_v11 = vmul.f32 %v10113_v14, %v10113_v14  ;;  %v5804_v49 = vmul.f32 %v10115_v36, %v10115_v36 }
 0xcbf   : > { %v5811_v28 = vmul.f32 %v5795_v60, %v10105_v25  ;;  %v5813_v44 = vmul.f32 %v5797_v63, %v10107_v35  ;;  %v5803_v7 = vmul.f32 %v10121_v40, %v10121_v40  ;;  %v5805_v19 = vmul.f32 %v10123_v62, %v10123_v62 }
 0xcc0   : > { %v5826_v61 = vmul.f32 0.044715, %v5810_v6  ;;  %v5828_v26 = vmul.f32 0.044715, %v5812_v8  ;;  %v5818_v50 = vmul.f32 %v5802_v11, %v10113_v14  ;;  %v5820_v51 = vmul.f32 %v5804_v49, %v10115_v36 }
 0xcc1   : > { %v5827_v53 = vmul.f32 0.044715, %v5811_v28  ;;  %v5829_v41 = vmul.f32 0.044715, %v5813_v44  ;;  %v5819_v42 = vmul.f32 %v5803_v7, %v10121_v40  ;;  %v5821_v46 = vmul.f32 %v5805_v19, %v10123_v62 }
 0xcc2   : > { %v5842_v52 = vadd.f32 %v5826_v61, %v10101_v20  ;;  %v5844_v47 = vadd.f32 %v5828_v26, %v10103_v27  ;;  %v5834_v48 = vmul.f32 0.044715, %v5818_v50  ;;  %v5836_v37 = vmul.f32 0.044715, %v5820_v51 }
 0xcc3   : > { %v5843_v31 = vadd.f32 %v5827_v53, %v10105_v25  ;;  %v5845_v55 = vadd.f32 %v5829_v41, %v10107_v35  ;;  %v5835_v9 = vmul.f32 0.044715, %v5819_v42  ;;  %v5837_v56 = vmul.f32 0.044715, %v5821_v46 }
 0xcc4   : > { %v5858_v59 = vmul.f32 0.7978846, %v5842_v52  ;;  %v5860_v30 = vmul.f32 0.7978846, %v5844_v47  ;;  %v5850_v29 = vadd.f32 %v5834_v48, %v10113_v14  ;;  %v5852_v38 = vadd.f32 %v5836_v37, %v10115_v36 }
 0xcc5   : > { %v5859_v2 = vmul.f32 0.7978846, %v5843_v31  ;;  %v5861_v5 = vmul.f32 0.7978846, %v5845_v55  ;;  %v5851_v39 = vadd.f32 %v5835_v9, %v10121_v40  ;;  %v5853_v32 = vadd.f32 %v5837_v56, %v10123_v62  ;;  %v8746_v56 = vld [vmem:[%s9190_s15 + $0x114] ss:$8 sps:$4 sm:$0xff]  }
 0xcc6   : > { %8921 = vtanh.f32 %v5858_v59  ;;  %v5866_v1 = vmul.f32 0.7978846, %v5850_v29  ;;  %v5868_v43 = vmul.f32 0.7978846, %v5852_v38  ;;  %v8750_v59 = vld [vmem:[%s9190_s15 + $0x130] ss:$8 sps:$4 sm:$0xff]  }
 0xcc7   : > { %8923 = vtanh.f32 %v5860_v30  ;;  %v5867_v4 = vmul.f32 0.7978846, %v5851_v39  ;;  %v5869_v12 = vmul.f32 0.7978846, %v5853_v32  ;;  %v8755_v30 = vld [vmem:[%s9190_s15 + $0x144] ss:$8 sps:$4 sm:$0xff]  }
 0xcc8   : > { %8925 = vtanh.f32 %v5859_v2  ;;  %v8753_v29 = vld [vmem:[%s9190_s15 + $0x140] ss:$8 sps:$4 sm:$0xff]   ;;  %v8758_v38 = vld [vmem:[%s9190_s15 + $0x154] ss:$8 sps:$4 sm:$0xff]   ;;  %v8756_v2 = vld [vmem:[%s9190_s15 + $0x150] ss:$8 sps:$4 sm:$0xff]  }
 0xcc9   : > { %8927 = vtanh.f32 %v5861_v5  ;;  %v8761_v5 = vld [vmem:[%s9190_s15 + $0x164] ss:$8 sps:$4 sm:$0xff]   ;;  %v4968_v39 = vsub.s32 6, %v9294_v13  ;;  %v4972_v32 = vsub.s32 7, %v9294_v13 }
 0xcca   : > { %8929 = vtanh.f32 %v5866_v1  ;;  %v8759_v1 = vld [vmem:[%s9190_s15 + $0x160] ss:$8 sps:$4 sm:$0xff]  }
 0xccb   : > { %8931 = vtanh.f32 %v5868_v43  ;;  %v4961_v43 = vrot.slane %v10089_v34, %v1017_v15 }
 0xccc   : > { %8933 = vtanh.f32 %v5867_v4  ;;  %v4969_v4 = vrot.slane %v10089_v34, %v4968_v39 }
 0xccd   : > { %8935 = vtanh.f32 %v5869_v12  ;;  %v8764_v12 = vld [vmem:[%s9190_s15 + $0x174] ss:$8 sps:$4 sm:$0xff]  }
 0xcd0   : > { %v8922_v21 = vpop.eup %8921 }
 0xcd1   : > { %v8924_v23 = vpop.eup %8923  ;;  %v5890_v57 = vadd.f32 1.0, %v8922_v21  ;;  %v4965_v21 = vrot.slane %v10089_v34, %v1021_v17 }
 0xcd2   : > { %v8926_v33 = vpop.eup %8925  ;;  %v5892_v10 = vadd.f32 1.0, %v8924_v23  ;;  %v4973_v23 = vrot.slane %v10089_v34, %v4972_v32 }
 0xcd3   : > { %v8928_v58 = vpop.eup %8927  ;;  %v5891_v16 = vadd.f32 1.0, %v8926_v33  ;;  %v5906_v6 = vmul.f32 0.5, %v5890_v57 }
 0xcd4   : > { %v8930_v3 = vpop.eup %8929  ;;  %v5893_v60 = vadd.f32 1.0, %v8928_v58  ;;  %v5908_v49 = vmul.f32 0.5, %v5892_v10  ;;  %v8762_v10 = vld [vmem:[%s9190_s15 + $0x170] ss:$8 sps:$4 sm:$0xff]  }
 0xcd5   : > { %v8932_v63 = vpop.eup %8931  ;;  %v5898_v8 = vadd.f32 1.0, %v8930_v3  ;;  %v5907_v61 = vmul.f32 0.5, %v5891_v16  ;;  %v5922_v53 = vmul.f32 %v5906_v6, %v10101_v20 }
 0xcd6   : > { %v8934_v11 = vpop.eup %8933  ;;  %v5900_v28 = vadd.f32 1.0, %v8932_v63  ;;  %v5909_v51 = vmul.f32 0.5, %v5893_v60  ;;  %v10152_v46 = vmul.f32 %v5908_v49, %v10103_v27  ;;  %v8767_v60 = vld [vmem:[%s9190_s15 + $0x184] ss:$8 sps:$4 sm:$0xff]  }
 0xcd7   : > { %v8936_v44 = vpop.eup %8935  ;;  %v5914_v7 = vmul.f32 0.5, %v5898_v8  ;;  %v5899_v19 = vadd.f32 1.0, %v8934_v11  ;;  %v5923_v48 = vmul.f32 %v5907_v61, %v10105_v25  ;;  %v8744_v25 = vld [vmem:[%s9190_s15 + $0x110] ss:$8 sps:$4 sm:$0xff]  }
 0xcd8   : > { %v5916_v26 = vmul.f32 0.5, %v5900_v28  ;;  %v5901_v50 = vadd.f32 1.0, %v8936_v44  ;;  %v5925_v20 = vmul.f32 %v5909_v51, %v10107_v35  ;;  %v8749_v35 = vld [vmem:[%s9190_s15 + $0x124] ss:$8 sps:$4 sm:$0xff]  }
 0xcd9   : > { %v5930_v41 = vmul.f32 %v5914_v7, %v10113_v14  ;;  %v5915_v42 = vmul.f32 0.5, %v5899_v19 }
 0xcda   : > { %v10155_v52 = vmul.f32 %v5916_v26, %v10115_v36  ;;  %v5917_v47 = vmul.f32 0.5, %v5901_v50  ;;  %v8741_v36 = vld [vmem:[%s9190_s15 + $0x100] ss:$8 sps:$4 sm:$0xff]  }
 0xcdb   : > { %v5931_v37 = vmul.f32 %v5915_v42, %v10121_v40  ;;  %v5938_v31 = vpack.c.bf16 %v5930_v41, %v5922_v53  ;;  %v8747_v40 = vld [vmem:[%s9190_s15 + $0x120] ss:$8 sps:$4 sm:$0xff]  }
 0xcdc   : > { %v5933_v14 = vmul.f32 %v5917_v47, %v10123_v62  ;;  %v5940_v27 = vpack.c.bf16 %v10155_v52, %v10152_v46  ;;  %v8752_v62 = vld [vmem:[%s9190_s15 + $0x134] ss:$8 sps:$4 sm:$0xff]   ;;  %v8765_v50 = vld [vmem:[%s9190_s15 + $0x180] ss:$8 sps:$4 sm:$0xff]   ;;  %v8803_v46 = vld [vmem:[%s9190_s15 + $0x244] ss:$8 sps:$4 sm:$0xff]  }
 0xcdd   : > { %v5939_v55 = vpack.c.bf16 %v5931_v37, %v5923_v48  ;;  %v8770_v47 = vld [vmem:[%s9190_s15 + $0x194] ss:$8 sps:$4 sm:$0xff]   ;;  %v8801_v52 = vld [vmem:[%s9190_s15 + $0x240] ss:$8 sps:$4 sm:$0xff]  }
 0xcde   : > { %v5941_v9 = vpack.c.bf16 %v5933_v14, %v5925_v20 }
 0xcdf   : > { %6758 = vmatprep.mubr.bf16.mxu0 %v5939_v55 }
 0xce0   : > { %6759 = vmatmul.mubr.bf16.vlgmr.msra.gmra.mrb[40].mxu0 %v5938_v31 }
 0xce1   : > { %6770 = vmatpush1.bf16.msra.mxu0 %v8741_v36  ;;  %6801 = vmatprep.mubr.bf16.mxu0 %v5941_v9 }
 0xce2   : > { %6771 = vmatprep.subr.bf16.mxu0 %v8746_v56 }
 0xce5   : > { %6772 = vmatpush1.bf16.msra.mxu0 %v8744_v25 }
 0xce6   : > { %6773 = vmatprep.subr.bf16.mxu0 %v8749_v35 }
 0xce9   : > { %6774 = vmatpush1.bf16.msra.mxu0 %v8747_v40 }
 0xcea   : > { %6775 = vmatprep.subr.bf16.mxu0 %v8752_v62  ;;  %v8768_v62 = vld [vmem:[%s9190_s15 + $0x190] ss:$8 sps:$4 sm:$0xff]  }
 0xced   : > { %6776 = vmatpush1.bf16.msra.mxu0 %v8750_v59 }
 0xcee   : > { %6777 = vmatprep.subr.bf16.mxu0 %v8755_v30 }
 0xcf1   : > { %6778 = vmatpush1.bf16.msra.mxu0 %v8753_v29 }
 0xcf2   : > { %6779 = vmatprep.subr.bf16.mxu0 %v8758_v38 }
 0xcf5   : > { %6780 = vmatpush1.bf16.msra.mxu0 %v8756_v2  ;;  %v8773_v2 = vld [vmem:[%s9190_s15 + $0x1a4] ss:$8 sps:$4 sm:$0xff]  }
 0xcf6   : > { %6781 = vmatprep.subr.bf16.mxu0 %v8761_v5 }
 0xcf9   : > { %6782 = vmatpush1.bf16.msra.mxu0 %v8759_v1  ;;  %v5742_v57 = vpop.f32.mrb[36].mxu0  ;;  %v5785_v33 = vpop.f32.mrb[72].mxu1 }
 0xcfa   : > { %v10188_v58 = vadd.f32 %v5742_v57, %v4961_v43  ;;  %v10190_v16 = vadd.f32 %v5785_v33, %v4969_v4  ;;  %6783 = vmatprep.subr.bf16.mxu0 %v8764_v12  ;;  %v5744_v3 = vpop.f32.mrb[37].mxu0  ;;  %v5787_v15 = vpop.f32.mrb[73].mxu1 }
 0xcfb   : > { %v10193_v63 = vadd.f32 %v5744_v3, %v4965_v21  ;;  %v10195_v13 = vadd.f32 %v5787_v15, %v4973_v23  ;;  %v5746_v17 = vpop.f32.mrb[38].mxu0  ;;  %v5789_v6 = vpop.f32.mrb[74].mxu1  ;;  %v8771_v3 = vld [vmem:[%s9190_s15 + $0x1a0] ss:$8 sps:$4 sm:$0xff]  }
 0xcfc   : > { %v5798_v34 = vmul.f32 %v10188_v58, %v10188_v58  ;;  %v5800_v8 = vmul.f32 %v10190_v16, %v10190_v16  ;;  %v10201_v11 = vadd.f32 %v5746_v17, %v4961_v43  ;;  %v10203_v49 = vadd.f32 %v5789_v6, %v4969_v4  ;;  %v5748_v28 = vpop.f32.mrb[39].mxu0  ;;  %v5791_v44 = vpop.f32.mrb[75].mxu1 }
 0xcfd   : > { %v5799_v7 = vmul.f32 %v10193_v63, %v10193_v63  ;;  %v5801_v19 = vmul.f32 %v10195_v13, %v10195_v13  ;;  %6784 = vmatpush1.bf16.msra.mxu0 %v8762_v10  ;;  %v10209_v61 = vadd.f32 %v5748_v28, %v4965_v21  ;;  %v10211_v26 = vadd.f32 %v5791_v44, %v4973_v23  ;;  %v8779_v28 = vld [vmem:[%s9190_s15 + $0x1c4] ss:$8 sps:$4 sm:$0xff]   ;;  %v8777_v44 = vld [vmem:[%s9190_s15 + $0x1c0] ss:$8 sps:$4 sm:$0xff]  }
 0xcfe   : > { %v5814_v51 = vmul.f32 %v5798_v34, %v10188_v58  ;;  %v5816_v53 = vmul.f32 %v5800_v8, %v10190_v16  ;;  %v5806_v41 = vmul.f32 %v10201_v11, %v10201_v11  ;;  %v5808_v42 = vmul.f32 %v10203_v49, %v10203_v49  ;;  %6785 = vmatprep.subr.bf16.mxu0 %v8767_v60  ;;  %v8776_v60 = vld [vmem:[%s9190_s15 + $0x1b4] ss:$8 sps:$4 sm:$0xff]   ;;  %v8774_v8 = vld [vmem:[%s9190_s15 + $0x1b0] ss:$8 sps:$4 sm:$0xff]  }
 0xcff   : > { %v5815_v48 = vmul.f32 %v5799_v7, %v10193_v63  ;;  %v5817_v37 = vmul.f32 %v5801_v19, %v10195_v13  ;;  %v5807_v31 = vmul.f32 %v10209_v61, %v10209_v61  ;;  %v5809_v20 = vmul.f32 %v10211_v26, %v10211_v26  ;;  %v8782_v7 = vld [vmem:[%s9190_s15 + $0x1d4] ss:$8 sps:$4 sm:$0xff]  }
 0xd00   : > { %v5830_v14 = vmul.f32 0.044715, %v5814_v51  ;;  %v5832_v55 = vmul.f32 0.044715, %v5816_v53  ;;  %v5822_v36 = vmul.f32 %v5806_v41, %v10201_v11  ;;  %v5824_v9 = vmul.f32 %v5808_v42, %v10203_v49  ;;  %v8780_v53 = vld [vmem:[%s9190_s15 + $0x1d0] ss:$8 sps:$4 sm:$0xff]  }
 0xd01   : > { %v5831_v56 = vmul.f32 0.044715, %v5815_v48  ;;  %v5833_v25 = vmul.f32 0.044715, %v5817_v37  ;;  %v5823_v35 = vmul.f32 %v5807_v31, %v10209_v61  ;;  %v5825_v40 = vmul.f32 %v5809_v20, %v10211_v26  ;;  %6786 = vmatpush1.bf16.msra.mxu0 %v8765_v50 }
 0xd02   : > { %v5846_v59 = vadd.f32 %v5830_v14, %v10188_v58  ;;  %v5848_v30 = vadd.f32 %v5832_v55, %v10190_v16  ;;  %v5838_v29 = vmul.f32 0.044715, %v5822_v36  ;;  %v5840_v38 = vmul.f32 0.044715, %v5824_v9  ;;  %6787 = vmatprep.subr.bf16.mxu0 %v8770_v47  ;;  %v8785_v47 = vld [vmem:[%s9190_s15 + $0x1e4] ss:$8 sps:$4 sm:$0xff]  }
 0xd03   : > { %v5847_v5 = vadd.f32 %v5831_v56, %v10193_v63  ;;  %v5849_v39 = vadd.f32 %v5833_v25, %v10195_v13  ;;  %v5839_v32 = vmul.f32 0.044715, %v5823_v35  ;;  %v5841_v1 = vmul.f32 0.044715, %v5825_v40  ;;  %v8783_v9 = vld [vmem:[%s9190_s15 + $0x1e0] ss:$8 sps:$4 sm:$0xff]  }
 0xd04   : > { %v5862_v43 = vmul.f32 0.7978846, %v5846_v59  ;;  %v5864_v4 = vmul.f32 0.7978846, %v5848_v30  ;;  %v5854_v12 = vadd.f32 %v5838_v29, %v10201_v11  ;;  %v5856_v21 = vadd.f32 %v5840_v38, %v10203_v49  ;;  %v8788_v40 = vld [vmem:[%s9190_s15 + $0x1f4] ss:$8 sps:$4 sm:$0xff]  }
 0xd05   : > { %v5863_v23 = vmul.f32 0.7978846, %v5847_v5  ;;  %v5865_v57 = vmul.f32 0.7978846, %v5849_v39  ;;  %v5855_v33 = vadd.f32 %v5839_v32, %v10209_v61  ;;  %v5857_v10 = vadd.f32 %v5841_v1, %v10211_v26  ;;  %6788 = vmatpush1.bf16.msra.mxu0 %v8768_v62  ;;  %v8786_v1 = vld [vmem:[%s9190_s15 + $0x1f0] ss:$8 sps:$4 sm:$0xff]  }
 0xd06   : > { %8937 = vtanh.f32 %v5862_v43  ;;  %v5870_v15 = vmul.f32 0.7978846, %v5854_v12  ;;  %6789 = vmatprep.subr.bf16.mxu0 %v8773_v2  ;;  %v5872_v17 = vmul.f32 0.7978846, %v5856_v21  ;;  %v8791_v21 = vld [vmem:[%s9190_s15 + $0x204] ss:$8 sps:$4 sm:$0xff]  }
 0xd07   : > { %8939 = vtanh.f32 %v5864_v4  ;;  %v5871_v6 = vmul.f32 0.7978846, %v5855_v33  ;;  %v5873_v34 = vmul.f32 0.7978846, %v5857_v10  ;;  %v8789_v10 = vld [vmem:[%s9190_s15 + $0x200] ss:$8 sps:$4 sm:$0xff]  }
 0xd08   : > { %8941 = vtanh.f32 %v5863_v23 }
 0xd09   : > { %8943 = vtanh.f32 %v5865_v57  ;;  %6790 = vmatpush1.bf16.msra.mxu0 %v8771_v3 }
 0xd0a   : > { %8945 = vtanh.f32 %v5870_v15  ;;  %6791 = vmatprep.subr.bf16.mxu0 %v8776_v60  ;;  %v8795_v15 = vld [vmem:[%s9190_s15 + $0x220] ss:$8 sps:$4 sm:$0xff]   ;;  %v8800_v60 = vld [vmem:[%s9190_s15 + $0x234] ss:$8 sps:$4 sm:$0xff]  }
 0xd0b   : > { %8947 = vtanh.f32 %v5872_v17  ;;  %v8798_v17 = vld [vmem:[%s9190_s15 + $0x230] ss:$8 sps:$4 sm:$0xff]  }
 0xd0c   : > { %8949 = vtanh.f32 %v5871_v6  ;;  %v8804_v6 = vld [vmem:[%s9190_s15 + $0x250] ss:$8 sps:$4 sm:$0xff]  }
 0xd0d   : > { %8951 = vtanh.f32 %v5873_v34  ;;  %6792 = vmatpush1.bf16.msra.mxu0 %v8774_v8  ;;  %v8809_v34 = vld [vmem:[%s9190_s15 + $0x264] ss:$8 sps:$4 sm:$0xff]   ;;  %v8807_v8 = vld [vmem:[%s9190_s15 + $0x260] ss:$8 sps:$4 sm:$0xff]  }
 0xd0e   : > { %6793 = vmatprep.subr.bf16.mxu0 %v8779_v28  ;;  %v8812_v28 = vld [vmem:[%s9190_s15 + $0x274] ss:$8 sps:$4 sm:$0xff]  }
 0xd10   : > { %v8938_v19 = vpop.eup %8937 }
 0xd11   : > { %v8940_v50 = vpop.eup %8939  ;;  %v5894_v51 = vadd.f32 1.0, %v8938_v19  ;;  %6794 = vmatpush1.bf16.msra.mxu0 %v8777_v44  ;;  %v8810_v44 = vld [vmem:[%s9190_s15 + $0x270] ss:$8 sps:$4 sm:$0xff]   ;;  %v8813_v19 = vld [vmem:[%s9190_s15 + $0x280] ss:$8 sps:$4 sm:$0xff]  }
 0xd12   : > { %v8942_v41 = vpop.eup %8941  ;;  %v5896_v42 = vadd.f32 1.0, %v8940_v50  ;;  %6795 = vmatprep.subr.bf16.mxu0 %v8782_v7  ;;  %v8815_v7 = vld [vmem:[%s9190_s15 + $0x284] ss:$8 sps:$4 sm:$0xff]   ;;  %v8818_v50 = vld [vmem:[%s9190_s15 + $0x294] ss:$8 sps:$4 sm:$0xff]  }
 0xd13   : > { %v8944_v48 = vpop.eup %8943  ;;  %v5895_v37 = vadd.f32 1.0, %v8942_v41  ;;  %v5910_v55 = vmul.f32 0.5, %v5894_v51  ;;  %v8816_v51 = vld [vmem:[%s9190_s15 + $0x290] ss:$8 sps:$4 sm:$0xff]   ;;  %v8819_v41 = vld [vmem:[%s9190_s15 + $0x2a0] ss:$8 sps:$4 sm:$0xff]  }
 0xd14   : > { %v8946_v31 = vpop.eup %8945  ;;  %v5897_v20 = vadd.f32 1.0, %v8944_v48  ;;  %v5912_v25 = vmul.f32 0.5, %v5896_v42  ;;  %v8824_v42 = vld [vmem:[%s9190_s15 + $0x2b4] ss:$8 sps:$4 sm:$0xff]   ;;  %v8827_v48 = vld [vmem:[%s9190_s15 + $0x2c4] ss:$8 sps:$4 sm:$0xff]  }
 0xd15   : > { %v8948_v14 = vpop.eup %8947  ;;  %v5902_v36 = vadd.f32 1.0, %v8946_v31  ;;  %6796 = vmatpush1.bf16.msra.mxu0 %v8780_v53  ;;  %v5911_v29 = vmul.f32 0.5, %v5895_v37  ;;  %v10252_v39 = vmul.f32 %v5910_v55, %v10188_v58  ;;  %v8821_v53 = vld [vmem:[%s9190_s15 + $0x2a4] ss:$8 sps:$4 sm:$0xff]   ;;  %v8825_v37 = vld [vmem:[%s9190_s15 + $0x2c0] ss:$8 sps:$4 sm:$0xff]  }
 0xd16   : > { %v8950_v56 = vpop.eup %8949  ;;  %v5904_v35 = vadd.f32 1.0, %v8948_v14  ;;  %6797 = vmatprep.subr.bf16.mxu0 %v8785_v47  ;;  %v5913_v5 = vmul.f32 0.5, %v5897_v20  ;;  %v10259_v4 = vmul.f32 %v5912_v25, %v10190_v16  ;;  %v8822_v47 = vld [vmem:[%s9190_s15 + $0x2b0] ss:$8 sps:$4 sm:$0xff]   ;;  %v8830_v31 = vld [vmem:[%s9190_s15 + $0x2d4] ss:$8 sps:$4 sm:$0xff]  }
 0xd17   : > { %v8952_v62 = vpop.eup %8951  ;;  %v5918_v59 = vmul.f32 0.5, %v5902_v36  ;;  %v5903_v30 = vadd.f32 1.0, %v8950_v56  ;;  %v5927_v58 = vmul.f32 %v5911_v29, %v10193_v63  ;;  %v8828_v20 = vld [vmem:[%s9190_s15 + $0x2d0] ss:$8 sps:$4 sm:$0xff]   ;;  %v8833_v14 = vld [vmem:[%s9190_s15 + $0x2e4] ss:$8 sps:$4 sm:$0xff]  }
 0xd18   : > { %v5920_v38 = vmul.f32 0.5, %v5904_v35  ;;  %v5905_v2 = vadd.f32 1.0, %v8952_v62  ;;  %v10270_v33 = vmul.f32 %v5913_v5, %v10195_v13  ;;  %v8792_v13 = vld [vmem:[%s9190_s15 + $0x210] ss:$8 sps:$4 sm:$0xff]   ;;  %v8831_v55 = vld [vmem:[%s9190_s15 + $0x2e0] ss:$8 sps:$4 sm:$0xff]  }
 0xd19   : > { %v10255_v32 = vmul.f32 %v5918_v59, %v10201_v11  ;;  %6798 = vmatpush1.bf16.msra.mxu0 %v8783_v9  ;;  %v5919_v43 = vmul.f32 0.5, %v5903_v30  ;;  %v8836_v36 = vld [vmem:[%s9190_s15 + $0x2f4] ss:$8 sps:$4 sm:$0xff]   ;;  %v8834_v9 = vld [vmem:[%s9190_s15 + $0x2f0] ss:$8 sps:$4 sm:$0xff]  }
 0xd1a   : > { %v10262_v12 = vmul.f32 %v5920_v38, %v10203_v49  ;;  %6799 = vmatprep.subr.bf16.mxu0 %v8788_v40  ;;  %v5921_v23 = vmul.f32 0.5, %v5905_v2  ;;  %v8839_v56 = vld [vmem:[%s9190_s15 + $0x304] ss:$8 sps:$4 sm:$0xff]   ;;  %v8837_v25 = vld [vmem:[%s9190_s15 + $0x300] ss:$8 sps:$4 sm:$0xff]  }
 0xd1b   : > { %v5935_v11 = vmul.f32 %v5919_v43, %v10209_v61  ;;  %v5942_v57 = vpack.c.bf16 %v10255_v32, %v10252_v39  ;;  %v8794_v61 = vld [vmem:[%s9190_s15 + $0x214] ss:$8 sps:$4 sm:$0xff]   ;;  %v8840_v40 = vld [vmem:[%s9190_s15 + $0x310] ss:$8 sps:$4 sm:$0xff]   ;;  %v8845_v62 = vld [vmem:[%s9190_s15 + $0x324] ss:$8 sps:$4 sm:$0xff]  }
 0xd1c   : > { %v10273_v16 = vmul.f32 %v5921_v23, %v10211_v26  ;;  %v5944_v49 = vpack.c.bf16 %v10262_v12, %v10259_v4  ;;  %v8797_v26 = vld [vmem:[%s9190_s15 + $0x224] ss:$8 sps:$4 sm:$0xff]   ;;  %v8842_v35 = vld [vmem:[%s9190_s15 + $0x314] ss:$8 sps:$4 sm:$0xff]   ;;  %v8843_v59 = vld [vmem:[%s9190_s15 + $0x320] ss:$8 sps:$4 sm:$0xff]  }
 0xd1d   : > { %6800 = vmatpush1.bf16.msra.mxu0 %v8786_v1  ;;  %v5943_v63 = vpack.c.bf16 %v5935_v11, %v5927_v58  ;;  %v8848_v30 = vld [vmem:[%s9190_s15 + $0x334] ss:$8 sps:$4 sm:$0xff]   ;;  %v8846_v29 = vld [vmem:[%s9190_s15 + $0x330] ss:$8 sps:$4 sm:$0xff]   ;;  %v8851_v38 = vld [vmem:[%s9190_s15 + $0x344] ss:$8 sps:$4 sm:$0xff]  }
 0xd1e   : > { %6812 = vmatprep.subr.bf16.mxu0 %v8791_v21  ;;  %v5945_v3 = vpack.c.bf16 %v10273_v16, %v10270_v33  ;;  %v8849_v2 = vld [vmem:[%s9190_s15 + $0x340] ss:$8 sps:$4 sm:$0xff]   ;;  %v8854_v5 = vld [vmem:[%s9190_s15 + $0x354] ss:$8 sps:$4 sm:$0xff]   ;;  %v8852_v39 = vld [vmem:[%s9190_s15 + $0x350] ss:$8 sps:$4 sm:$0xff]  }
 0xd1f   : > { %v8857_v32 = vld [vmem:[%s9190_s15 + $0x364] ss:$8 sps:$4 sm:$0xff]   ;;  %v8855_v1 = vld [vmem:[%s9190_s15 + $0x360] ss:$8 sps:$4 sm:$0xff]   ;;  %v8860_v43 = vld [vmem:[%s9190_s15 + $0x374] ss:$8 sps:$4 sm:$0xff]  }
 0xd20   : > { %6802 = vmatmul.mubr.bf16.vlgmr.msra.gmra.mrb[40].mxu0 %v5940_v27  ;;  %v8806_v27 = vld [vmem:[%s9190_s15 + $0x254] ss:$8 sps:$4 sm:$0xff]   ;;  %v8858_v21 = vld [vmem:[%s9190_s15 + $0x370] ss:$8 sps:$4 sm:$0xff]   ;;  %v8863_v23 = vld [vmem:[%s9190_s15 + $0x384] ss:$8 sps:$4 sm:$0xff]  }
 0xd21   : > { %6813 = vmatpush1.bf16.msra.mxu0 %v8789_v10  ;;  %6844 = vmatprep.mubr.bf16.mxu0 %v5943_v63  ;;  %v8861_v58 = vld [vmem:[%s9190_s15 + $0x380] ss:$8 sps:$4 sm:$0xff]   ;;  %v8866_v11 = vld [vmem:[%s9190_s15 + $0x394] ss:$8 sps:$4 sm:$0xff]   ;;  %v8869_v33 = vld [vmem:[%s9190_s15 + $0x3a4] ss:$8 sps:$4 sm:$0xff]  }
 0xd22   : > { %6814 = vmatprep.subr.bf16.mxu0 %v8794_v61  ;;  %v8867_v16 = vld [vmem:[%s9190_s15 + $0x3a0] ss:$8 sps:$4 sm:$0xff]   ;;  %v8872_v10 = vld [vmem:[%s9190_s15 + $0x3b4] ss:$8 sps:$4 sm:$0xff]   ;;  %v8870_v63 = vld [vmem:[%s9190_s15 + $0x3b0] ss:$8 sps:$4 sm:$0xff]  }
 0xd23   : > { %v8875_v61 = vld [vmem:[%s9190_s15 + $0x3c4] ss:$8 sps:$4 sm:$0xff]  }
 0xd25   : > { %6815 = vmatpush1.bf16.msra.mxu0 %v8792_v13  ;;  %v8878_v13 = vld [vmem:[%s9190_s15 + $0x3d4] ss:$8 sps:$4 sm:$0xff]  }
 0xd26   : > { %6816 = vmatprep.subr.bf16.mxu0 %v8797_v26  ;;  %v8876_v26 = vld [vmem:[%s9190_s15 + $0x3d0] ss:$8 sps:$4 sm:$0xff]  }
 0xd29   : > { %6817 = vmatpush1.bf16.msra.mxu0 %v8795_v15  ;;  %v8881_v15 = vld [vmem:[%s9190_s15 + $0x3e4] ss:$8 sps:$4 sm:$0xff]  }
 0xd2a   : > { %6818 = vmatprep.subr.bf16.mxu0 %v8800_v60  ;;  %v8879_v60 = vld [vmem:[%s9190_s15 + $0x3e0] ss:$8 sps:$4 sm:$0xff]  }
 0xd2d   : > { %6819 = vmatpush1.bf16.msra.mxu0 %v8798_v17  ;;  %v8884_v17 = vld [vmem:[%s9190_s15 + $0x3f4] ss:$8 sps:$4 sm:$0xff]  }
 0xd2e   : > { %6820 = vmatprep.subr.bf16.mxu0 %v8803_v46  ;;  %v8882_v46 = vld [vmem:[%s9190_s15 + $0x3f0] ss:$8 sps:$4 sm:$0xff]  }
 0xd31   : > { %6821 = vmatpush1.bf16.msra.mxu0 %v8801_v52  ;;  %v6074_v52 = vld [vmem:[%s859_s14] sm:$0x3] }
 0xd32   : > { %6822 = vmatprep.subr.bf16.mxu0 %v8806_v27  ;;  %v6079_v27 = vrot.slane %v6074_v52, %v9301_v18 }
 0xd35   : > { %6823 = vmatpush1.bf16.msra.mxu0 %v8804_v6  ;;  %v6083_v6 = vrot.slane %v6074_v52, %v9316_v24 }
 0xd36   : > { %6824 = vmatprep.subr.bf16.mxu0 %v8809_v34 }
 0xd39   : > { %6825 = vmatpush1.bf16.msra.mxu0 %v8807_v8 }
 0xd3a   : > { %6826 = vmatprep.subr.bf16.mxu0 %v8812_v28 }
 0xd3d   : > { %6827 = vmatpush1.bf16.msra.mxu0 %v8810_v44 }
 0xd3e   : > { %6828 = vmatprep.subr.bf16.mxu0 %v8815_v7 }
 0xd41   : > { %6829 = vmatpush1.bf16.msra.mxu0 %v8813_v19 }
 0xd42   : > { %6830 = vmatprep.subr.bf16.mxu0 %v8818_v50 }
 0xd45   : > { %6831 = vmatpush1.bf16.msra.mxu0 %v8816_v51 }
 0xd46   : > { %6832 = vmatprep.subr.bf16.mxu0 %v8821_v53 }
 0xd49   : > { %6833 = vmatpush1.bf16.msra.mxu0 %v8819_v41 }
 0xd4a   : > { %6834 = vmatprep.subr.bf16.mxu0 %v8824_v42 }
 0xd4d   : > { %6835 = vmatpush1.bf16.msra.mxu0 %v8822_v47 }
 0xd4e   : > { %6836 = vmatprep.subr.bf16.mxu0 %v8827_v48 }
 0xd51   : > { %6837 = vmatpush1.bf16.msra.mxu0 %v8825_v37 }
 0xd52   : > { %6838 = vmatprep.subr.bf16.mxu0 %v8830_v31 }
 0xd55   : > { %6839 = vmatpush1.bf16.msra.mxu0 %v8828_v20 }
 0xd56   : > { %6840 = vmatprep.subr.bf16.mxu0 %v8833_v14 }
 0xd59   : > { %6841 = vmatpush1.bf16.msra.mxu0 %v8831_v55 }
 0xd5a   : > { %6842 = vmatprep.subr.bf16.mxu0 %v8836_v36 }
 0xd5d   : > { %6843 = vmatpush1.bf16.msra.mxu0 %v8834_v9 }
 0xd5e   : > { %6855 = vmatprep.subr.bf16.mxu0 %v8839_v56 }
 0xd60   : > { %6845 = vmatmul.mubr.bf16.vlgmr.msra.gmra.mrb[40].mxu0 %v5942_v57  ;;  %v8864_v57 = vld [vmem:[%s9190_s15 + $0x390] ss:$8 sps:$4 sm:$0xff]  }
 0xd61   : > { %6856 = vmatpush1.bf16.msra.mxu0 %v8837_v25  ;;  %6887 = vmatprep.mubr.bf16.mxu0 %v5945_v3  ;;  %v8873_v3 = vld [vmem:[%s9190_s15 + $0x3c0] ss:$8 sps:$4 sm:$0xff]  }
 0xd62   : > { %6857 = vmatprep.subr.bf16.mxu0 %v8842_v35 }
 0xd65   : > { %6858 = vmatpush1.bf16.msra.mxu0 %v8840_v40 }
 0xd66   : > { %6859 = vmatprep.subr.bf16.mxu0 %v8845_v62 }
 0xd69   : > { %6860 = vmatpush1.bf16.msra.mxu0 %v8843_v59 }
 0xd6a   : > { %6861 = vmatprep.subr.bf16.mxu0 %v8848_v30 }
 0xd6d   : > { %6862 = vmatpush1.bf16.msra.mxu0 %v8846_v29  ;;  %v6902_v29 = vld [vmem:[%s867_s16] sm:$0x3] }
 0xd6e   : > { %6863 = vmatprep.subr.bf16.mxu0 %v8851_v38  ;;  %v6903_v38 = vld [vmem:[%s875_s1] sm:$0x3] }
 0xd71   : > { %6864 = vmatpush1.bf16.msra.mxu0 %v8849_v2  ;;  %v6940_v2 = vrot.slane %v6902_v29, %v9301_v18 }
 0xd72   : > { %6865 = vmatprep.subr.bf16.mxu0 %v8854_v5  ;;  %v6944_v5 = vrot.slane %v6902_v29, %v9316_v24 }
 0xd75   : > { %6866 = vmatpush1.bf16.msra.mxu0 %v8852_v39 }
 0xd76   : > { %6867 = vmatprep.subr.bf16.mxu0 %v8857_v32  ;;  %v6955_v32 = vrot.slane %v6903_v38, %v9301_v18 }
 0xd79   : > { %6868 = vmatpush1.bf16.msra.mxu0 %v8855_v1  ;;  %v6959_v1 = vrot.slane %v6903_v38, %v9316_v24 }
 0xd7a   : > { %6869 = vmatprep.subr.bf16.mxu0 %v8860_v43 }
 0xd7d   : > { %6870 = vmatpush1.bf16.msra.mxu0 %v8858_v21 }
 0xd7e   : > { %6871 = vmatprep.subr.bf16.mxu0 %v8863_v23 }
 0xd81   : > { %6872 = vmatpush1.bf16.msra.mxu0 %v8861_v58 }
 0xd82   : > { %6873 = vmatprep.subr.bf16.mxu0 %v8866_v11 }
 0xd85   : > { %6874 = vmatpush1.bf16.msra.mxu0 %v8864_v57 }
 0xd86   : > { %6875 = vmatprep.subr.bf16.mxu0 %v8869_v33 }
 0xd89   : > { %6876 = vmatpush1.bf16.msra.mxu0 %v8867_v16 }
 0xd8a   : > { %6877 = vmatprep.subr.bf16.mxu0 %v8872_v10 }
 0xd8d   : > { %6878 = vmatpush1.bf16.msra.mxu0 %v8870_v63 }
 0xd8e   : > { %6879 = vmatprep.subr.bf16.mxu0 %v8875_v61 }
 0xd91   : > { %6880 = vmatpush1.bf16.msra.mxu0 %v8873_v3 }
 0xd92   : > { %6881 = vmatprep.subr.bf16.mxu0 %v8878_v13 }
 0xd95   : > { %6882 = vmatpush1.bf16.msra.mxu0 %v8876_v26 }
 0xd96   : > { %6883 = vmatprep.subr.bf16.mxu0 %v8881_v15 }
 0xd99   : > { %6884 = vmatpush1.bf16.msra.mxu0 %v8879_v60 }
 0xd9a   : > { %6885 = vmatprep.subr.bf16.mxu0 %v8884_v17 }
 0xd9d   : > { %6886 = vmatpush1.bf16.msra.mxu0 %v8882_v46 }
 0xda0   : > { %6888 = vmatmul.mubr.bf16.vlgmr.msra.gmra.mrb[40].mxu0 %v5944_v49 }
 0xe73   : > { %v6889_v34 = vpop.f32.mrb[40].mxu0 }
 0xe74   : > { %v8289_v8 = vadd.f32 %v6889_v34, %v6079_v27  ;;  %v6891_v28 = vpop.f32.mrb[41].mxu0 }
 0xe75   : > { %v8290_v44 = vadd.f32 %v6891_v28, %v6083_v6  ;;  %v6893_v7 = vpop.f32.mrb[42].mxu0 }
 0xe76   : > { %v6898_v19 = vadd.f32 %v8289_v8, %v9977_v45  ;;  %v8291_v50 = vadd.f32 %v6893_v7, %v6079_v27  ;;  %v6895_v51 = vpop.f32.mrb[43].mxu0 }
 0xe77   : > { %v6899_v4 = vadd.f32 %v8290_v44, %v9973_v22  ;;  %v8292_v12 = vadd.f32 %v6895_v51, %v6083_v6 }
 0xe78   : > { %v6900_v49 = vadd.f32 %v8291_v50, %v9979_v54 }
 0xe79   : > { %v6901_v53 = vadd.f32 %v8292_v12, %v9975_v0  ;;  %v6904_v41 = vadd.f32 %v6899_v4, %v6898_v19 }
 0xe7b   : > { %6905 = vadd.xlane.f32.xlu0 %v6904_v41  ;;  %v6907_v42 = vadd.f32 %v6901_v53, %v6900_v49 }
 0xe7d   : > { %6908 = vadd.xlane.f32.xlu1 %v6907_v42 }
 0xf08   : > { %v6906_v47 = vpop.xlane.xlu0 %6905 }
 0xf09   : > { %v6910_v48 = vmul.f32 0.00390625, %v6906_v47 }
 0xf0a   : > { %v6909_v37 = vpop.xlane.xlu1 %6908 }
 0xf0b   : > { %v6912_v31 = vsub.f32 %v6898_v19, %v6910_v48  ;;  %v6913_v20 = vsub.f32 %v6899_v4, %v6910_v48  ;;  %v6911_v14 = vmul.f32 0.00390625, %v6909_v37 }
 0xf0d   : > { %v6916_v45 = vmul.f32 %v6912_v31, %v6912_v31  ;;  %v6917_v55 = vmul.f32 %v6913_v20, %v6913_v20  ;;  %v6914_v36 = vsub.f32 %v6900_v49, %v6911_v14  ;;  %v6915_v22 = vsub.f32 %v6901_v53, %v6911_v14 }
 0xf0f   : > { %v6918_v9 = vmul.f32 %v6914_v36, %v6914_v36  ;;  %v6919_v54 = vmul.f32 %v6915_v22, %v6915_v22  ;;  %v6920_v56 = vadd.f32 %v6917_v55, %v6916_v45 }
 0xf11   : > { %6921 = vadd.xlane.f32.xlu0 %v6920_v56  ;;  %v6923_v0 = vadd.f32 %v6919_v54, %v6918_v9 }
 0xf13   : > { %6924 = vadd.xlane.f32.xlu1 %v6923_v0 }
 0xf9e   : > { %v6922_v25 = vpop.xlane.xlu0 %6921 }
 0xf9f   : > { %v6926_v35 = vmul.f32 0.00390625, %v6922_v25 }
 0xfa0   : > { %v6925_v40 = vpop.xlane.xlu1 %6924 }
 0xfa1   : > { %v6928_v62 = vadd.f32 1e-12, %v6926_v35  ;;  %v6927_v59 = vmul.f32 0.00390625, %v6925_v40 }
 0xfa3   : > { %8953 = vrsqrt.f32 %v6928_v62  ;;  %v6929_v30 = vadd.f32 1e-12, %v6927_v59 }
 0xfa5   : > { %8955 = vrsqrt.f32 %v6929_v30 }
 0xfad   : > { %v8954_v39 = vpop.eup %8953 }
 0xfae   : > { %v6932_v43 = vmul.f32 %v8954_v39, %v6912_v31  ;;  %v6933_v21 = vmul.f32 %v8954_v39, %v6913_v20 }
 0xfaf   : > { %v8956_v23 = vpop.eup %8955 }
 0xfb0   : > { %v6947_v58 = vmul.f32 %v6940_v2, %v6932_v43  ;;  %v6948_v11 = vmul.f32 %v6944_v5, %v6933_v21  ;;  %v6934_v57 = vmul.f32 %v8956_v23, %v6914_v36  ;;  %v6935_v33 = vmul.f32 %v8956_v23, %v6915_v22 }
 0xfb2   : > { %v6962_v16 = vadd.f32 %v6955_v32, %v6947_v58  ;;  %v6963_v10 = vadd.f32 %v6959_v1, %v6948_v11  ;;  %v6949_v63 = vmul.f32 %v6940_v2, %v6934_v57  ;;  %v6950_v61 = vmul.f32 %v6944_v5, %v6935_v33 }
 0xfb4   : > { %6966 = vst [vmem:[%s9209_s9] sm:$0xff] %v6962_v16  ;;  %6967 = vst [vmem:[%s9209_s9 + $0x8] sm:$0xff] %v6963_v10  ;;  %v6964_v3 = vadd.f32 %v6955_v32, %v6949_v63  ;;  %v6965_v13 = vadd.f32 %v6959_v1, %v6950_v61 }
 0xfb6   : > { %6968 = vst [vmem:[%s9209_s9 + $0x10] sm:$0xff] %v6964_v3  ;;  %6969 = vst [vmem:[%s9209_s9 + $0x18] sm:$0xff] %v6965_v13 }
 0xfb7 PF: > { %s10461_s19 = sld [smem:[#allocation5_spill]]  ;;  %s10462_s29 = sld [smem:[#allocation3_spill]] }
 0xfb8   : > { %s10463_s30 = sld [smem:[#allocation4_spill]]  ;;  %s10464_s15 = sld [smem:[#allocation6_spill]] }
 0xfb9   : > { %s10465_s16 = sld [smem:[#allocation7_spill]] }
 0xfbd   : > { %s24_s17 = sadd.s32 1, %s10461_s19  }
 0xfbe   : > { %p21_p8 = scmp.ge.s32.totalorder %s24_s17, 6  }
 0xfc0   :  { %23 = sbr.rel (!%p21_p8) target bundleno = 10 (0xa), region = 149 }

</bundles_post_ra>
